<compile_context>
chip_gen: v6e
topology: v6e:2x2x1
jax: 0.10.0
libtpu: 0.0.40
codegen_flags: <defaults>
</compile_context>

<pallas_src>
import math
import functools

import jax
import jax.numpy as jnp
from jax import lax
from jax.experimental import pallas as pl
from jax.experimental.pallas import tpu as pltpu

# ----------------------------- model hyper-params ---------------------------
INPUT_SIZE = 16
OUTPUT_SIZE = 12
HIDDEN_SIZE = 32
N_HEADS = 4
N_LAYERS = 2
BATCH_SIZE = 2
SEQ_LEN = 8            # "time" length of `inputs` before .view(-1, input_size)
MEM_LEN = 8            # memory sequence length
FFN_SIZE = 2048        # nn.TransformerDecoderLayer default dim_feedforward
LN_EPS = 1e-5          # nn.LayerNorm default
N_TOKENS = SEQ_LEN * BATCH_SIZE

# Row layout of the packed per-layer vector array `lvec` [N_LAYERS, 16, E].
_SA_BQ, _SA_BK, _SA_BV, _SA_BO = 0, 1, 2, 3
_CA_BQ, _CA_BK, _CA_BV, _CA_BO = 4, 5, 6, 7
_FFN_B2 = 8
_LN1_G, _LN1_B, _LN2_G, _LN2_B, _LN3_G, _LN3_B = 9, 10, 11, 12, 13, 14
_N_VEC = 16            # padded to 2 sublane tiles


# ------------------------------ fused Pallas kernel --------------------------
def _decoder_kernel(
    # globals (constant block index)
    x_ref, mem_ref, embed_w_ref, out_w_ref, gvec_ref,
    # per-layer weights (block index = layer -> streamed / double-buffered)
    sa_wqkv_ref, sa_wo_ref, ca_wqkv_ref, ca_wo_ref,
    ffn_w1_ref, ffn_w2t_ref, ffn_b1_ref, lvec_ref,
    # outputs
    out_ref, tfm_ref,
    # scratch: running activation, persists across grid steps
    t_ref,
    *, n_heads, eps):
    """One transformer-decoder layer per grid step; activations stay in VMEM."""
    e = t_ref.shape[-1]
    d = e // n_heads
    scale = 1.0 / math.sqrt(d)
    layer = pl.program_id(0)

    def row(r):                                   # [1, E] packed per-layer vec
        return lvec_ref[r:r + 1, :]

    def layer_norm(y, g, b):                      # single-pass LayerNorm
        mu = jnp.mean(y, axis=-1, keepdims=True)
        c = y - mu
        var = jnp.mean(c * c, axis=-1, keepdims=True)
        return c * (g * lax.rsqrt(var + eps)) + b

    def mha(q, k, v, wo):
        """Multi-head attention; per-head scores stacked along sublanes so ONE
        softmax (and one EUP reciprocal) covers all heads."""
        tq = q.shape[0]
        q = q * scale
        parts = [
            lax.dot_general(q[:, h * d:(h + 1) * d], k[:, h * d:(h + 1) * d],
                            (((1,), (1,)), ((), ())),
                            preferred_element_type=jnp.float32)
            for h in range(n_heads)
        ]
        s = jnp.concatenate(parts, axis=0)                     # [H*T, S]
        s = s - jnp.max(s, axis=-1, keepdims=True)
        p = jnp.exp(s)
        p = p * pl.reciprocal(jnp.sum(p, axis=-1, keepdims=True), approx=True)
        out = None
        for h in range(n_heads):
            ctx_h = jnp.dot(p[h * tq:(h + 1) * tq, :], v[:, h * d:(h + 1) * d],
                            preferred_element_type=jnp.float32)        # [T, d]
            # concat(heads) @ Wo == sum_h head_h @ Wo[h*d:(h+1)*d, :]
            contrib = jnp.dot(ctx_h, wo[h * d:(h + 1) * d, :],
                              preferred_element_type=jnp.float32)
            out = contrib if out is None else out + contrib
        return out

    # ---- embed (first grid step only):  t = x @ We + be ---------------------
    @pl.when(layer == 0)
    def _():
        t_ref[...] = (jnp.dot(x_ref[...], embed_w_ref[...],
                              preferred_element_type=jnp.float32)
                      + gvec_ref[0:1, :])

    t = t_ref[...]
    mem = mem_ref[...]

    # ---- self-attention block (post-norm) ------------------------------------
    qkv = jnp.dot(t, sa_wqkv_ref[...], preferred_element_type=jnp.float32)
    sa = mha(qkv[:, :e] + row(_SA_BQ),
             qkv[:, e:2 * e] + row(_SA_BK),
             qkv[:, 2 * e:] + row(_SA_BV),
             sa_wo_ref[...]) + row(_SA_BO)
    t = layer_norm(t + sa, row(_LN1_G), row(_LN1_B))

    # ---- cross-attention block (post-norm) ------------------------------------
    ca_wqkv = ca_wqkv_ref[...]
    q = jnp.dot(t, ca_wqkv[:, :e], preferred_element_type=jnp.float32) + row(_CA_BQ)
    kv = jnp.dot(mem, ca_wqkv[:, e:], preferred_element_type=jnp.float32)
    ca = mha(q,
             kv[:, :e] + row(_CA_BK),
             kv[:, e:] + row(_CA_BV),
             ca_wo_ref[...]) + row(_CA_BO)
    t = layer_norm(t + ca, row(_LN2_G), row(_LN2_B))

    # ---- feed-forward block (ReLU); dropout = identity in eval mode ----------
    hid = jnp.maximum(jnp.dot(t, ffn_w1_ref[...],
                              preferred_element_type=jnp.float32)
                      + ffn_b1_ref[...], 0.0)
    # ffn_w2 stored transposed ([E, F], lane-dense): contract the last dims.
    f = lax.dot_general(hid, ffn_w2t_ref[...], (((1,), (1,)), ((), ())),
                        preferred_element_type=jnp.float32) + row(_FFN_B2)
    t = layer_norm(t + f, row(_LN3_G), row(_LN3_B))

    t_ref[...] = t

    # ---- output projection (last grid step only) ------------------------------
    @pl.when(layer == pl.num_programs(0) - 1)
    def _():
        tfm_ref[...] = t.astype(tfm_ref.dtype)
        out_ref[...] = (jnp.dot(t, out_w_ref[...],
                                preferred_element_type=jnp.float32)
                        + gvec_ref[1:2, :out_ref.shape[-1]]).astype(out_ref.dtype)


# --------------------------- parameter construction --------------------------
def make_params(key):
    def nxt():
        nonlocal key
        key, sub = jax.random.split(key)
        return sub

    def w(shape, scale=0.05):
        return (scale * jax.random.normal(nxt(), shape)).astype(jnp.float32)

    E, F, L = HIDDEN_SIZE, FFN_SIZE, N_LAYERS

    # gvec: row 0 = embed bias, row 1 = output bias (padded to E lanes).
    gvec = jnp.zeros((2, E), jnp.float32)
    gvec = gvec.at[0, :].set(w((E,)))
    gvec = gvec.at[1, :OUTPUT_SIZE].set(w((OUTPUT_SIZE,)))

    # lvec: all small per-layer biases / LayerNorm params packed into [L,16,E].
    lvec = jnp.zeros((L, _N_VEC, E), jnp.float32)
    for r in (_SA_BQ, _SA_BK, _SA_BV, _SA_BO,
              _CA_BQ, _CA_BK, _CA_BV, _CA_BO, _FFN_B2):
        lvec = lvec.at[:, r, :].set(w((L, E), scale=0.02))
    for r in (_LN1_G, _LN2_G, _LN3_G):
        lvec = lvec.at[:, r, :].set(1.0)
    # LayerNorm biases (rows _LN*_B) stay zero, as in torch's default init.

    # NOTE for loading real PyTorch weights: nn.Linear / in_proj weights are
    # stored [out, in]; embed/out/ffn_w1/wqkv/wo below use [in, out] and must
    # be transposed, while ffn_w2t already matches linear2.weight ([E, F]).
    return {
        "embed_w": w((INPUT_SIZE, E)),
        "out_w": w((E, OUTPUT_SIZE)),
        "gvec": gvec,
        "sa_wqkv": w((L, E, 3 * E)),     # packed Q|K|V, [in, out]
        "sa_wo": w((L, E, E)),
        "ca_wqkv": w((L, E, 3 * E)),
        "ca_wo": w((L, E, E)),
        "ffn_w1": w((L, E, F)),
        "ffn_w2t": w((L, E, F)),         # W2 transposed (lane-dense)
        "ffn_b1": w((L, 1, F), scale=0.02),
        "lvec": lvec,
    }


# --------------------------------- forward -----------------------------------
def _full_spec(shape):
    return pl.BlockSpec(tuple(shape), lambda l: (0,) * len(shape))


def _layer_spec(shape):
    return pl.BlockSpec((None,) + tuple(shape), lambda l: (l,) + (0,) * len(shape))


def decoder_forward(inputs, memory, params):
    # embedded = self.embed(inputs.view(-1, input_size)) and the rest of the
    # forward are fused into ONE pallas_call; only the reshape stays outside.
    x = inputs.reshape(-1, INPUT_SIZE)
    n_tok = x.shape[0]
    e = HIDDEN_SIZE

    kernel = functools.partial(_decoder_kernel, n_heads=N_HEADS, eps=LN_EPS)

    grid_spec = pltpu.PrefetchScalarGridSpec(
        num_scalar_prefetch=0,
        grid=(N_LAYERS,),                       # one decoder layer per step
        in_specs=[
            _full_spec(x.shape),                # x
            _full_spec(memory.shape),           # memory
            _full_spec((INPUT_SIZE, e)),        # embed_w
            _full_spec((e, OUTPUT_SIZE)),       # out_w
            _full_spec((2, e)),                 # gvec (embed_b | out_b)
            _layer_spec((e, 3 * e)),            # sa_wqkv
            _layer_spec((e, e)),                # sa_wo
            _layer_spec((e, 3 * e)),            # ca_wqkv
            _layer_spec((e, e)),                # ca_wo
            _layer_spec((e, FFN_SIZE)),         # ffn_w1
            _layer_spec((e, FFN_SIZE)),         # ffn_w2t (lane-dense)
            _layer_spec((1, FFN_SIZE)),         # ffn_b1
            _layer_spec((_N_VEC, e)),           # lvec (packed biases / LN)
        ],
        out_specs=(
            _full_spec((n_tok, OUTPUT_SIZE)),   # out
            _full_spec((n_tok, e)),             # transformer_output
        ),
        scratch_shapes=[pltpu.VMEM((n_tok, e), jnp.float32)],
    )

    out, tfm = pl.pallas_call(
        kernel,
        out_shape=(jax.ShapeDtypeStruct((n_tok, OUTPUT_SIZE), jnp.float32),
                   jax.ShapeDtypeStruct((n_tok, e), jnp.float32)),
        grid_spec=grid_spec,
        compiler_params=pltpu.CompilerParams(
            dimension_semantics=("arbitrary",),       # layer axis carries state
            vmem_limit_bytes=16 * 1024 * 1024),
    )(x, memory,
      params["embed_w"], params["out_w"], params["gvec"],
      params["sa_wqkv"], params["sa_wo"], params["ca_wqkv"], params["ca_wo"],
      params["ffn_w1"], params["ffn_w2t"], params["ffn_b1"], params["lvec"])
    return out, tfm


# --------------------------- pure-JAX reference -------------------------------
def _reference(x, memory, params):
    E, H = HIDDEN_SIZE, N_HEADS
    d = E // H

    def ln(y, g, b):
        mu = y.mean(-1, keepdims=True)
        c = y - mu
        var = (c * c).mean(-1, keepdims=True)
        return c * (g / jnp.sqrt(var + LN_EPS)) + b

    def attn(q, k, v, wo, bo):
        qh = q.reshape(-1, H, d).transpose(1, 0, 2)
        kh = k.reshape(-1, H, d).transpose(1, 0, 2)
        vh = v.reshape(-1, H, d).transpose(1, 0, 2)
        s = jnp.einsum('htd,hsd->hts', qh, kh) / math.sqrt(d)
        p = jax.nn.softmax(s, axis=-1)
        ctx = jnp.einsum('hts,hsd->htd', p, vh).transpose(1, 0, 2).reshape(-1, E)
        return ctx @ wo + bo

    t = x @ params["embed_w"] + params["gvec"][0]
    for l in range(N_LAYERS):
        lv = params["lvec"][l]
        wqkv = params["sa_wqkv"][l]
        qkv = t @ wqkv
        t = ln(t + attn(qkv[:, :E] + lv[_SA_BQ], qkv[:, E:2 * E] + lv[_SA_BK],
                        qkv[:, 2 * E:] + lv[_SA_BV], params["sa_wo"][l],
                        lv[_SA_BO]),
               lv[_LN1_G], lv[_LN1_B])
        wqkv = params["ca_wqkv"][l]
        t = ln(t + attn(t @ wqkv[:, :E] + lv[_CA_BQ],
                        memory @ wqkv[:, E:2 * E] + lv[_CA_BK],
                        memory @ wqkv[:, 2 * E:] + lv[_CA_BV],
                        params["ca_wo"][l], lv[_CA_BO]),
               lv[_LN2_G], lv[_LN2_B])
        hid = jnp.maximum(t @ params["ffn_w1"][l] + params["ffn_b1"][l], 0.0)
        f = hid @ params["ffn_w2t"][l].T + lv[_FFN_B2]
        t = ln(t + f, lv[_LN3_G], lv[_LN3_B])
    out = t @ params["out_w"] + params["gvec"][1, :OUTPUT_SIZE]
    return out, t


if __name__ == "__main__":
    key = jax.random.PRNGKey(0)
    k_in, k_mem, k_par = jax.random.split(key, 3)

    # inputs: (seq, batch, input_size); forward flattens to (seq*batch, input_size)
    inputs = jax.random.normal(k_in, (SEQ_LEN, BATCH_SIZE, INPUT_SIZE), jnp.float32)
    # memory: unbatched (S, hidden_size), matching the unbatched tgt sequence
    memory = jax.random.normal(k_mem, (MEM_LEN, HIDDEN_SIZE), jnp.float32)
    params = make_params(k_par)

    fwd = jax.jit(decoder_forward)
    out, transformer_output = fwd(inputs, memory, params)
    jax.block_until_ready((out, transformer_output))

    out_ref, tfm_ref = _reference(inputs.reshape(-1, INPUT_SIZE), memory, params)

    assert out.shape == (N_TOKENS, OUTPUT_SIZE)
    assert transformer_output.shape == (N_TOKENS, HIDDEN_SIZE)
    assert bool(jnp.all(jnp.isfinite(out)))
    assert bool(jnp.all(jnp.isfinite(transformer_output)))
    # approx-reciprocal softmax -> allow a small tolerance vs. the exact reference
    assert float(jnp.max(jnp.abs(out - out_ref))) < 5e-2
    assert float(jnp.max(jnp.abs(transformer_output - tfm_ref))) < 5e-2
    print("KERNEL_OK")
</pallas_src>

<mosaic_0001>
module attributes {stable_mosaic.version = 11 : i64} {
  func.func @_decoder_kernel(%arg0: i32, %arg1: memref<16x16xf32, #tpu.memory_space<vmem>>, %arg2: memref<8x32xf32, #tpu.memory_space<vmem>>, %arg3: memref<16x32xf32, #tpu.memory_space<vmem>>, %arg4: memref<32x12xf32, #tpu.memory_space<vmem>>, %arg5: memref<2x32xf32, #tpu.memory_space<vmem>>, %arg6: memref<1x32x96xf32, #tpu.memory_space<vmem>>, %arg7: memref<1x32x32xf32, #tpu.memory_space<vmem>>, %arg8: memref<1x32x96xf32, #tpu.memory_space<vmem>>, %arg9: memref<1x32x32xf32, #tpu.memory_space<vmem>>, %arg10: memref<1x32x2048xf32, #tpu.memory_space<vmem>>, %arg11: memref<1x32x2048xf32, #tpu.memory_space<vmem>>, %arg12: memref<1x1x2048xf32, #tpu.memory_space<vmem>>, %arg13: memref<1x16x32xf32, #tpu.memory_space<vmem>>, %arg14: memref<16x12xf32, #tpu.memory_space<vmem>>, %arg15: memref<16x32xf32, #tpu.memory_space<vmem>>, %arg16: memref<16x32xf32, #tpu.memory_space<vmem>>) attributes {dimension_semantics = [#tpu.dimension_semantics<arbitrary>], iteration_bounds = array<i64: 2>, scalar_prefetch = 0 : i64, scratch_operands = 1 : i64, tpu.core_type = #tpu.core_type<tc>, window_params = [{pipeline_mode = #tpu.pipeline_mode<synchronous>, transform_indices = @transform_0, window_bounds = array<i64: 16, 16>}, {pipeline_mode = #tpu.pipeline_mode<synchronous>, transform_indices = @transform_1, window_bounds = array<i64: 8, 32>}, {pipeline_mode = #tpu.pipeline_mode<synchronous>, transform_indices = @transform_2, window_bounds = array<i64: 16, 32>}, {pipeline_mode = #tpu.pipeline_mode<synchronous>, transform_indices = @transform_3, window_bounds = array<i64: 32, 12>}, {pipeline_mode = #tpu.pipeline_mode<synchronous>, transform_indices = @transform_4, window_bounds = array<i64: 2, 32>}, {transform_indices = @transform_5, window_bounds = array<i64: 1, 32, 96>}, {transform_indices = @transform_6, window_bounds = array<i64: 1, 32, 32>}, {transform_indices = @transform_7, window_bounds = array<i64: 1, 32, 96>}, {transform_indices = @transform_8, window_bounds = array<i64: 1, 32, 32>}, {transform_indices = @transform_9, window_bounds = array<i64: 1, 32, 2048>}, {transform_indices = @transform_10, window_bounds = array<i64: 1, 32, 2048>}, {transform_indices = @transform_11, window_bounds = array<i64: 1, 1, 2048>}, {transform_indices = @transform_12, window_bounds = array<i64: 1, 16, 32>}, {pipeline_mode = #tpu.pipeline_mode<synchronous>, transform_indices = @transform_13, window_bounds = array<i64: 16, 12>}, {pipeline_mode = #tpu.pipeline_mode<synchronous>, transform_indices = @transform_14, window_bounds = array<i64: 16, 32>}]} {
    %c0_i32 = arith.constant 0 : i32
    %0 = arith.cmpi eq, %arg0, %c0_i32 : i32
    %1 = arith.extui %0 : i1 to i32
    %c0_i32_0 = arith.constant 0 : i32
    %2 = arith.cmpi ne, %1, %c0_i32_0 : i32
    scf.if %2 {
      %c0_109 = arith.constant 0 : index
      %c0_110 = arith.constant 0 : index
      %246 = vector.load %arg1[%c0_109, %c0_110] : memref<16x16xf32, #tpu.memory_space<vmem>>, vector<16x16xf32>
      %c0_111 = arith.constant 0 : index
      %c0_112 = arith.constant 0 : index
      %247 = vector.load %arg3[%c0_111, %c0_112] : memref<16x32xf32, #tpu.memory_space<vmem>>, vector<16x32xf32>
      %cst_113 = arith.constant dense<0.000000e+00> : vector<16x32xf32>
      %248 = tpu.matmul %246, %247, %cst_113 {dimension_numbers = #tpu.dot_dimension_numbers<[1], [0], [0], [1], [0, 0, 1, 1], [], []>} : vector<16x16xf32>, vector<16x32xf32>, vector<16x32xf32> -> vector<16x32xf32>
      %c0_114 = arith.constant 0 : index
      %c0_115 = arith.constant 0 : index
      %249 = vector.load %arg5[%c0_114, %c0_115] : memref<2x32xf32, #tpu.memory_space<vmem>>, vector<1x32xf32>
      %250 = vector.broadcast %249 : vector<1x32xf32> to vector<16x32xf32>
      %251 = arith.addf %248, %250 : vector<16x32xf32>
      %c0_116 = arith.constant 0 : index
      %c0_117 = arith.constant 0 : index
      %252 = vector.load %arg16[%c0_116, %c0_117] : memref<16x32xf32, #tpu.memory_space<vmem>>, vector<16x32xf32>
      tpu.vector_store %arg16[%c0_116, %c0_117], %251 {strides = array<i32>} : memref<16x32xf32, #tpu.memory_space<vmem>>, vector<16x32xf32>,
    } else {
    }
    %c0 = arith.constant 0 : index
    %c0_1 = arith.constant 0 : index
    %3 = vector.load %arg16[%c0, %c0_1] : memref<16x32xf32, #tpu.memory_space<vmem>>, vector<16x32xf32>
    %c0_2 = arith.constant 0 : index
    %c0_3 = arith.constant 0 : index
    %4 = vector.load %arg2[%c0_2, %c0_3] : memref<8x32xf32, #tpu.memory_space<vmem>>, vector<8x32xf32>
    %c0_4 = arith.constant 0 : index
    %c0_5 = arith.constant 0 : index
    %c0_6 = arith.constant 0 : index
    %5 = vector.load %arg6[%c0_4, %c0_5, %c0_6] : memref<1x32x96xf32, #tpu.memory_space<vmem>>, vector<1x32x96xf32>
    %6 = vector.shape_cast %5 : vector<1x32x96xf32> to vector<32x96xf32>
    %cst = arith.constant dense<0.000000e+00> : vector<16x96xf32>
    %7 = tpu.matmul %3, %6, %cst {dimension_numbers = #tpu.dot_dimension_numbers<[1], [0], [0], [1], [0, 0, 1, 1], [], []>} : vector<16x32xf32>, vector<32x96xf32>, vector<16x96xf32> -> vector<16x96xf32>
    %8 = vector.extract_strided_slice %7 {offsets = [0, 0], sizes = [16, 32], strides = [1, 1]} : vector<16x96xf32> to vector<16x32xf32>
    %c0_7 = arith.constant 0 : index
    %c0_8 = arith.constant 0 : index
    %c0_9 = arith.constant 0 : index
    %9 = vector.load %arg13[%c0_7, %c0_8, %c0_9] : memref<1x16x32xf32, #tpu.memory_space<vmem>>, vector<1x1x32xf32>
    %10 = vector.shape_cast %9 : vector<1x1x32xf32> to vector<1x32xf32>
    %11 = vector.broadcast %10 : vector<1x32xf32> to vector<16x32xf32>
    %12 = arith.addf %8, %11 : vector<16x32xf32>
    %13 = vector.extract_strided_slice %7 {offsets = [0, 32], sizes = [16, 32], strides = [1, 1]} : vector<16x96xf32> to vector<16x32xf32>
    %c0_10 = arith.constant 0 : index
    %c1 = arith.constant 1 : index
    %c0_11 = arith.constant 0 : index
    %14 = vector.load %arg13[%c0_10, %c1, %c0_11] : memref<1x16x32xf32, #tpu.memory_space<vmem>>, vector<1x1x32xf32>
    %15 = vector.shape_cast %14 : vector<1x1x32xf32> to vector<1x32xf32>
    %16 = vector.broadcast %15 : vector<1x32xf32> to vector<16x32xf32>
    %17 = arith.addf %13, %16 : vector<16x32xf32>
    %18 = vector.extract_strided_slice %7 {offsets = [0, 64], sizes = [16, 32], strides = [1, 1]} : vector<16x96xf32> to vector<16x32xf32>
    %c0_12 = arith.constant 0 : index
    %c2 = arith.constant 2 : index
    %c0_13 = arith.constant 0 : index
    %19 = vector.load %arg13[%c0_12, %c2, %c0_13] : memref<1x16x32xf32, #tpu.memory_space<vmem>>, vector<1x1x32xf32>
    %20 = vector.shape_cast %19 : vector<1x1x32xf32> to vector<1x32xf32>
    %21 = vector.broadcast %20 : vector<1x32xf32> to vector<16x32xf32>
    %22 = arith.addf %18, %21 : vector<16x32xf32>
    %c0_14 = arith.constant 0 : index
    %c0_15 = arith.constant 0 : index
    %c0_16 = arith.constant 0 : index
    %23 = vector.load %arg7[%c0_14, %c0_15, %c0_16] : memref<1x32x32xf32, #tpu.memory_space<vmem>>, vector<1x32x32xf32>
    %24 = vector.shape_cast %23 : vector<1x32x32xf32> to vector<32x32xf32>
    %cst_17 = arith.constant 0.353553385 : f32
    %25 = vector.broadcast %cst_17 : f32 to vector<16x32xf32>
    %26 = arith.mulf %12, %25 : vector<16x32xf32>
    %27 = vector.extract_strided_slice %26 {offsets = [0, 0], sizes = [16, 8], strides = [1, 1]} : vector<16x32xf32> to vector<16x8xf32>
    %28 = vector.extract_strided_slice %17 {offsets = [0, 0], sizes = [16, 8], strides = [1, 1]} : vector<16x32xf32> to vector<16x8xf32>
    %cst_18 = arith.constant dense<0.000000e+00> : vector<16x16xf32>
    %29 = tpu.matmul %27, %28, %cst_18 {dimension_numbers = #tpu.dot_dimension_numbers<[1], [1], [0], [0], [0, 0, 1, 0], [], []>} : vector<16x8xf32>, vector<16x8xf32>, vector<16x16xf32> -> vector<16x16xf32>
    %30 = vector.extract_strided_slice %26 {offsets = [0, 8], sizes = [16, 8], strides = [1, 1]} : vector<16x32xf32> to vector<16x8xf32>
    %31 = vector.extract_strided_slice %17 {offsets = [0, 8], sizes = [16, 8], strides = [1, 1]} : vector<16x32xf32> to vector<16x8xf32>
    %cst_19 = arith.constant dense<0.000000e+00> : vector<16x16xf32>
    %32 = tpu.matmul %30, %31, %cst_19 {dimension_numbers = #tpu.dot_dimension_numbers<[1], [1], [0], [0], [0, 0, 1, 0], [], []>} : vector<16x8xf32>, vector<16x8xf32>, vector<16x16xf32> -> vector<16x16xf32>
    %33 = vector.extract_strided_slice %26 {offsets = [0, 16], sizes = [16, 8], strides = [1, 1]} : vector<16x32xf32> to vector<16x8xf32>
    %34 = vector.extract_strided_slice %17 {offsets = [0, 16], sizes = [16, 8], strides = [1, 1]} : vector<16x32xf32> to vector<16x8xf32>
    %cst_20 = arith.constant dense<0.000000e+00> : vector<16x16xf32>
    %35 = tpu.matmul %33, %34, %cst_20 {dimension_numbers = #tpu.dot_dimension_numbers<[1], [1], [0], [0], [0, 0, 1, 0], [], []>} : vector<16x8xf32>, vector<16x8xf32>, vector<16x16xf32> -> vector<16x16xf32>
    %36 = vector.extract_strided_slice %26 {offsets = [0, 24], sizes = [16, 8], strides = [1, 1]} : vector<16x32xf32> to vector<16x8xf32>
    %37 = vector.extract_strided_slice %17 {offsets = [0, 24], sizes = [16, 8], strides = [1, 1]} : vector<16x32xf32> to vector<16x8xf32>
    %cst_21 = arith.constant dense<0.000000e+00> : vector<16x16xf32>
    %38 = tpu.matmul %36, %37, %cst_21 {dimension_numbers = #tpu.dot_dimension_numbers<[1], [1], [0], [0], [0, 0, 1, 0], [], []>} : vector<16x8xf32>, vector<16x8xf32>, vector<16x16xf32> -> vector<16x16xf32>
    %39 = tpu.concatenate %29, %32, %35, %38 in 0 : vector<16x16xf32>, vector<16x16xf32>, vector<16x16xf32>, vector<16x16xf32> -> vector<64x16xf32>
    %cst_22 = arith.constant dense<0xFF800000> : vector<64xf32>
    %40 = vector.multi_reduction <maximumf>, %39, %cst_22 [1] : vector<64x16xf32> to vector<64xf32>
    %41 = vector.shape_cast %40 : vector<64xf32> to vector<64x1xf32>
    %42 = vector.broadcast %41 : vector<64x1xf32> to vector<64x16xf32>
    %43 = arith.subf %39, %42 : vector<64x16xf32>
    %44 = math.exp %43 : vector<64x16xf32>
    %cst_23 = arith.constant dense<0.000000e+00> : vector<64xf32>
    %45 = vector.multi_reduction <add>, %44, %cst_23 [1] : vector<64x16xf32> to vector<64xf32>
    %46 = vector.shape_cast %45 : vector<64xf32> to vector<64x1xf32>
    %47 = tpu.reciprocal %46 {approx = true} : vector<64x1xf32> -> vector<64x1xf32>
    %48 = vector.broadcast %47 : vector<64x1xf32> to vector<64x16xf32>
    %49 = arith.mulf %44, %48 : vector<64x16xf32>
    %50 = vector.extract_strided_slice %49 {offsets = [0, 0], sizes = [16, 16], strides = [1, 1]} : vector<64x16xf32> to vector<16x16xf32>
    %51 = vector.extract_strided_slice %22 {offsets = [0, 0], sizes = [16, 8], strides = [1, 1]} : vector<16x32xf32> to vector<16x8xf32>
    %cst_24 = arith.constant dense<0.000000e+00> : vector<16x8xf32>
    %52 = tpu.matmul %50, %51, %cst_24 {dimension_numbers = #tpu.dot_dimension_numbers<[1], [0], [0], [1], [0, 0, 1, 1], [], []>} : vector<16x16xf32>, vector<16x8xf32>, vector<16x8xf32> -> vector<16x8xf32>
    %53 = vector.extract_strided_slice %24 {offsets = [0, 0], sizes = [8, 32], strides = [1, 1]} : vector<32x32xf32> to vector<8x32xf32>
    %cst_25 = arith.constant dense<0.000000e+00> : vector<16x32xf32>
    %54 = tpu.matmul %52, %53, %cst_25 {dimension_numbers = #tpu.dot_dimension_numbers<[1], [0], [0], [1], [0, 0, 1, 1], [], []>} : vector<16x8xf32>, vector<8x32xf32>, vector<16x32xf32> -> vector<16x32xf32>
    %55 = vector.extract_strided_slice %49 {offsets = [16, 0], sizes = [16, 16], strides = [1, 1]} : vector<64x16xf32> to vector<16x16xf32>
    %56 = vector.extract_strided_slice %22 {offsets = [0, 8], sizes = [16, 8], strides = [1, 1]} : vector<16x32xf32> to vector<16x8xf32>
    %cst_26 = arith.constant dense<0.000000e+00> : vector<16x8xf32>
    %57 = tpu.matmul %55, %56, %cst_26 {dimension_numbers = #tpu.dot_dimension_numbers<[1], [0], [0], [1], [0, 0, 1, 1], [], []>} : vector<16x16xf32>, vector<16x8xf32>, vector<16x8xf32> -> vector<16x8xf32>
    %58 = vector.extract_strided_slice %24 {offsets = [8, 0], sizes = [8, 32], strides = [1, 1]} : vector<32x32xf32> to vector<8x32xf32>
    %cst_27 = arith.constant dense<0.000000e+00> : vector<16x32xf32>
    %59 = tpu.matmul %57, %58, %cst_27 {dimension_numbers = #tpu.dot_dimension_numbers<[1], [0], [0], [1], [0, 0, 1, 1], [], []>} : vector<16x8xf32>, vector<8x32xf32>, vector<16x32xf32> -> vector<16x32xf32>
    %60 = arith.addf %54, %59 : vector<16x32xf32>
    %61 = vector.extract_strided_slice %49 {offsets = [32, 0], sizes = [16, 16], strides = [1, 1]} : vector<64x16xf32> to vector<16x16xf32>
    %62 = vector.extract_strided_slice %22 {offsets = [0, 16], sizes = [16, 8], strides = [1, 1]} : vector<16x32xf32> to vector<16x8xf32>
    %cst_28 = arith.constant dense<0.000000e+00> : vector<16x8xf32>
    %63 = tpu.matmul %61, %62, %cst_28 {dimension_numbers = #tpu.dot_dimension_numbers<[1], [0], [0], [1], [0, 0, 1, 1], [], []>} : vector<16x16xf32>, vector<16x8xf32>, vector<16x8xf32> -> vector<16x8xf32>
    %64 = vector.extract_strided_slice %24 {offsets = [16, 0], sizes = [8, 32], strides = [1, 1]} : vector<32x32xf32> to vector<8x32xf32>
    %cst_29 = arith.constant dense<0.000000e+00> : vector<16x32xf32>
    %65 = tpu.matmul %63, %64, %cst_29 {dimension_numbers = #tpu.dot_dimension_numbers<[1], [0], [0], [1], [0, 0, 1, 1], [], []>} : vector<16x8xf32>, vector<8x32xf32>, vector<16x32xf32> -> vector<16x32xf32>
    %66 = arith.addf %60, %65 : vector<16x32xf32>
    %67 = vector.extract_strided_slice %49 {offsets = [48, 0], sizes = [16, 16], strides = [1, 1]} : vector<64x16xf32> to vector<16x16xf32>
    %68 = vector.extract_strided_slice %22 {offsets = [0, 24], sizes = [16, 8], strides = [1, 1]} : vector<16x32xf32> to vector<16x8xf32>
    %cst_30 = arith.constant dense<0.000000e+00> : vector<16x8xf32>
    %69 = tpu.matmul %67, %68, %cst_30 {dimension_numbers = #tpu.dot_dimension_numbers<[1], [0], [0], [1], [0, 0, 1, 1], [], []>} : vector<16x16xf32>, vector<16x8xf32>, vector<16x8xf32> -> vector<16x8xf32>
    %70 = vector.extract_strided_slice %24 {offsets = [24, 0], sizes = [8, 32], strides = [1, 1]} : vector<32x32xf32> to vector<8x32xf32>
    %cst_31 = arith.constant dense<0.000000e+00> : vector<16x32xf32>
    %71 = tpu.matmul %69, %70, %cst_31 {dimension_numbers = #tpu.dot_dimension_numbers<[1], [0], [0], [1], [0, 0, 1, 1], [], []>} : vector<16x8xf32>, vector<8x32xf32>, vector<16x32xf32> -> vector<16x32xf32>
    %72 = arith.addf %66, %71 : vector<16x32xf32>
    %c0_32 = arith.constant 0 : index
    %c3 = arith.constant 3 : index
    %c0_33 = arith.constant 0 : index
    %73 = vector.load %arg13[%c0_32, %c3, %c0_33] : memref<1x16x32xf32, #tpu.memory_space<vmem>>, vector<1x1x32xf32>
    %74 = vector.shape_cast %73 : vector<1x1x32xf32> to vector<1x32xf32>
    %75 = vector.broadcast %74 : vector<1x32xf32> to vector<16x32xf32>
    %76 = arith.addf %72, %75 : vector<16x32xf32>
    %77 = arith.addf %3, %76 : vector<16x32xf32>
    %c0_34 = arith.constant 0 : index
    %c9 = arith.constant 9 : index
    %c0_35 = arith.constant 0 : index
    %78 = vector.load %arg13[%c0_34, %c9, %c0_35] : memref<1x16x32xf32, #tpu.memory_space<vmem>>, vector<1x1x32xf32>
    %79 = vector.shape_cast %78 : vector<1x1x32xf32> to vector<1x32xf32>
    %c0_36 = arith.constant 0 : index
    %c10 = arith.constant 10 : index
    %c0_37 = arith.constant 0 : index
    %80 = vector.load %arg13[%c0_36, %c10, %c0_37] : memref<1x16x32xf32, #tpu.memory_space<vmem>>, vector<1x1x32xf32>
    %81 = vector.shape_cast %80 : vector<1x1x32xf32> to vector<1x32xf32>
    %cst_38 = arith.constant dense<0.000000e+00> : vector<16xf32>
    %82 = vector.multi_reduction <add>, %77, %cst_38 [1] : vector<16x32xf32> to vector<16xf32>
    %83 = vector.shape_cast %82 : vector<16xf32> to vector<16x1xf32>
    %cst_39 = arith.constant 3.200000e+01 : f32
    %84 = vector.broadcast %cst_39 : f32 to vector<16x1xf32>
    %85 = arith.divf %83, %84 : vector<16x1xf32>
    %86 = vector.broadcast %85 : vector<16x1xf32> to vector<16x32xf32>
    %87 = arith.subf %77, %86 : vector<16x32xf32>
    %88 = arith.mulf %87, %87 : vector<16x32xf32>
    %cst_40 = arith.constant dense<0.000000e+00> : vector<16xf32>
    %89 = vector.multi_reduction <add>, %88, %cst_40 [1] : vector<16x32xf32> to vector<16xf32>
    %90 = vector.shape_cast %89 : vector<16xf32> to vector<16x1xf32>
    %cst_41 = arith.constant 3.200000e+01 : f32
    %91 = vector.broadcast %cst_41 : f32 to vector<16x1xf32>
    %92 = arith.divf %90, %91 : vector<16x1xf32>
    %cst_42 = arith.constant 9.99999974E-6 : f32
    %93 = vector.broadcast %cst_42 : f32 to vector<16x1xf32>
    %94 = arith.addf %92, %93 : vector<16x1xf32>
    %95 = math.rsqrt %94 : vector<16x1xf32>
    %96 = vector.broadcast %79 : vector<1x32xf32> to vector<16x32xf32>
    %97 = vector.broadcast %95 : vector<16x1xf32> to vector<16x32xf32>
    %98 = arith.mulf %96, %97 : vector<16x32xf32>
    %99 = arith.mulf %87, %98 : vector<16x32xf32>
    %100 = vector.broadcast %81 : vector<1x32xf32> to vector<16x32xf32>
    %101 = arith.addf %99, %100 : vector<16x32xf32>
    %c0_43 = arith.constant 0 : index
    %c0_44 = arith.constant 0 : index
    %c0_45 = arith.constant 0 : index
    %102 = vector.load %arg8[%c0_43, %c0_44, %c0_45] : memref<1x32x96xf32, #tpu.memory_space<vmem>>, vector<1x32x96xf32>
    %103 = vector.shape_cast %102 : vector<1x32x96xf32> to vector<32x96xf32>
    %104 = vector.extract_strided_slice %103 {offsets = [0, 0], sizes = [32, 32], strides = [1, 1]} : vector<32x96xf32> to vector<32x32xf32>
    %cst_46 = arith.constant dense<0.000000e+00> : vector<16x32xf32>
    %105 = tpu.matmul %101, %104, %cst_46 {dimension_numbers = #tpu.dot_dimension_numbers<[1], [0], [0], [1], [0, 0, 1, 1], [], []>} : vector<16x32xf32>, vector<32x32xf32>, vector<16x32xf32> -> vector<16x32xf32>
    %c0_47 = arith.constant 0 : index
    %c4 = arith.constant 4 : index
    %c0_48 = arith.constant 0 : index
    %106 = vector.load %arg13[%c0_47, %c4, %c0_48] : memref<1x16x32xf32, #tpu.memory_space<vmem>>, vector<1x1x32xf32>
    %107 = vector.shape_cast %106 : vector<1x1x32xf32> to vector<1x32xf32>
    %108 = vector.broadcast %107 : vector<1x32xf32> to vector<16x32xf32>
    %109 = arith.addf %105, %108 : vector<16x32xf32>
    %110 = vector.extract_strided_slice %103 {offsets = [0, 32], sizes = [32, 64], strides = [1, 1]} : vector<32x96xf32> to vector<32x64xf32>
    %cst_49 = arith.constant dense<0.000000e+00> : vector<8x64xf32>
    %111 = tpu.matmul %4, %110, %cst_49 {dimension_numbers = #tpu.dot_dimension_numbers<[1], [0], [0], [1], [0, 0, 1, 1], [], []>} : vector<8x32xf32>, vector<32x64xf32>, vector<8x64xf32> -> vector<8x64xf32>
    %112 = vector.extract_strided_slice %111 {offsets = [0, 0], sizes = [8, 32], strides = [1, 1]} : vector<8x64xf32> to vector<8x32xf32>
    %c0_50 = arith.constant 0 : index
    %c5 = arith.constant 5 : index
    %c0_51 = arith.constant 0 : index
    %113 = vector.load %arg13[%c0_50, %c5, %c0_51] : memref<1x16x32xf32, #tpu.memory_space<vmem>>, vector<1x1x32xf32>
    %114 = vector.shape_cast %113 : vector<1x1x32xf32> to vector<1x32xf32>
    %115 = vector.broadcast %114 : vector<1x32xf32> to vector<8x32xf32>
    %116 = arith.addf %112, %115 : vector<8x32xf32>
    %117 = vector.extract_strided_slice %111 {offsets = [0, 32], sizes = [8, 32], strides = [1, 1]} : vector<8x64xf32> to vector<8x32xf32>
    %c0_52 = arith.constant 0 : index
    %c6 = arith.constant 6 : index
    %c0_53 = arith.constant 0 : index
    %118 = vector.load %arg13[%c0_52, %c6, %c0_53] : memref<1x16x32xf32, #tpu.memory_space<vmem>>, vector<1x1x32xf32>
    %119 = vector.shape_cast %118 : vector<1x1x32xf32> to vector<1x32xf32>
    %120 = vector.broadcast %119 : vector<1x32xf32> to vector<8x32xf32>
    %121 = arith.addf %117, %120 : vector<8x32xf32>
    %c0_54 = arith.constant 0 : index
    %c0_55 = arith.constant 0 : index
    %c0_56 = arith.constant 0 : index
    %122 = vector.load %arg9[%c0_54, %c0_55, %c0_56] : memref<1x32x32xf32, #tpu.memory_space<vmem>>, vector<1x32x32xf32>
    %123 = vector.shape_cast %122 : vector<1x32x32xf32> to vector<32x32xf32>
    %cst_57 = arith.constant 0.353553385 : f32
    %124 = vector.broadcast %cst_57 : f32 to vector<16x32xf32>
    %125 = arith.mulf %109, %124 : vector<16x32xf32>
    %126 = vector.extract_strided_slice %125 {offsets = [0, 0], sizes = [16, 8], strides = [1, 1]} : vector<16x32xf32> to vector<16x8xf32>
    %127 = vector.extract_strided_slice %116 {offsets = [0, 0], sizes = [8, 8], strides = [1, 1]} : vector<8x32xf32> to vector<8x8xf32>
    %cst_58 = arith.constant dense<0.000000e+00> : vector<16x8xf32>
    %128 = tpu.matmul %126, %127, %cst_58 {dimension_numbers = #tpu.dot_dimension_numbers<[1], [1], [0], [0], [0, 0, 1, 0], [], []>} : vector<16x8xf32>, vector<8x8xf32>, vector<16x8xf32> -> vector<16x8xf32>
    %129 = vector.extract_strided_slice %125 {offsets = [0, 8], sizes = [16, 8], strides = [1, 1]} : vector<16x32xf32> to vector<16x8xf32>
    %130 = vector.extract_strided_slice %116 {offsets = [0, 8], sizes = [8, 8], strides = [1, 1]} : vector<8x32xf32> to vector<8x8xf32>
    %cst_59 = arith.constant dense<0.000000e+00> : vector<16x8xf32>
    %131 = tpu.matmul %129, %130, %cst_59 {dimension_numbers = #tpu.dot_dimension_numbers<[1], [1], [0], [0], [0, 0, 1, 0], [], []>} : vector<16x8xf32>, vector<8x8xf32>, vector<16x8xf32> -> vector<16x8xf32>
    %132 = vector.extract_strided_slice %125 {offsets = [0, 16], sizes = [16, 8], strides = [1, 1]} : vector<16x32xf32> to vector<16x8xf32>
    %133 = vector.extract_strided_slice %116 {offsets = [0, 16], sizes = [8, 8], strides = [1, 1]} : vector<8x32xf32> to vector<8x8xf32>
    %cst_60 = arith.constant dense<0.000000e+00> : vector<16x8xf32>
    %134 = tpu.matmul %132, %133, %cst_60 {dimension_numbers = #tpu.dot_dimension_numbers<[1], [1], [0], [0], [0, 0, 1, 0], [], []>} : vector<16x8xf32>, vector<8x8xf32>, vector<16x8xf32> -> vector<16x8xf32>
    %135 = vector.extract_strided_slice %125 {offsets = [0, 24], sizes = [16, 8], strides = [1, 1]} : vector<16x32xf32> to vector<16x8xf32>
    %136 = vector.extract_strided_slice %116 {offsets = [0, 24], sizes = [8, 8], strides = [1, 1]} : vector<8x32xf32> to vector<8x8xf32>
    %cst_61 = arith.constant dense<0.000000e+00> : vector<16x8xf32>
    %137 = tpu.matmul %135, %136, %cst_61 {dimension_numbers = #tpu.dot_dimension_numbers<[1], [1], [0], [0], [0, 0, 1, 0], [], []>} : vector<16x8xf32>, vector<8x8xf32>, vector<16x8xf32> -> vector<16x8xf32>
    %138 = tpu.concatenate %128, %131, %134, %137 in 0 : vector<16x8xf32>, vector<16x8xf32>, vector<16x8xf32>, vector<16x8xf32> -> vector<64x8xf32>
    %cst_62 = arith.constant dense<0xFF800000> : vector<64xf32>
    %139 = vector.multi_reduction <maximumf>, %138, %cst_62 [1] : vector<64x8xf32> to vector<64xf32>
    %140 = vector.shape_cast %139 : vector<64xf32> to vector<64x1xf32>
    %141 = vector.broadcast %140 : vector<64x1xf32> to vector<64x8xf32>
    %142 = arith.subf %138, %141 : vector<64x8xf32>
    %143 = math.exp %142 : vector<64x8xf32>
    %cst_63 = arith.constant dense<0.000000e+00> : vector<64xf32>
    %144 = vector.multi_reduction <add>, %143, %cst_63 [1] : vector<64x8xf32> to vector<64xf32>
    %145 = vector.shape_cast %144 : vector<64xf32> to vector<64x1xf32>
    %146 = tpu.reciprocal %145 {approx = true} : vector<64x1xf32> -> vector<64x1xf32>
    %147 = vector.broadcast %146 : vector<64x1xf32> to vector<64x8xf32>
    %148 = arith.mulf %143, %147 : vector<64x8xf32>
    %149 = vector.extract_strided_slice %148 {offsets = [0, 0], sizes = [16, 8], strides = [1, 1]} : vector<64x8xf32> to vector<16x8xf32>
    %150 = vector.extract_strided_slice %121 {offsets = [0, 0], sizes = [8, 8], strides = [1, 1]} : vector<8x32xf32> to vector<8x8xf32>
    %cst_64 = arith.constant dense<0.000000e+00> : vector<16x8xf32>
    %151 = tpu.matmul %149, %150, %cst_64 {dimension_numbers = #tpu.dot_dimension_numbers<[1], [0], [0], [1], [0, 0, 1, 1], [], []>} : vector<16x8xf32>, vector<8x8xf32>, vector<16x8xf32> -> vector<16x8xf32>
    %152 = vector.extract_strided_slice %123 {offsets = [0, 0], sizes = [8, 32], strides = [1, 1]} : vector<32x32xf32> to vector<8x32xf32>
    %cst_65 = arith.constant dense<0.000000e+00> : vector<16x32xf32>
    %153 = tpu.matmul %151, %152, %cst_65 {dimension_numbers = #tpu.dot_dimension_numbers<[1], [0], [0], [1], [0, 0, 1, 1], [], []>} : vector<16x8xf32>, vector<8x32xf32>, vector<16x32xf32> -> vector<16x32xf32>
    %154 = vector.extract_strided_slice %148 {offsets = [16, 0], sizes = [16, 8], strides = [1, 1]} : vector<64x8xf32> to vector<16x8xf32>
    %155 = vector.extract_strided_slice %121 {offsets = [0, 8], sizes = [8, 8], strides = [1, 1]} : vector<8x32xf32> to vector<8x8xf32>
    %cst_66 = arith.constant dense<0.000000e+00> : vector<16x8xf32>
    %156 = tpu.matmul %154, %155, %cst_66 {dimension_numbers = #tpu.dot_dimension_numbers<[1], [0], [0], [1], [0, 0, 1, 1], [], []>} : vector<16x8xf32>, vector<8x8xf32>, vector<16x8xf32> -> vector<16x8xf32>
    %157 = vector.extract_strided_slice %123 {offsets = [8, 0], sizes = [8, 32], strides = [1, 1]} : vector<32x32xf32> to vector<8x32xf32>
    %cst_67 = arith.constant dense<0.000000e+00> : vector<16x32xf32>
    %158 = tpu.matmul %156, %157, %cst_67 {dimension_numbers = #tpu.dot_dimension_numbers<[1], [0], [0], [1], [0, 0, 1, 1], [], []>} : vector<16x8xf32>, vector<8x32xf32>, vector<16x32xf32> -> vector<16x32xf32>
    %159 = arith.addf %153, %158 : vector<16x32xf32>
    %160 = vector.extract_strided_slice %148 {offsets = [32, 0], sizes = [16, 8], strides = [1, 1]} : vector<64x8xf32> to vector<16x8xf32>
    %161 = vector.extract_strided_slice %121 {offsets = [0, 16], sizes = [8, 8], strides = [1, 1]} : vector<8x32xf32> to vector<8x8xf32>
    %cst_68 = arith.constant dense<0.000000e+00> : vector<16x8xf32>
    %162 = tpu.matmul %160, %161, %cst_68 {dimension_numbers = #tpu.dot_dimension_numbers<[1], [0], [0], [1], [0, 0, 1, 1], [], []>} : vector<16x8xf32>, vector<8x8xf32>, vector<16x8xf32> -> vector<16x8xf32>
    %163 = vector.extract_strided_slice %123 {offsets = [16, 0], sizes = [8, 32], strides = [1, 1]} : vector<32x32xf32> to vector<8x32xf32>
    %cst_69 = arith.constant dense<0.000000e+00> : vector<16x32xf32>
    %164 = tpu.matmul %162, %163, %cst_69 {dimension_numbers = #tpu.dot_dimension_numbers<[1], [0], [0], [1], [0, 0, 1, 1], [], []>} : vector<16x8xf32>, vector<8x32xf32>, vector<16x32xf32> -> vector<16x32xf32>
    %165 = arith.addf %159, %164 : vector<16x32xf32>
    %166 = vector.extract_strided_slice %148 {offsets = [48, 0], sizes = [16, 8], strides = [1, 1]} : vector<64x8xf32> to vector<16x8xf32>
    %167 = vector.extract_strided_slice %121 {offsets = [0, 24], sizes = [8, 8], strides = [1, 1]} : vector<8x32xf32> to vector<8x8xf32>
    %cst_70 = arith.constant dense<0.000000e+00> : vector<16x8xf32>
    %168 = tpu.matmul %166, %167, %cst_70 {dimension_numbers = #tpu.dot_dimension_numbers<[1], [0], [0], [1], [0, 0, 1, 1], [], []>} : vector<16x8xf32>, vector<8x8xf32>, vector<16x8xf32> -> vector<16x8xf32>
    %169 = vector.extract_strided_slice %123 {offsets = [24, 0], sizes = [8, 32], strides = [1, 1]} : vector<32x32xf32> to vector<8x32xf32>
    %cst_71 = arith.constant dense<0.000000e+00> : vector<16x32xf32>
    %170 = tpu.matmul %168, %169, %cst_71 {dimension_numbers = #tpu.dot_dimension_numbers<[1], [0], [0], [1], [0, 0, 1, 1], [], []>} : vector<16x8xf32>, vector<8x32xf32>, vector<16x32xf32> -> vector<16x32xf32>
    %171 = arith.addf %165, %170 : vector<16x32xf32>
    %c0_72 = arith.constant 0 : index
    %c7 = arith.constant 7 : index
    %c0_73 = arith.constant 0 : index
    %172 = vector.load %arg13[%c0_72, %c7, %c0_73] : memref<1x16x32xf32, #tpu.memory_space<vmem>>, vector<1x1x32xf32>
    %173 = vector.shape_cast %172 : vector<1x1x32xf32> to vector<1x32xf32>
    %174 = vector.broadcast %173 : vector<1x32xf32> to vector<16x32xf32>
    %175 = arith.addf %171, %174 : vector<16x32xf32>
    %176 = arith.addf %101, %175 : vector<16x32xf32>
    %c0_74 = arith.constant 0 : index
    %c11 = arith.constant 11 : index
    %c0_75 = arith.constant 0 : index
    %177 = vector.load %arg13[%c0_74, %c11, %c0_75] : memref<1x16x32xf32, #tpu.memory_space<vmem>>, vector<1x1x32xf32>
    %178 = vector.shape_cast %177 : vector<1x1x32xf32> to vector<1x32xf32>
    %c0_76 = arith.constant 0 : index
    %c12 = arith.constant 12 : index
    %c0_77 = arith.constant 0 : index
    %179 = vector.load %arg13[%c0_76, %c12, %c0_77] : memref<1x16x32xf32, #tpu.memory_space<vmem>>, vector<1x1x32xf32>
    %180 = vector.shape_cast %179 : vector<1x1x32xf32> to vector<1x32xf32>
    %cst_78 = arith.constant dense<0.000000e+00> : vector<16xf32>
    %181 = vector.multi_reduction <add>, %176, %cst_78 [1] : vector<16x32xf32> to vector<16xf32>
    %182 = vector.shape_cast %181 : vector<16xf32> to vector<16x1xf32>
    %cst_79 = arith.constant 3.200000e+01 : f32
    %183 = vector.broadcast %cst_79 : f32 to vector<16x1xf32>
    %184 = arith.divf %182, %183 : vector<16x1xf32>
    %185 = vector.broadcast %184 : vector<16x1xf32> to vector<16x32xf32>
    %186 = arith.subf %176, %185 : vector<16x32xf32>
    %187 = arith.mulf %186, %186 : vector<16x32xf32>
    %cst_80 = arith.constant dense<0.000000e+00> : vector<16xf32>
    %188 = vector.multi_reduction <add>, %187, %cst_80 [1] : vector<16x32xf32> to vector<16xf32>
    %189 = vector.shape_cast %188 : vector<16xf32> to vector<16x1xf32>
    %cst_81 = arith.constant 3.200000e+01 : f32
    %190 = vector.broadcast %cst_81 : f32 to vector<16x1xf32>
    %191 = arith.divf %189, %190 : vector<16x1xf32>
    %cst_82 = arith.constant 9.99999974E-6 : f32
    %192 = vector.broadcast %cst_82 : f32 to vector<16x1xf32>
    %193 = arith.addf %191, %192 : vector<16x1xf32>
    %194 = math.rsqrt %193 : vector<16x1xf32>
    %195 = vector.broadcast %178 : vector<1x32xf32> to vector<16x32xf32>
    %196 = vector.broadcast %194 : vector<16x1xf32> to vector<16x32xf32>
    %197 = arith.mulf %195, %196 : vector<16x32xf32>
    %198 = arith.mulf %186, %197 : vector<16x32xf32>
    %199 = vector.broadcast %180 : vector<1x32xf32> to vector<16x32xf32>
    %200 = arith.addf %198, %199 : vector<16x32xf32>
    %c0_83 = arith.constant 0 : index
    %c0_84 = arith.constant 0 : index
    %c0_85 = arith.constant 0 : index
    %201 = vector.load %arg10[%c0_83, %c0_84, %c0_85] : memref<1x32x2048xf32, #tpu.memory_space<vmem>>, vector<1x32x2048xf32>
    %202 = vector.shape_cast %201 : vector<1x32x2048xf32> to vector<32x2048xf32>
    %cst_86 = arith.constant dense<0.000000e+00> : vector<16x2048xf32>
    %203 = tpu.matmul %200, %202, %cst_86 {dimension_numbers = #tpu.dot_dimension_numbers<[1], [0], [0], [1], [0, 0, 1, 1], [], []>} : vector<16x32xf32>, vector<32x2048xf32>, vector<16x2048xf32> -> vector<16x2048xf32>
    %c0_87 = arith.constant 0 : index
    %c0_88 = arith.constant 0 : index
    %c0_89 = arith.constant 0 : index
    %204 = vector.load %arg12[%c0_87, %c0_88, %c0_89] : memref<1x1x2048xf32, #tpu.memory_space<vmem>>, vector<1x1x2048xf32>
    %205 = vector.shape_cast %204 : vector<1x1x2048xf32> to vector<1x2048xf32>
    %206 = vector.broadcast %205 : vector<1x2048xf32> to vector<16x2048xf32>
    %207 = arith.addf %203, %206 : vector<16x2048xf32>
    %cst_90 = arith.constant 0.000000e+00 : f32
    %208 = vector.broadcast %cst_90 : f32 to vector<16x2048xf32>
    %209 = arith.maximumf %207, %208 : vector<16x2048xf32>
    %c0_91 = arith.constant 0 : index
    %c0_92 = arith.constant 0 : index
    %c0_93 = arith.constant 0 : index
    %210 = vector.load %arg11[%c0_91, %c0_92, %c0_93] : memref<1x32x2048xf32, #tpu.memory_space<vmem>>, vector<1x32x2048xf32>
    %211 = vector.shape_cast %210 : vector<1x32x2048xf32> to vector<32x2048xf32>
    %cst_94 = arith.constant dense<0.000000e+00> : vector<16x32xf32>
    %212 = tpu.matmul %209, %211, %cst_94 {dimension_numbers = #tpu.dot_dimension_numbers<[1], [1], [0], [0], [0, 0, 1, 0], [], []>} : vector<16x2048xf32>, vector<32x2048xf32>, vector<16x32xf32> -> vector<16x32xf32>
    %c0_95 = arith.constant 0 : index
    %c8 = arith.constant 8 : index
    %c0_96 = arith.constant 0 : index
    %213 = vector.load %arg13[%c0_95, %c8, %c0_96] : memref<1x16x32xf32, #tpu.memory_space<vmem>>, vector<1x1x32xf32>
    %214 = vector.shape_cast %213 : vector<1x1x32xf32> to vector<1x32xf32>
    %215 = vector.broadcast %214 : vector<1x32xf32> to vector<16x32xf32>
    %216 = arith.addf %212, %215 : vector<16x32xf32>
    %217 = arith.addf %200, %216 : vector<16x32xf32>
    %c0_97 = arith.constant 0 : index
    %c13 = arith.constant 13 : index
    %c0_98 = arith.constant 0 : index
    %218 = vector.load %arg13[%c0_97, %c13, %c0_98] : memref<1x16x32xf32, #tpu.memory_space<vmem>>, vector<1x1x32xf32>
    %219 = vector.shape_cast %218 : vector<1x1x32xf32> to vector<1x32xf32>
    %c0_99 = arith.constant 0 : index
    %c14 = arith.constant 14 : index
    %c0_100 = arith.constant 0 : index
    %220 = vector.load %arg13[%c0_99, %c14, %c0_100] : memref<1x16x32xf32, #tpu.memory_space<vmem>>, vector<1x1x32xf32>
    %221 = vector.shape_cast %220 : vector<1x1x32xf32> to vector<1x32xf32>
    %cst_101 = arith.constant dense<0.000000e+00> : vector<16xf32>
    %222 = vector.multi_reduction <add>, %217, %cst_101 [1] : vector<16x32xf32> to vector<16xf32>
    %223 = vector.shape_cast %222 : vector<16xf32> to vector<16x1xf32>
    %cst_102 = arith.constant 3.200000e+01 : f32
    %224 = vector.broadcast %cst_102 : f32 to vector<16x1xf32>
    %225 = arith.divf %223, %224 : vector<16x1xf32>
    %226 = vector.broadcast %225 : vector<16x1xf32> to vector<16x32xf32>
    %227 = arith.subf %217, %226 : vector<16x32xf32>
    %228 = arith.mulf %227, %227 : vector<16x32xf32>
    %cst_103 = arith.constant dense<0.000000e+00> : vector<16xf32>
    %229 = vector.multi_reduction <add>, %228, %cst_103 [1] : vector<16x32xf32> to vector<16xf32>
    %230 = vector.shape_cast %229 : vector<16xf32> to vector<16x1xf32>
    %cst_104 = arith.constant 3.200000e+01 : f32
    %231 = vector.broadcast %cst_104 : f32 to vector<16x1xf32>
    %232 = arith.divf %230, %231 : vector<16x1xf32>
    %cst_105 = arith.constant 9.99999974E-6 : f32
    %233 = vector.broadcast %cst_105 : f32 to vector<16x1xf32>
    %234 = arith.addf %232, %233 : vector<16x1xf32>
    %235 = math.rsqrt %234 : vector<16x1xf32>
    %236 = vector.broadcast %219 : vector<1x32xf32> to vector<16x32xf32>
    %237 = vector.broadcast %235 : vector<16x1xf32> to vector<16x32xf32>
    %238 = arith.mulf %236, %237 : vector<16x32xf32>
    %239 = arith.mulf %227, %238 : vector<16x32xf32>
    %240 = vector.broadcast %221 : vector<1x32xf32> to vector<16x32xf32>
    %241 = arith.addf %239, %240 : vector<16x32xf32>
    %c0_106 = arith.constant 0 : index
    %c0_107 = arith.constant 0 : index
    %242 = vector.load %arg16[%c0_106, %c0_107] : memref<16x32xf32, #tpu.memory_space<vmem>>, vector<16x32xf32>
    tpu.vector_store %arg16[%c0_106, %c0_107], %241 {strides = array<i32>} : memref<16x32xf32, #tpu.memory_space<vmem>>, vector<16x32xf32>,
    %c1_i32 = arith.constant 1 : i32
    %243 = arith.cmpi eq, %arg0, %c1_i32 : i32
    %244 = arith.extui %243 : i1 to i32
    %c0_i32_108 = arith.constant 0 : i32
    %245 = arith.cmpi ne, %244, %c0_i32_108 : i32
    scf.if %245 {
      %c0_109 = arith.constant 0 : index
      %c0_110 = arith.constant 0 : index
      %246 = vector.load %arg15[%c0_109, %c0_110] : memref<16x32xf32, #tpu.memory_space<vmem>>, vector<16x32xf32>
      tpu.vector_store %arg15[%c0_109, %c0_110], %241 {strides = array<i32>} : memref<16x32xf32, #tpu.memory_space<vmem>>, vector<16x32xf32>,
      %c0_111 = arith.constant 0 : index
      %c0_112 = arith.constant 0 : index
      %247 = vector.load %arg4[%c0_111, %c0_112] : memref<32x12xf32, #tpu.memory_space<vmem>>, vector<32x12xf32>
      %cst_113 = arith.constant dense<0.000000e+00> : vector<16x12xf32>
      %248 = tpu.matmul %241, %247, %cst_113 {dimension_numbers = #tpu.dot_dimension_numbers<[1], [0], [0], [1], [0, 0, 1, 1], [], []>} : vector<16x32xf32>, vector<32x12xf32>, vector<16x12xf32> -> vector<16x12xf32>
      %c1_114 = arith.constant 1 : index
      %c0_115 = arith.constant 0 : index
      %249 = vector.load %arg5[%c1_114, %c0_115] : memref<2x32xf32, #tpu.memory_space<vmem>>, vector<1x12xf32>
      %250 = vector.broadcast %249 : vector<1x12xf32> to vector<16x12xf32>
      %251 = arith.addf %248, %250 : vector<16x12xf32>
      %c0_116 = arith.constant 0 : index
      %c0_117 = arith.constant 0 : index
      %252 = vector.load %arg14[%c0_116, %c0_117] : memref<16x12xf32, #tpu.memory_space<vmem>>, vector<16x12xf32>
      tpu.vector_store %arg14[%c0_116, %c0_117], %251 {strides = array<i32>} : memref<16x12xf32, #tpu.memory_space<vmem>>, vector<16x12xf32>,
    } else {
    }
    return
  }
  func.func @transform_0(%arg0: i32) -> (i32, i32) {
    %c0_i32 = arith.constant 0 : i32
    %c0_i32_0 = arith.constant 0 : i32
    %c0_i32_1 = arith.constant 0 : i32
    return %c0_i32, %c0_i32_0 : i32, i32
  }
  func.func @transform_1(%arg0: i32) -> (i32, i32) {
    %c0_i32 = arith.constant 0 : i32
    %c0_i32_0 = arith.constant 0 : i32
    %c0_i32_1 = arith.constant 0 : i32
    return %c0_i32, %c0_i32_0 : i32, i32
  }
  func.func @transform_2(%arg0: i32) -> (i32, i32) {
    %c0_i32 = arith.constant 0 : i32
    %c0_i32_0 = arith.constant 0 : i32
    %c0_i32_1 = arith.constant 0 : i32
    return %c0_i32, %c0_i32_0 : i32, i32
  }
  func.func @transform_3(%arg0: i32) -> (i32, i32) {
    %c0_i32 = arith.constant 0 : i32
    %c0_i32_0 = arith.constant 0 : i32
    %c0_i32_1 = arith.constant 0 : i32
    return %c0_i32, %c0_i32_0 : i32, i32
  }
  func.func @transform_4(%arg0: i32) -> (i32, i32) {
    %c0_i32 = arith.constant 0 : i32
    %c0_i32_0 = arith.constant 0 : i32
    %c0_i32_1 = arith.constant 0 : i32
    return %c0_i32, %c0_i32_0 : i32, i32
  }
  func.func @transform_5(%arg0: i32) -> (i32, i32, i32) {
    %c0_i32 = arith.constant 0 : i32
    %c0_i32_0 = arith.constant 0 : i32
    %c0_i32_1 = arith.constant 0 : i32
    return %arg0, %c0_i32, %c0_i32_0 : i32, i32, i32
  }
  func.func @transform_6(%arg0: i32) -> (i32, i32, i32) {
    %c0_i32 = arith.constant 0 : i32
    %c0_i32_0 = arith.constant 0 : i32
    %c0_i32_1 = arith.constant 0 : i32
    return %arg0, %c0_i32, %c0_i32_0 : i32, i32, i32
  }
  func.func @transform_7(%arg0: i32) -> (i32, i32, i32) {
    %c0_i32 = arith.constant 0 : i32
    %c0_i32_0 = arith.constant 0 : i32
    %c0_i32_1 = arith.constant 0 : i32
    return %arg0, %c0_i32, %c0_i32_0 : i32, i32, i32
  }
  func.func @transform_8(%arg0: i32) -> (i32, i32, i32) {
    %c0_i32 = arith.constant 0 : i32
    %c0_i32_0 = arith.constant 0 : i32
    %c0_i32_1 = arith.constant 0 : i32
    return %arg0, %c0_i32, %c0_i32_0 : i32, i32, i32
  }
  func.func @transform_9(%arg0: i32) -> (i32, i32, i32) {
    %c0_i32 = arith.constant 0 : i32
    %c0_i32_0 = arith.constant 0 : i32
    %c0_i32_1 = arith.constant 0 : i32
    return %arg0, %c0_i32, %c0_i32_0 : i32, i32, i32
  }
  func.func @transform_10(%arg0: i32) -> (i32, i32, i32) {
    %c0_i32 = arith.constant 0 : i32
    %c0_i32_0 = arith.constant 0 : i32
    %c0_i32_1 = arith.constant 0 : i32
    return %arg0, %c0_i32, %c0_i32_0 : i32, i32, i32
  }
  func.func @transform_11(%arg0: i32) -> (i32, i32, i32) {
    %c0_i32 = arith.constant 0 : i32
    %c0_i32_0 = arith.constant 0 : i32
    %c0_i32_1 = arith.constant 0 : i32
    return %arg0, %c0_i32, %c0_i32_0 : i32, i32, i32
  }
  func.func @transform_12(%arg0: i32) -> (i32, i32, i32) {
    %c0_i32 = arith.constant 0 : i32
    %c0_i32_0 = arith.constant 0 : i32
    %c0_i32_1 = arith.constant 0 : i32
    return %arg0, %c0_i32, %c0_i32_0 : i32, i32, i32
  }
  func.func @transform_13(%arg0: i32) -> (i32, i32) {
    %c0_i32 = arith.constant 0 : i32
    %c0_i32_0 = arith.constant 0 : i32
    %c0_i32_1 = arith.constant 0 : i32
    return %c0_i32, %c0_i32_0 : i32, i32
  }
  func.func @transform_14(%arg0: i32) -> (i32, i32) {
    %c0_i32 = arith.constant 0 : i32
    %c0_i32_0 = arith.constant 0 : i32
    %c0_i32_1 = arith.constant 0 : i32
    return %c0_i32, %c0_i32_0 : i32, i32
  }
}

</mosaic_0001>

<bundles_post_ra>
// kernel: decoder_forward.1
= control target key start
LH: loop header
LB: loop body
LE: loop exit
PB: predicated region body
PF: predicated region fallthrough
CT: control target
= control target key end

     0   :  { %s7540_s0 = inlined_call_operand.hbm [shape: f32[16,16], index: 0, kind: input, shape index: {}]   ;;  %s7541_s1 = inlined_call_operand.hbm [shape: f32[8,32], index: 1, kind: input, shape index: {}]   ;;  %s7542_s2 = inlined_call_operand.hbm [shape: f32[16,32], index: 2, kind: input, shape index: {}]   ;;  %s7543_s3 = inlined_call_operand.vmem [shape: f32[32,12], index: 3, kind: input, shape index: {}]   ;;  %s7544_s4 = inlined_call_operand.vmem [shape: f32[2,32], index: 4, kind: input, shape index: {}]   ;;  %s7545_s5 = inlined_call_operand.vmem [shape: f32[2,32,96], index: 5, kind: input, shape index: {}]   ;;  %s7546_s6 = inlined_call_operand.hbm [shape: f32[2,32,32], index: 6, kind: input, shape index: {}]   ;;  %s7547_s7 = inlined_call_operand.hbm [shape: f32[2,32,96], index: 7, kind: input, shape index: {}]   ;;  %s7548_s8 = inlined_call_operand.hbm [shape: f32[2,32,32], index: 8, kind: input, shape index: {}]   ;;  %s7549_s9 = inlined_call_operand.hbm [shape: f32[2,32,2048], index: 9, kind: input, shape index: {}]   ;;  %s7550_s10 = inlined_call_operand.hbm [shape: f32[2,32,2048], index: 10, kind: input, shape index: {}]   ;;  %s7551_s11 = inlined_call_operand.hbm [shape: f32[2,1,2048], index: 11, kind: input, shape index: {}]   ;;  %s7552_s12 = inlined_call_operand.hbm [shape: f32[2,16,32], index: 12, kind: input, shape index: {}]   ;;  %s7553_s13 = inlined_call_operand.hbm [shape: f32[16,12], index: 13, kind: output, shape index: {0}]   ;;  %s7554_s14 = inlined_call_operand.hbm [shape: f32[16,32], index: 14, kind: output, shape index: {1}]  }
   0x1   :  { %7572 = sst [smem:[#allocation38_spill]] %s7541_s1 }
   0x2   :  { %7573 = sst [smem:[#allocation39_spill]] %s7543_s3 }
   0x3   :  { %7574 = sst [smem:[#allocation40_spill]] %s7544_s4 }
   0x4   :  { %7575 = sst [smem:[#allocation41_spill]] %s7545_s5 }
   0x5   :  { %7576 = sst [smem:[#allocation42_spill]] %s7546_s6 }
   0x6   :  { %7577 = sst [smem:[#allocation43_spill]] %s7548_s8 }
   0x7   :  { %7578 = sst [smem:[#allocation44_spill]] %s7553_s13 }
   0x8   :  { %7579 = sst [smem:[#allocation45_spill]] %s7554_s14 }
   0x9   :  { %20 = vsyncpa [#allocation4], 0 }
   0xa   :  { %21 = vsyncpa [#allocation7], 0 }
   0xb   :  { %22 = vsyncpa [#allocation10], 0 }
   0xc   :  { %24 = vsyncpa [#allocation10 + $0x1], 0 }
   0xd   :  { %25 = vsyncpa [#allocation13], 0 }
   0xe   :  { %27 = vsyncpa [#allocation13 + $0x1], 0 }
   0xf   :  { %28 = vsyncpa [#allocation16], 0 }
  0x10   :  { %30 = vsyncpa [#allocation16 + $0x1], 0 }
  0x11   :  { %31 = vsyncpa [#allocation19], 0 }
  0x12   :  { %33 = vsyncpa [#allocation19 + $0x1], 0 }
  0x13   :  { %34 = vsyncpa [#allocation5], 0 }
  0x14   :  { %35 = vsyncpa [#allocation22], 0  ;;  %s6538_s29 = smov 0   ;;  %s6540_s30 = smov 0  }
  0x15   :  { %s6542_s15 = smov 0   ;;  %s6544_s16 = smov 0  }
  0x16 LB: > { %7580 = sst [smem:[#allocation31_spill]] %s6422_s30  ;;  %s6557_s17 = sadd.s32 4294967295, %s6430_s16   ;;  %s6430_s16 = sphi %s6544_s16, %s7623_s16   ;;  %s6426_s15 = sphi %s6542_s15, %s7626_s15   ;;  %s6422_s30 = sphi %s6540_s30, %s7625_s30   ;;  %s6418_s29 = sphi %s6538_s29, %s7624_s29  }
  0x17   : > { %7581 = sst [smem:[#allocation32_spill]] %s6426_s15  ;;  %s6560_s18 = sadd.s32 1, %s6430_s16  }
  0x18   : > { %7582 = sst [smem:[#allocation33_spill]] %s6557_s17  ;;  %s176_s19 = ssub.s32 %s6430_s16, %s6560_s18 }
  0x19   : > { %7583 = sst [smem:[#allocation34_spill]] %s6560_s18  ;;  %s179_s20 = sadd.s32 1, %s6426_s15 }
  0x1a   : > { %p177_p0 = scmp.eq.s32.totalorder %s176_s19, 0  ;;  %p186_p1 = scmp.ne.s32.totalorder %s6426_s15, %s6422_s30 }
  0x1b   : > { %p187_p2 = scmp.eq.s32.totalorder %s6430_s16, 0  ;;  %p192_p3 = scmp.ne.s32.totalorder %s6422_s30, %s6418_s29 }
  0x1c   : > { %s6570_s21 = scalar_select %p177_p0, %s6426_s15, %s179_s20  }
  0x1d   : > { %p6572_p4 = por %p187_p2, %p186_p1  ;;  %p7555_p5 = scmp.eq.s32.totalorder %s6557_s17, 0 }
  0x1e   : > { %7584 = sst [smem:[#allocation35_spill]] %s6570_s21  ;;  %p5386_p6 = scmp.ge.s32.totalorder %s6430_s16, 1 }
  0x1f   : > { %p401_p7 = scmp.lt.s32.totalorder %s6430_s16, 3  ;;  %p6581_p8 = por %p7555_p5, %p192_p3 }
  0x20   : > { %s6432_s25 = smov [#allocation6]   ;;  %p5906_p12 = scmp.lt.s32.totalorder %s6430_s16, 2 }
  0x21   : > { %s7586_s23 = scalar_select %p6581_p8, 1, 0 }
  0x22   : > { %p6586_p10 = pnand %p5386_p6, %p401_p7  ;;  %s427_s26 = sshll.u32 %s6432_s25, 4  ;;  %s428_s26 = int_to_ptr.vmem [resolvable:$true] %s427_s26 }
  0x23   : > { %7587 = sst [smem:[#allocation36_spill]] %s7586_s23  ;;  %p6601_p0 = pnand %p5906_p12, %p6572_p4 }
  0x24   : > { %s7588_s24 = scalar_select %p6586_p10, 1, 0 }
  0x25   : > { %p5871_p11 = pneg %p6586_p10  ;;  %s6606_s29 = sand.u32 1, %s6430_s16  }
  0x26   : > { %7589 = sst [smem:[#allocation37_spill]] %s7588_s24  ;;  %s6057_s19 = scalar_lea.vmem %s428_s26, 128 }
  0x27   : > { %p6595_p13 = pnand %p5871_p11, %p7555_p5  ;;  %p6058_p2 = scmp.ne.s32.totalorder %s428_s26, %s6057_s19 }
  0x28   : > { %p6065_p7 = scmp.lt.s32.totalorder %s428_s26, %s428_s26  ;;  %p6066_p11 = scmp.lt.s32.totalorder %s6057_s19, %s6057_s19 }
  0x29   : > { %s7590_s27 = scalar_select %p6595_p13, 1, 0 }
  0x2a   : > { %p7560_p1 = pneg %p6595_p13  ;;  %p6067_p9 = por %p6066_p11, %p6065_p7 }
  0x2c   : > { %p6060_p3 = pnand %p6058_p2, %p7560_p1 }
  0x2e   : > { %p6061_p6 = pneg %p6060_p3 }
  0x30   : > { %p6068_p5 = pnand %p6067_p9, %p6061_p6 }
  0x32   : > { %6071 = shalt.err (!%p6068_p5)
}
  0x33   : > { %s7592_s1 = sld [smem:[#allocation38_spill]]  ;;  %s6619_s25 = sand.u32 1, %s6426_s15  }
  0x34   : > { %s6622_s21 = sshll.u32 %s6619_s25, 5  ;;  %s6625_s19 = sshll.u32 %s6430_s16, 9 }
  0x35   : > { %s7593_s6 = sld [smem:[#allocation42_spill]]  ;;  %s469_s20 = scalar_lea.vmem [#allocation9], %s6622_s21 }
  0x36   : > { %s476_s22 = sshll.u32 %s469_s20, 4  ;;  %p6641_p5 = pneg %p6601_p0  ;;  %s6634_s22 = int_to_ptr.vmem [resolvable:$true] %s476_s22 }
  0x39   : > { %5877 = dma.hbm_to_vmem [thread:$0]  (!%p6595_p13), %s7592_s1, 128, %s428_s26, [#allocation7]  }
  0x3b   : > { %s6631_s13 = scalar_lea.hbm %s7593_s6, %s6625_s19  ;;  %s6077_s3 = scalar_lea.hbm %s7593_s6, 1024 }
  0x3c   : > { %s6072_s1 = scalar_lea.hbm %s6631_s13, 512  ;;  %p6078_p2 = scmp.lt.s32.totalorder %s6631_s13, %s7593_s6 }
  0x3d   : > { %p6073_p4 = scmp.ne.s32.totalorder %s6631_s13, %s6072_s1  ;;  %p6079_p3 = scmp.lt.s32.totalorder %s6077_s3, %s6072_s1 }
  0x3f   : > { %p6075_p9 = pnand %p6641_p5, %p6073_p4  ;;  %p6080_p6 = por %p6079_p3, %p6078_p2 }
  0x41   : > { %p6076_p12 = pneg %p6075_p9 }
  0x43   : > { %p6081_p7 = pnand %p6080_p6, %p6076_p12 }
  0x45   : > { %6084 = shalt.err (!%p6081_p7)
}
  0x46   : > { %s6085_s26 = scalar_lea.vmem %s6634_s22, 512  ;;  %s6433_s5 = smov [#allocation9]  }
  0x47   : > { %p6086_p11 = scmp.ne.s32.totalorder %s6634_s22, %s6085_s26  ;;  %s6090_s14 = sshll.u32 %s6433_s5, 4  ;;  %s6091_s14 = int_to_ptr.vmem [resolvable:$false] %s6090_s14 }
  0x48   : > { %s6092_s18 = scalar_lea.vmem %s6091_s14, 1024  ;;  %p6093_p1 = scmp.lt.s32.totalorder %s6634_s22, %s6091_s14 }
  0x49   : > { %p6088_p4 = pnand %p6086_p11, %p6641_p5  ;;  %p6094_p8 = scmp.lt.s32.totalorder %s6092_s18, %s6085_s26 }
  0x4b   : > { %p6089_p9 = pneg %p6088_p4  ;;  %p6095_p10 = por %p6094_p8, %p6093_p1 }
  0x4d   : > { %p6096_p13 = pnand %p6095_p10, %p6089_p9 }
  0x4f   : > { %6099 = shalt.err (!%p6096_p13)
}
  0x50   : > { %s6434_s1 = smov 128   ;;  %s6435_s3 = smov 8  }
  0x51   : > { %s7595_s4 = scalar_lea.sflag [#allocation10], %s6606_s29  ;;  %s7596_s8 = sld [smem:[#allocation43_spill]] }
  0x52   : > { %5884 = dma.hbm_to_vmem [thread:$0]  (!%p6601_p0), %s6631_s13, 512, %s6634_s22, %s7595_s4, %s6434_s1, %s6434_s1, %s6435_s3  }
  0x53   : > { %s511_s14 = scalar_lea.vmem [#allocation12], %s6622_s21  ;;  %s508_s23 = scalar_lea.sflag [#allocation13], %s6606_s29 }
  0x54   : > { %s518_s18 = sshll.u32 %s511_s14, 4  ;;  %s6675_s18 = int_to_ptr.vmem [resolvable:$true] %s518_s18 }
  0x57   : > { %s6672_s20 = scalar_lea.hbm %s7596_s8, %s6625_s19  ;;  %s6105_s4 = scalar_lea.hbm %s7596_s8, 1024 }
  0x58   : > { %s6100_s30 = scalar_lea.hbm %s6672_s20, 512  ;;  %p6106_p1 = scmp.lt.s32.totalorder %s6672_s20, %s7596_s8 }
  0x59   : > { %p6101_p8 = scmp.ne.s32.totalorder %s6672_s20, %s6100_s30  ;;  %p6107_p12 = scmp.lt.s32.totalorder %s6105_s4, %s6100_s30 }
  0x5b   : > { %p6103_p10 = pnand %p6101_p8, %p6641_p5  ;;  %p6108_p2 = por %p6107_p12, %p6106_p1 }
  0x5d   : > { %p6104_p13 = pneg %p6103_p10 }
  0x5f   : > { %p6109_p3 = pnand %p6108_p2, %p6104_p13 }
  0x61   : > { %6112 = shalt.err (!%p6109_p3)
}
  0x62   : > { %s6113_s14 = scalar_lea.vmem %s6675_s18, 512  ;;  %s6436_s6 = smov [#allocation12]  }
  0x63   : > { %p6114_p6 = scmp.ne.s32.totalorder %s6675_s18, %s6113_s14  ;;  %s6118_s13 = sshll.u32 %s6436_s6, 4  ;;  %s6119_s13 = int_to_ptr.vmem [resolvable:$false] %s6118_s13 }
  0x64   : > { %s6120_s22 = scalar_lea.vmem %s6119_s13, 1024  ;;  %p6121_p4 = scmp.lt.s32.totalorder %s6675_s18, %s6119_s13 }
  0x65   : > { %p6116_p7 = pnand %p6114_p6, %p6641_p5  ;;  %p6122_p9 = scmp.lt.s32.totalorder %s6120_s22, %s6113_s14 }
  0x67   : > { %p6117_p11 = pneg %p6116_p7  ;;  %p6123_p8 = por %p6122_p9, %p6121_p4 }
  0x69   : > { %p6124_p10 = pnand %p6123_p8, %p6117_p11 }
  0x6b   : > { %6127 = shalt.err (!%p6124_p10)
}
  0x6c   : > { %5890 = dma.hbm_to_vmem [thread:$0]  (!%p6601_p0), %s6672_s20, 512, %s6675_s18, %s508_s23, %s6434_s1, %s6434_s1, %s6435_s3  }
  0x6d   : > { %s5538_s6 = sshll.u32 %s6430_s16, 13  ;;  %s7597_s26 = sshll.u32 %s6619_s25, 9 }
  0x6e   : > { %s6708_s5 = scalar_lea.hbm %s7549_s9, %s5538_s6  ;;  %s532_s14 = scalar_lea.vmem [#allocation14], %s7597_s26 }
  0x6f   : > { %s539_s13 = sshll.u32 %s532_s14, 4  ;;  %s6717_s17 = scalar_lea.hbm %s7550_s10, %s5538_s6  ;;  %s6712_s13 = int_to_ptr.vmem [resolvable:$true] %s539_s13 }
  0x70   : > { %s7598_s24 = smov %s7597_s26  ;;  %s550_s30 = scalar_lea.sflag [#allocation16], %s6606_s29 }
  0x71   : > { %s553_s20 = scalar_lea.vmem [#allocation15], %s7598_s24  ;;  %s6128_s4 = scalar_lea.hbm %s6717_s17, 8192 }
  0x72   : > { %s560_s18 = sshll.u32 %s553_s20, 4  ;;  %p6129_p13 = scmp.ne.s32.totalorder %s6717_s17, %s6128_s4  ;;  %s6721_s18 = int_to_ptr.vmem [resolvable:$true] %s560_s18 }
  0x73   : > { %s6133_s8 = scalar_lea.hbm %s7550_s10, 16384  ;;  %p6134_p2 = scmp.lt.s32.totalorder %s6717_s17, %s7550_s10 }
  0x74   : > { %p6131_p1 = pnand %p6129_p13, %p6641_p5  ;;  %p6135_p3 = scmp.lt.s32.totalorder %s6133_s8, %s6128_s4 }
  0x76   : > { %p6132_p12 = pneg %p6131_p1  ;;  %p6136_p6 = por %p6135_p3, %p6134_p2 }
  0x78   : > { %p6137_p7 = pnand %p6136_p6, %p6132_p12 }
  0x7a   : > { %6140 = shalt.err (!%p6137_p7)
}
  0x7b   : > { %s6141_s24 = scalar_lea.vmem %s6721_s18, 8192  ;;  %s6437_s20 = smov [#allocation15]  }
  0x7c   : > { %p6142_p11 = scmp.ne.s32.totalorder %s6721_s18, %s6141_s24  ;;  %s6146_s26 = sshll.u32 %s6437_s20, 4  ;;  %s6147_s26 = int_to_ptr.vmem [resolvable:$false] %s6146_s26 }
  0x7d   : > { %s6148_s14 = scalar_lea.vmem %s6147_s26, 16384  ;;  %p6149_p8 = scmp.lt.s32.totalorder %s6721_s18, %s6147_s26 }
  0x7e   : > { %p6144_p4 = pnand %p6142_p11, %p6641_p5  ;;  %p6150_p10 = scmp.lt.s32.totalorder %s6148_s14, %s6141_s24 }
  0x80   : > { %p6145_p9 = pneg %p6144_p4  ;;  %p6151_p13 = por %p6150_p10, %p6149_p8 }
  0x82   : > { %p6152_p1 = pnand %p6151_p13, %p6145_p9 }
  0x84   : > { %6155 = shalt.err (!%p6152_p1)
}
  0x85   : > { %s6438_s4 = smov 2048   ;;  %s6439_s8 = smov [#allocation3]  }
  0x86   : > { %5896 = dma.hbm_to_vmem [thread:$0]  (!%p6601_p0), %s6717_s17, 8192, %s6721_s18, %s550_s30, %s6438_s4, %s6438_s4, %s6434_s1  }
  0x87   : > { %s413_s6 = sshll.u32 %s6439_s8, 4  ;;  %s6440_s22 = smov [#allocation8]   ;;  %s414_s6 = int_to_ptr.vmem [resolvable:$true] %s413_s6 }
  0x88   : > { %s437_s24 = sshll.u32 %s6440_s22, 4  ;;  %s6167_s20 = scalar_lea.vmem %s414_s6, 256  ;;  %s438_s24 = int_to_ptr.vmem [resolvable:$true] %s437_s24 }
  0x89   : > { %p6168_p12 = scmp.ne.s32.totalorder %s414_s6, %s6167_s20  ;;  %p7599_p2 = scmp.ne.s32.totalorder %s7590_s27, 0 }
  0x8a   : > { %p6175_p11 = scmp.lt.s32.totalorder %s414_s6, %s414_s6  ;;  %p6176_p4 = scmp.lt.s32.totalorder %s6167_s20, %s6167_s20 }
  0x8b   : > { %p7600_p3 = pneg %p7599_p2 }
  0x8c   : > { %p6177_p9 = por %p6176_p4, %p6175_p11 }
  0x8d   : > { %p6170_p6 = pnand %p6168_p12, %p7600_p3 }
  0x8f   : > { %p6171_p7 = pneg %p6170_p6 }
  0x91   : > { %p6178_p8 = pnand %p6177_p9, %p6171_p7 }
  0x93   : > { %6181 = shalt.err (!%p6178_p8)
}
  0x94   : > { %5874 = dma.hbm_to_vmem [thread:$0]  (!%p7599_p2), %s7540_s0, 256, %s414_s6, [#allocation4], %s6434_s1, %s6434_s1, %s6435_s3  }
  0x95   : > { %s6193_s26 = scalar_lea.vmem %s438_s24, 256  ;;  %p7601_p13 = pmov %p7600_p3 }
  0x96   : > { %p6194_p10 = scmp.ne.s32.totalorder %s438_s24, %s6193_s26  ;;  %p6201_p3 = scmp.lt.s32.totalorder %s438_s24, %s438_s24 }
  0x97   : > { %p6202_p6 = scmp.lt.s32.totalorder %s6193_s26, %s6193_s26 }
  0x98   : > { %p6196_p1 = pnand %p6194_p10, %p7601_p13 }
  0x99   : > { %p6203_p7 = por %p6202_p6, %p6201_p3 }
  0x9a   : > { %p6197_p12 = pneg %p6196_p1 }
  0x9c   : > { %p6204_p11 = pnand %p6203_p7, %p6197_p12 }
  0x9e   : > { %6207 = shalt.err (!%p6204_p11)
}
  0x9f   : > { %5880 = dma.hbm_to_vmem [thread:$0]  (!%p7599_p2), %s7542_s2, 256, %s438_s24, [#allocation7], %s6434_s1, %s6434_s1, %s6435_s3  }
  0xa0   : > { %s6775_s20 = scalar_lea.hbm %s7547_s7, %s6625_s19  ;;  %s490_s27 = scalar_lea.vmem [#allocation11], %s6622_s21 }
  0xa1   : > { %s497_s17 = sshll.u32 %s490_s27, 4  ;;  %s5406_s18 = sshll.u32 %s6619_s25, 4  ;;  %s6778_s17 = int_to_ptr.vmem [resolvable:$true] %s497_s17 }
  0xa2   : > { %s6208_s26 = scalar_lea.hbm %s6775_s20, 512  ;;  %s6213_s8 = scalar_lea.hbm %s7547_s7, 1024 }
  0xa3   : > { %p6209_p4 = scmp.ne.s32.totalorder %s6775_s20, %s6208_s26  ;;  %p6214_p2 = scmp.lt.s32.totalorder %s6775_s20, %s7547_s7 }
  0xa4   : > { %p6215_p10 = scmp.lt.s32.totalorder %s6213_s8, %s6208_s26 }
  0xa5   : > { %p6211_p9 = pnand %p6209_p4, %p6641_p5 }
  0xa6   : > { %p6216_p13 = por %p6215_p10, %p6214_p2 }
  0xa7   : > { %p6212_p8 = pneg %p6211_p9 }
  0xa9   : > { %p6217_p1 = pnand %p6216_p13, %p6212_p8 }
  0xab   : > { %6220 = shalt.err (!%p6217_p1)
}
  0xac   : > { %s6221_s21 = scalar_lea.vmem %s6778_s17, 512  ;;  %s6441_s22 = smov [#allocation11]  }
  0xad   : > { %p6222_p12 = scmp.ne.s32.totalorder %s6778_s17, %s6221_s21  ;;  %s6226_s27 = sshll.u32 %s6441_s22, 4  ;;  %s6227_s27 = int_to_ptr.vmem [resolvable:$false] %s6226_s27 }
  0xae   : > { %s6228_s14 = scalar_lea.vmem %s6227_s27, 1024  ;;  %p6229_p7 = scmp.lt.s32.totalorder %s6778_s17, %s6227_s27 }
  0xaf   : > { %p6224_p3 = pnand %p6222_p12, %p6641_p5  ;;  %p6230_p11 = scmp.lt.s32.totalorder %s6228_s14, %s6221_s21 }
  0xb1   : > { %p6225_p6 = pneg %p6224_p3  ;;  %p6231_p4 = por %p6230_p11, %p6229_p7 }
  0xb3   : > { %p6232_p9 = pnand %p6231_p4, %p6225_p6 }
  0xb5   : > { %6235 = shalt.err (!%p6232_p9)
}
  0xb6   : > { %s7602_s26 = scalar_lea.sflag [#allocation10], %s6606_s29  ;;  %s6236_s24 = scalar_lea.hbm %s6708_s5, 8192 }
  0xb7   : > { %5887 = dma.hbm_to_vmem [thread:$0]  (!%p6601_p0), %s6775_s20, 512, %s6778_s17, %s7602_s26, %s6434_s1, %s6434_s1, %s6435_s3  }
  0xb8   : > { %p6237_p8 = scmp.ne.s32.totalorder %s6708_s5, %s6236_s24  ;;  %s6241_s19 = scalar_lea.hbm %s7549_s9, 16384 }
  0xb9   : > { %p6242_p13 = scmp.lt.s32.totalorder %s6708_s5, %s7549_s9  ;;  %p6243_p1 = scmp.lt.s32.totalorder %s6241_s19, %s6236_s24 }
  0xba   : > { %p6239_p2 = pnand %p6237_p8, %p6641_p5 }
  0xbb   : > { %p6244_p12 = por %p6243_p1, %p6242_p13 }
  0xbc   : > { %p6240_p10 = pneg %p6239_p2 }
  0xbe   : > { %p6245_p3 = pnand %p6244_p12, %p6240_p10 }
  0xc0   : > { %6248 = shalt.err (!%p6245_p3)
}
  0xc1   : > { %s6249_s20 = scalar_lea.vmem %s6712_s13, 8192  ;;  %s6442_s17 = smov [#allocation14]  }
  0xc2   : > { %p6250_p6 = scmp.ne.s32.totalorder %s6712_s13, %s6249_s20  ;;  %s6254_s27 = sshll.u32 %s6442_s17, 4  ;;  %s6255_s27 = int_to_ptr.vmem [resolvable:$false] %s6254_s27 }
  0xc3   : > { %s6256_s14 = scalar_lea.vmem %s6255_s27, 16384  ;;  %p6257_p4 = scmp.lt.s32.totalorder %s6712_s13, %s6255_s27 }
  0xc4   : > { %p6252_p7 = pnand %p6250_p6, %p6641_p5  ;;  %p6258_p9 = scmp.lt.s32.totalorder %s6256_s14, %s6249_s20 }
  0xc6   : > { %p6253_p11 = pneg %p6252_p7  ;;  %p6259_p8 = por %p6258_p9, %p6257_p4 }
  0xc8   : > { %p6260_p2 = pnand %p6259_p8, %p6253_p11 }
  0xca   : > { %6263 = shalt.err (!%p6260_p2)
}
  0xcb   : > { %5893 = dma.hbm_to_vmem [thread:$0]  (!%p6601_p0), %s6708_s5, 8192, %s6712_s13, %s508_s23, %s6438_s4, %s6438_s4, %s6434_s1  }
  0xcc   : > { %s5540_s26 = sshll.u32 %s6430_s16, 8  ;;  %s574_s19 = scalar_lea.vmem [#allocation17], %s5406_s18 }
  0xcd   : > { %s580_s6 = scalar_lea.hbm %s7551_s11, %s5540_s26  ;;  %s582_s21 = sshll.u32 %s574_s19, 4  ;;  %s583_s21 = int_to_ptr.vmem [resolvable:$true] %s582_s21 }
  0xce   : > { %s6264_s22 = scalar_lea.hbm %s580_s6, 256  ;;  %s6269_s27 = scalar_lea.hbm %s7551_s11, 512 }
  0xcf   : > { %p6265_p10 = scmp.ne.s32.totalorder %s580_s6, %s6264_s22  ;;  %p6270_p12 = scmp.lt.s32.totalorder %s580_s6, %s7551_s11 }
  0xd0   : > { %p6271_p3 = scmp.lt.s32.totalorder %s6269_s27, %s6264_s22 }
  0xd1   : > { %p6267_p13 = pnand %p6265_p10, %p6641_p5 }
  0xd2   : > { %p6272_p6 = por %p6271_p3, %p6270_p12 }
  0xd3   : > { %p6268_p1 = pneg %p6267_p13 }
  0xd5   : > { %p6273_p7 = pnand %p6272_p6, %p6268_p1 }
  0xd7   : > { %6276 = shalt.err (!%p6273_p7)
}
  0xd8   : > { %s6277_s13 = scalar_lea.vmem %s583_s21, 256  ;;  %s6443_s4 = smov [#allocation17]  }
  0xd9   : > { %p6278_p11 = scmp.ne.s32.totalorder %s583_s21, %s6277_s13  ;;  %s6282_s14 = sshll.u32 %s6443_s4, 4  ;;  %s6283_s14 = int_to_ptr.vmem [resolvable:$false] %s6282_s14 }
  0xda   : > { %s6284_s24 = scalar_lea.vmem %s6283_s14, 512  ;;  %p6285_p8 = scmp.lt.s32.totalorder %s583_s21, %s6283_s14 }
  0xdb   : > { %p6280_p4 = pnand %p6278_p11, %p6641_p5  ;;  %p6286_p2 = scmp.lt.s32.totalorder %s6284_s24, %s6277_s13 }
  0xdd   : > { %p6281_p9 = pneg %p6280_p4  ;;  %p6287_p10 = por %p6286_p2, %p6285_p8 }
  0xdf   : > { %p6288_p13 = pnand %p6287_p10, %p6281_p9 }
  0xe1   : > { %6291 = shalt.err (!%p6288_p13)
}
  0xe2   : > { %5899 = dma.hbm_to_vmem [thread:$0]  (!%p6601_p0), %s580_s6, 256, %s583_s21, %s550_s30  }
  0xe3   : > { %s6858_s22 = scalar_lea.hbm %s7552_s12, %s5540_s26  ;;  %s593_s20 = scalar_lea.vmem [#allocation18], %s5406_s18 }
  0xe4   : > { %s600_s17 = sshll.u32 %s593_s20, 4  ;;  %s590_s29 = scalar_lea.sflag [#allocation19], %s6619_s25  ;;  %s6862_s17 = int_to_ptr.vmem [resolvable:$true] %s600_s17 }
  0xe5   : > { %s6292_s27 = scalar_lea.hbm %s6858_s22, 256  ;;  %s6297_s6 = scalar_lea.hbm %s7552_s12, 512 }
  0xe6   : > { %p6293_p1 = scmp.ne.s32.totalorder %s6858_s22, %s6292_s27  ;;  %p6298_p6 = scmp.lt.s32.totalorder %s6858_s22, %s7552_s12 }
  0xe7   : > { %p6299_p7 = scmp.lt.s32.totalorder %s6297_s6, %s6292_s27 }
  0xe8   : > { %p6295_p12 = pnand %p6293_p1, %p6641_p5 }
  0xe9   : > { %p6300_p11 = por %p6299_p7, %p6298_p6 }
  0xea   : > { %p6296_p3 = pneg %p6295_p12 }
  0xec   : > { %p6301_p4 = pnand %p6300_p11, %p6296_p3 }
  0xee   : > { %6304 = shalt.err (!%p6301_p4)
}
  0xef   : > { %s6305_s25 = scalar_lea.vmem %s6862_s17, 256  ;;  %s6444_s18 = smov [#allocation18]  }
  0xf0   : > { %p6306_p9 = scmp.ne.s32.totalorder %s6862_s17, %s6305_s25  ;;  %s6310_s23 = sshll.u32 %s6444_s18, 4  ;;  %s6311_s23 = int_to_ptr.vmem [resolvable:$false] %s6310_s23 }
  0xf1   : > { %s6312_s5 = scalar_lea.vmem %s6311_s23, 512  ;;  %p6313_p10 = scmp.lt.s32.totalorder %s6862_s17, %s6311_s23 }
  0xf2   : > { %p6308_p8 = pnand %p6306_p9, %p6641_p5  ;;  %p6314_p13 = scmp.lt.s32.totalorder %s6312_s5, %s6305_s25 }
  0xf4   : > { %p6309_p2 = pneg %p6308_p8  ;;  %p6315_p1 = por %p6314_p13, %p6313_p10 }
  0xf6   : > { %p6316_p12 = pnand %p6315_p1, %p6309_p2 }
  0xf8   : > { %6319 = shalt.err (!%p6316_p12)
}
  0xf9   : > { %5902 = dma.hbm_to_vmem [thread:$0]  (!%p6601_p0), %s6858_s22, 256, %s6862_s17, %s590_s29, %s6434_s1, %s6434_s1, %s6435_s3  }
  0xfa   : > { %s7603_s15 = sld [smem:[#allocation37_spill]] }
 0x100   : > { %p7604_p5 = scmp.ne.s32.totalorder %s7603_s15, 0 }
 0x101   : > { %s7605_s13 = sld [smem:[#allocation33_spill]] (!%p7604_p5) }
 0x102   : > { %612 = sbr.rel (%p7604_p5) target bundleno = 5029 (0x13a5), region = 72 }
 0x107   : > { %p7606_p3 = scmp.eq.s32.totalorder %s7605_s13, 0 }
 0x109   : > { %6385 = dma.done.wait (%p7606_p3), [#allocation4], 256   ;;  %p7607_p6 = pmov %p7606_p3 }
 0x10a   : > { %p7608_p7 = pmov %p7606_p3 }
 0x10b   : > { %6387 = vsyncadd (%p7607_p6), [#allocation4], 4294967040 }
 0x10c   : > { %6389 = dma.done.wait (%p7608_p7), [#allocation7], 384   ;;  %p7609_p11 = pmov %p7606_p3 }
 0x10d   : > { %s7610_s28 = sld [smem:[#allocation31_spill]]  ;;  %s626_s14 = sand.u32 1, %s7605_s13  }
 0x10e   : > { %6391 = vsyncadd (%p7609_p11), [#allocation7], 4294966912  ;;  %s7611_s4 = sld [smem:[#allocation36_spill]]  ;;  %s627_s24 = scalar_lea.sflag [#allocation10], %s626_s14 }
 0x113   : > { %s628_s1 = sand.u32 1, %s7610_s28  }
 0x114   : > { %s5416_s3 = sshll.u32 %s628_s1, 5  ;;  %p7612_p0 = scmp.ne.s32.totalorder %s7611_s4, 0 }
 0x115   : > { %s6900_s8 = scalar_lea.vmem [#allocation9], %s5416_s3 }
 0x116   : > { %6393 = dma.done.wait (%p7612_p0), %s627_s24, 1024  }
 0x117   : > { %6395 = vsyncadd (%p7612_p0), %s627_s24, 4294966272  ;;  %s6906_s19 = scalar_lea.vmem [#allocation11], %s5416_s3  ;;  %s645_s22 = scalar_lea.sflag [#allocation13], %s626_s14 }
 0x118   : > { %s6908_s20 = scalar_lea.vmem [#allocation12], %s5416_s3 }
 0x119   : > { %6397 = dma.done.wait (%p7612_p0), %s645_s22, 8704  }
 0x11a   : > { %6399 = vsyncadd (%p7612_p0), %s645_s22, 4294958592  ;;  %s5419_s17 = sshll.u32 %s628_s1, 9  ;;  %s663_s27 = scalar_lea.sflag [#allocation16], %s626_s14 }
 0x11b   : > { %s6914_s29 = scalar_lea.vmem [#allocation14], %s5419_s17  ;;  %s6916_s16 = scalar_lea.vmem [#allocation15], %s5419_s17 }
 0x11c   : > { %6401 = dma.done.wait (%p7612_p0), %s663_s27, 8448  }
 0x11d   : > { %6403 = vsyncadd (%p7612_p0), %s663_s27, 4294958848  ;;  %s5421_s30 = sshll.u32 %s628_s1, 4  ;;  %s681_s26 = scalar_lea.sflag [#allocation19], %s628_s1 }
 0x11e   : > { %s6922_s6 = scalar_lea.vmem [#allocation17], %s5421_s30  ;;  %s6924_s21 = scalar_lea.vmem [#allocation18], %s5421_s30 }
 0x11f   : > { %6405 = dma.done.wait (%p7612_p0), %s681_s26, 256  }
 0x120   : > { %6407 = vsyncadd (%p7612_p0), %s681_s26, 4294967040  ;;  %p759_p4 = scmp.lt.s32.totalorder %s7605_s13, 1  ;;  %s7613_s15 = sld [smem:[#allocation41_spill]] }
 0x121   : > { %p7614_p9 = scmp.ne.s32.totalorder %s7605_s13, 0 }
 0x122   : > { %s760_s25 = scalar_select %p759_p4, %s7605_s13, 1 }
 0x123   : > { %767 = sbr.rel (%p7614_p9) target bundleno = 499 (0x1f3), region = 116  ;;  %s7615_s1 = sld [smem:[#allocation40_spill]] (!%p7614_p9) }
 0x124   : > { %s5542_s18 = sshll.u32 %s760_s25, 5 }
 0x126   : > { %s6935_s28 = scalar_lea.vmem %s7613_s15, %s5542_s18 }
 0x128   : > { %v771_v0 = vld [vmem:[#allocation8 + $0x8] sm:$0xff]  ;;  %v770_v1 = vld [vmem:[#allocation8] sm:$0xff]  ;;  %vm777_vm0 = vcmask 130048   ;;  %v769_v3 = vld [vmem:[#allocation3 + $0x8] sm:$0xff]  ;;  %vm859_vm1 = vcmask 261120  }
 0x129   : > { %v768_v2 = vld [vmem:[#allocation3] sm:$0xff]  ;;  %5650 = vmatprep.subr.mxu0 %v771_v0  ;;  %v5426_v4 = vld [vmem:[%s7615_s1] ss:$0 sm:$0xff] }
 0x12a   : > { %5654 = vmatprep.mubr.msk.f32.mxu0 %vm777_vm0, %v768_v2  ;;  %5651 = vmatpush3.msra.mxu0 %v771_v0 }
 0x12b   : > { %5652 = vmatprep.subr.mxu0 %v770_v1 }
 0x12c   : > { %5653 = vmatpush3.msra.mxu0 %v770_v1 }
 0x12d   : > { %5655 = vmatmul.mubr.msk.f32.vlgmr.msra.gmra.mxu0 %vm777_vm0, %v769_v3 }
 0x1ed   : > { %v5656_v5 = vpop.f32.mrf.mxu0 }
 0x1ee   : > { %v856_v6 = vadd.f32 %v5656_v5, %v5426_v4 }
 0x1ef   : > { %v850_v7 = vpop.f32.mrf.mxu0 }
 0x1f0   : > { %861 = vst.msk [vmem:[#allocation2 + $0x8] sm:$0xff] %vm859_vm1, %v856_v6  ;;  %v851_v8 = vadd.f32 %v5426_v4, %v850_v7 }
 0x1f2   : > { %860 = vst.msk [vmem:[#allocation2] sm:$0xff] %vm859_vm1, %v851_v8 }
 0x1f3 PF: > { %v868_v9 = vld [vmem:[%s6935_s28 + $0x18] sm:$0xff]  ;;  %v867_v10 = vld [vmem:[%s6935_s28 + $0x10] sm:$0xff]  ;;  %vm869_vm2 = vcmask 261120   ;;  %v866_v12 = vld [vmem:[%s6935_s28 + $0x8] sm:$0xff]  ;;  %s6445_s13 = smov 32   ;;  %s6446_s3 = smov 96  }
 0x1f4   : > { %5657 = vmatprep.subr.mxu0 %v868_v9  ;;  %v5432_v13 = vld [vmem:[%s6924_s21 + $0x1] ss:$0 sm:$0xff]  ;;  %v865_v14 = vld [vmem:[%s6935_s28] sm:$0xff]  ;;  %v5431_v19 = vld [vmem:[%s6924_s21] ss:$0 sm:$0xff]  ;;  %vm992_vm3 = vcmask 64512  }
 0x1f5   : > { %5658 = vmatpush3.msra.mxu0 %v868_v9  ;;  %964 = vrot.lane.b32.xlu0 %v5432_v13, %s6445_s13  ;;  %s6447_s24 = smov 88   ;;  %s6448_s22 = smov 120   ;;  %vm1351_vm4 = vcmask 130048   ;;  %v5433_v48 = vld [vmem:[%s6924_s21 + $0x2] ss:$0 sm:$0xff]  ;;  %vm6458_vm5 = vmmov 0  }
 0x1f6   : > { %5659 = vmatprep.subr.mxu0 %v867_v10  ;;  %s6449_s17 = smov 80   ;;  %s6450_s27 = smov 112  }
 0x1f7   : > { %5660 = vmatpush3.msra.mxu0 %v867_v10  ;;  %v6952_v15 = vld [vmem:[#allocation2 + $0x8] sm:$0xff]  ;;  %s6451_s30 = smov 72   ;;  %s6452_s26 = smov 104  }
 0x1f8   : > { %5661 = vmatprep.subr.mxu0 %v866_v12  ;;  %s6453_s25 = smov 64   ;;  %s6454_s18 = smov 56  }
 0x1f9   : > { %v6944_v11 = vld [vmem:[#allocation2] sm:$0xff]  ;;  %5662 = vmatpush3.msra.mxu0 %v866_v12  ;;  %s6455_s23 = smov 48   ;;  %s6456_s5 = smov 40  }
 0x1fa   : > { %5665 = vmatprep.mubr.msk.f32.mxu0 %vm869_vm2, %v6944_v11  ;;  %5663 = vmatprep.subr.mxu0 %v865_v14 }
 0x1fb   : > { %5664 = vmatpush3.msra.mxu0 %v865_v14 }
 0x1fc   : > { %5666 = vmatmul.mubr.msk.f32.vlgmr.msra.gmra.mxu0 %vm869_vm2, %v6952_v15 }
 0x267   : > { %v965_v16 = vpop.permute.xlu0 %964 }
 0x2bc   : > { %v6956_v17 = vpop.f32.mrf.mxu0 }
 0x2bd   : > { %v968_v18 = vadd.f32 %v6956_v17, %v965_v16  ;;  %v957_v23 = vadd.f32 %v6956_v17, %v5431_v19 }
 0x2be   : > { %v6960_v20 = vpop.f32.mrf.mxu0 }
 0x2bf   : > { %v956_v21 = vadd.f32 %v5431_v19, %v6960_v20  ;;  %v967_v22 = vadd.f32 %v965_v16, %v6960_v20  ;;  %990 = vrot.lane.b32.xlu0 %v968_v18, %s6446_s3  ;;  %v985_v25 = vmul.f32 0.35355338, %v957_v23 }
 0x2c1   : > { %v984_v24 = vmul.f32 0.35355338, %v956_v21  ;;  %988 = vrot.lane.b32.xlu1 %v967_v22, %s6446_s3 }
 0x2c3   : > { %1082 = vrot.lane.b32.xlu0 %v967_v22, %s6447_s24  ;;  %5672 = vmatprep.mubr.msk.f32.mxu1 %vm992_vm3, %v984_v24 }
 0x2c5   : > { %1084 = vrot.lane.b32.xlu1 %v968_v18, %s6447_s24 }
 0x2c7   : > { %1080 = vrot.lane.b32.xlu0 %v985_v25, %s6448_s22 }
 0x2c9   : > { %1078 = vrot.lane.b32.xlu1 %v984_v24, %s6448_s22 }
 0x2cb   : > { %1173 = vrot.lane.b32.xlu0 %v967_v22, %s6449_s17 }
 0x2cd   : > { %1175 = vrot.lane.b32.xlu1 %v968_v18, %s6449_s17 }
 0x2cf   : > { %1169 = vrot.lane.b32.xlu0 %v984_v24, %s6450_s27 }
 0x2d1   : > { %1266 = vrot.lane.b32.xlu1 %v968_v18, %s6451_s30  ;;  %v981_v18 = vld [vmem:[%s6900_s8 + $0x8] sm:$0xff] }
 0x2d3   : > { %1264 = vrot.lane.b32.xlu0 %v967_v22, %s6451_s30 }
 0x2d5   : > { %1171 = vrot.lane.b32.xlu1 %v985_v25, %s6450_s27 }
 0x2d7   : > { %1262 = vrot.lane.b32.xlu0 %v985_v25, %s6452_s26 }
 0x2d9   : > { %1260 = vrot.lane.b32.xlu1 %v984_v24, %s6452_s26 }
 0x331   : > { %v991_v26 = vpop.permute.xlu0 %990 }
 0x332   : > { %5668 = vmatprep.subr.msk.mxu1 %vm992_vm3, %v991_v26 }
 0x333   : > { %5669 = vmatpush3.xpose.msk.msra.mxu1 %vm992_vm3, %v991_v26  ;;  %v989_v27 = vpop.permute.xlu1 %988 }
 0x334   : > { %5670 = vmatprep.subr.msk.mxu1 %vm992_vm3, %v989_v27 }
 0x335   : > { %v1083_v28 = vpop.permute.xlu0 %1082 }
 0x337   : > { %5671 = vmatpush3.xpose.msk.msra.mxu1 %vm992_vm3, %v989_v27  ;;  %v1085_v29 = vpop.permute.xlu1 %1084 }
 0x338   : > { %5675 = vmatprep.subr.msk.mxu0 %vm992_vm3, %v1085_v29 }
 0x339   : > { %v1081_v30 = vpop.permute.xlu0 %1080  ;;  %5676 = vmatpush3.xpose.msk.msra.mxu0 %vm992_vm3, %v1085_v29 }
 0x33a   : > { %5673 = vmatmul.mubr.msk.f32.vlgmr.msra.gmra.mxu1 %vm992_vm3, %v985_v25  ;;  %5677 = vmatprep.subr.msk.mxu0 %vm992_vm3, %v1083_v28 }
 0x33b   : > { %v1079_v31 = vpop.permute.xlu1 %1078 }
 0x33c   : > { %5679 = vmatprep.mubr.msk.f32.mxu0 %vm992_vm3, %v1079_v31 }
 0x33d   : > { %v1174_v32 = vpop.permute.xlu0 %1173  ;;  %5678 = vmatpush3.xpose.msk.msra.mxu0 %vm992_vm3, %v1083_v28 }
 0x33f   : > { %v1176_v33 = vpop.permute.xlu1 %1175 }
 0x340   : > { %5680 = vmatmul.mubr.msk.f32.vlgmr.msra.gmra.mxu0 %vm992_vm3, %v1081_v30  ;;  %5682 = vmatprep.subr.msk.mxu1 %vm992_vm3, %v1176_v33 }
 0x341   : > { %v1170_v34 = vpop.permute.xlu0 %1169  ;;  %5683 = vmatpush3.xpose.msk.msra.mxu1 %vm992_vm3, %v1176_v33 }
 0x342   : > { %5684 = vmatprep.subr.msk.mxu1 %vm992_vm3, %v1174_v32  ;;  %5686 = vmatprep.mubr.msk.f32.mxu1 %vm992_vm3, %v1170_v34 }
 0x343   : > { %v1267_v35 = vpop.permute.xlu1 %1266 }
 0x344   : > { %5689 = vmatprep.subr.msk.mxu0 %vm992_vm3, %v1267_v35 }
 0x345   : > { %v1265_v36 = vpop.permute.xlu0 %1264  ;;  %5685 = vmatpush3.xpose.msk.msra.mxu1 %vm992_vm3, %v1174_v32  ;;  %5690 = vmatpush3.xpose.msk.msra.mxu0 %vm992_vm3, %v1267_v35 }
 0x346   : > { %5691 = vmatprep.subr.msk.mxu0 %vm992_vm3, %v1265_v36 }
 0x347   : > { %v1172_v37 = vpop.permute.xlu1 %1171 }
 0x348   : > { %5687 = vmatmul.mubr.msk.f32.vlgmr.msra.gmra.mxu1 %vm992_vm3, %v1172_v37 }
 0x349   : > { %5692 = vmatpush3.xpose.msk.msra.mxu0 %vm992_vm3, %v1265_v36  ;;  %v1263_v39 = vpop.permute.xlu0 %1262 }
 0x34a   : > { %5710 = vmatprep.subr.mxu0 %v981_v18 }
 0x34b   : > { %v1261_v38 = vpop.permute.xlu1 %1260 }
 0x34c   : > { %5693 = vmatprep.mubr.msk.f32.mxu0 %vm992_vm3, %v1261_v38 }
 0x34d   : > { %5694 = vmatmul.mubr.msk.f32.vlgmr.msra.gmra.mxu0 %vm992_vm3, %v1263_v39 }
 0x34e   : > { %5711 = vmatpush3.msra.mxu0 %v981_v18 }
 0x3fa   : > { %v5674_v40 = vpop.f32.mrf.mxu1 }
 0x3fb   : > { %v1355_v41 = vsel %vm1351_vm4, %v5674_v40, -inf }
 0x3fc   : > { %1356 = vmax.xlane.f32.xlu0 %v1355_v41  ;;  %v1069_v42 = vpop.f32.mrf.mxu1 }
 0x3fd   : > { %v1352_v43 = vsel %vm1351_vm4, %v1069_v42, -inf }
 0x3fe   : > { %1353 = vmax.xlane.f32.xlu1 %v1352_v43 }
 0x400   : > { %v5681_v44 = vpop.f32.mrf.mxu0 }
 0x401   : > { %v1361_v45 = vsel %vm1351_vm4, %v5681_v44, -inf }
 0x402   : > { %v1160_v46 = vpop.f32.mrf.mxu0  ;;  %1362 = vmax.xlane.f32.xlu1 %v1361_v45 }
 0x403   : > { %v1358_v47 = vsel %vm1351_vm4, %v1160_v46, -inf }
 0x404   : > { %1359 = vmax.xlane.f32.xlu0 %v1358_v47 }
 0x408   : > { %v7020_v8 = vpop.f32.mrf.mxu1 }
 0x40a   : > { %v1251_v9 = vpop.f32.mrf.mxu1 }
 0x40b   : > { %v1364_v12 = vsel %vm1351_vm4, %v1251_v9, -inf }
 0x40d   : > { %v7022_v10 = vpop.f32.mrf.mxu0 }
 0x40e   : > { %v1373_v16 = vsel %vm1351_vm4, %v7022_v10, -inf }
 0x40f   : > { %v1342_v13 = vpop.f32.mrf.mxu0 }
 0x410   : > { %v1370_v14 = vsel %vm1351_vm4, %v1342_v13, -inf }
 0x41a   : > { %975 = vrot.lane.b32.xlu0 %v5433_v48, %s6453_s25 }
 0x485   : > { %v1357_v49 = vpop.xlane.xlu0 %1356 }
 0x486   : > { %v1377_v50 = vsub.f32 %v5674_v40, %v1357_v49 }
 0x487   : > { %v1354_v51 = vpop.xlane.xlu1 %1353 }
 0x488   : > { %v1386_v52 = vmul.f32 1.442695, %v1377_v50  ;;  %v1376_v53 = vsub.f32 %v1069_v42, %v1354_v51 }
 0x48a   : > { %5970 = vpow2.f32 %v1386_v52  ;;  %v1384_v57 = vmul.f32 1.442695, %v1376_v53 }
 0x48b   : > { %v1363_v54 = vpop.xlane.xlu1 %1362 }
 0x48c   : > { %v1379_v55 = vsub.f32 %v5681_v44, %v1363_v54 }
 0x48d   : > { %v1360_v56 = vpop.xlane.xlu0 %1359 }
 0x48e   : > { %v1390_v58 = vmul.f32 1.442695, %v1379_v55  ;;  %v1378_v59 = vsub.f32 %v1160_v46, %v1360_v56  ;;  %v980_v56 = vld [vmem:[%s6900_s8] sm:$0xff] }
 0x490   : > { %5972 = vpow2.f32 %v1390_v58  ;;  %v1388_v61 = vmul.f32 1.442695, %v1378_v59 }
 0x491   : > { %v976_v60 = vpop.permute.xlu0 %975  ;;  %5974 = vpow2.f32 %v1384_v57 }
 0x492   : > { %v7010_v62 = vadd.f32 %v976_v60, %v6960_v20  ;;  %5976 = vpow2.f32 %v1388_v61  ;;  %v979_v63 = vadd.f32 %v6956_v17, %v976_v60  ;;  %v1367_v17 = vsel %vm1351_vm4, %v7020_v8, -inf }
 0x494   : > { %1442 = vrot.lane.b32.xlu0 %v7010_v62, %s6453_s25 }
 0x497   : > { %v5971_v0 = vpop.eup %5970 }
 0x498   : > { %1531 = vrot.lane.b32.xlu0 %v979_v63, %s6454_s18  ;;  %v1403_v1 = vsel %vm1351_vm4, %v5971_v0, 0.0 }
 0x499   : > { %1404 = vadd.xlane.f32.xlu1 %v1403_v1 }
 0x49c   : > { %1529 = vrot.lane.b32.xlu0 %v7010_v62, %s6454_s18 }
 0x49d   : > { %v5973_v2 = vpop.eup %5972 }
 0x49e   : > { %v1409_v3 = vsel %vm1351_vm4, %v5973_v2, 0.0  ;;  %v5975_v4 = vpop.eup %5974 }
 0x49f   : > { %1410 = vadd.xlane.f32.xlu1 %v1409_v3  ;;  %v1400_v5 = vsel %vm1351_vm4, %v5975_v4, 0.0  ;;  %v5977_v6 = vpop.eup %5976 }
 0x4a0   : > { %v1406_v7 = vsel %vm1351_vm4, %v5977_v6, 0.0 }
 0x4a3   : > { %1401 = vadd.xlane.f32.xlu1 %v1400_v5 }
 0x4a7   : > { %1407 = vadd.xlane.f32.xlu1 %v1406_v7 }
 0x4b8   : > { %1444 = vrot.lane.b32.xlu1 %v979_v63, %s6453_s25 }
 0x4bb   : > { %1365 = vmax.xlane.f32.xlu0 %v1364_v12 }
 0x4bf   : > { %1371 = vmax.xlane.f32.xlu0 %v1370_v14  ;;  %v983_v14 = vld [vmem:[%s6900_s8 + $0x18] sm:$0xff] }
 0x4c3   : > { %1374 = vmax.xlane.f32.xlu0 %v1373_v16 }
 0x4dc   : > { %1368 = vmax.xlane.f32.xlu1 %v1367_v17 }
 0x4ed   : > { %1780 = vrot.lane.b32.xlu1 %v979_v63, %s6455_s23 }
 0x4f1   : > { %1950 = vrot.lane.b32.xlu1 %v979_v63, %s6456_s5 }
 0x506   : > { %v1443_v23 = vpop.permute.xlu0 %1442 }
 0x50a   : > { %v1532_v25 = vpop.permute.xlu0 %1531 }
 0x50e   : > { %v1530_v32 = vpop.permute.xlu0 %1529 }
 0x522   : > { %v1405_v19 = vpop.xlane.xlu1 %1404 }
 0x523   : > { %5978 = vrcp.f32 %v1405_v19 }
 0x528   : > { %v1411_v20 = vpop.xlane.xlu1 %1410 }
 0x52c   : > { %v1402_v21 = vpop.xlane.xlu1 %1401 }
 0x52d   : > { %5980 = vrcp.f32 %v1402_v21 }
 0x52e   : > { %5982 = vrcp.f32 %v1411_v20 }
 0x530   : > { %v1408_v22 = vpop.xlane.xlu1 %1407  ;;  %v5979_v26 = vpop.eup %5978 }
 0x531   : > { %5984 = vrcp.f32 %v1408_v22  ;;  %v1433_v29 = vmul.f32 %v5979_v26, %v5971_v0 }
 0x534   : > { %v1445_v24 = vpop.permute.xlu1 %1444 }
 0x535   : > { %5696 = vmatprep.subr.mxu1 %v1445_v24 }
 0x536   : > { %5697 = vmatpush3.msra.mxu1 %v1445_v24 }
 0x537   : > { %5698 = vmatprep.subr.mxu1 %v1443_v23 }
 0x538   : > { %5699 = vmatpush3.msra.mxu1 %v1443_v23 }
 0x539   : > { %5703 = vmatprep.subr.mxu1 %v1532_v25 }
 0x53a   : > { %v5981_v27 = vpop.eup %5980 }
 0x53b   : > { %v1432_v28 = vmul.f32 %v5981_v27, %v5975_v4  ;;  %v5983_v30 = vpop.eup %5982 }
 0x53c   : > { %v1435_v34 = vmul.f32 %v5983_v30, %v5973_v2  ;;  %v5466_v30 = vld [vmem:[%s6924_s21 + $0x3] ss:$0 sm:$0xff] }
 0x53d   : > { %5700 = vmatprep.mubr.msk.f32.mxu1 %vm1351_vm4, %v1432_v28 }
 0x53e   : > { %v5985_v31 = vpop.eup %5984  ;;  %5701 = vmatmul.mubr.msk.f32.vlgmr.msra.gmra.mxu1 %vm1351_vm4, %v1433_v29 }
 0x53f   : > { %5704 = vmatpush3.msra.mxu1 %v1532_v25  ;;  %v1434_v33 = vmul.f32 %v5985_v31, %v5977_v6 }
 0x540   : > { %5705 = vmatprep.subr.mxu1 %v1530_v32 }
 0x541   : > { %5706 = vmatpush3.msra.mxu1 %v1530_v32  ;;  %5707 = vmatprep.mubr.msk.f32.mxu1 %vm1351_vm4, %v1434_v33 }
 0x542   : > { %5708 = vmatmul.mubr.msk.f32.vlgmr.msra.gmra.mxu1 %vm1351_vm4, %v1435_v34  ;;  %5715 = vmatprep.subr.mxu1 %v980_v56 }
 0x543   : > { %5716 = vmatpush3.msra.mxu1 %v980_v56 }
 0x544   : > { %v1366_v35 = vpop.xlane.xlu0 %1365 }
 0x545   : > { %v1380_v36 = vsub.f32 %v1251_v9, %v1366_v35 }
 0x547   : > { %v1392_v37 = vmul.f32 1.442695, %v1380_v36 }
 0x548   : > { %v1372_v38 = vpop.xlane.xlu0 %1371 }
 0x549   : > { %5986 = vpow2.f32 %v1392_v37  ;;  %v1382_v39 = vsub.f32 %v1342_v13, %v1372_v38  ;;  %v982_v13 = vld [vmem:[%s6900_s8 + $0x10] sm:$0xff]  ;;  %s7616_s8 = sld [smem:[#allocation33_spill]] }
 0x54a   : > { %5727 = vmatprep.subr.mxu1 %v982_v13 }
 0x54b   : > { %v1396_v40 = vmul.f32 1.442695, %v1382_v39 }
 0x54c   : > { %v1375_v45 = vpop.xlane.xlu0 %1374 }
 0x54d   : > { %5988 = vpow2.f32 %v1396_v40  ;;  %v1383_v46 = vsub.f32 %v7022_v10, %v1375_v45 }
 0x54f   : > { %v1398_v49 = vmul.f32 1.442695, %v1383_v46  ;;  %p5525_p8 = scmp.ne.s32.totalorder %s7616_s8, 1 }
 0x556   : > { %v5987_v41 = vpop.eup %5986 }
 0x557   : > { %v1412_v42 = vsel %vm1351_vm4, %v5987_v41, 0.0 }
 0x558   : > { %1413 = vadd.xlane.f32.xlu1 %v1412_v42  ;;  %v2169_v42 = vld [vmem:[%s6906_s19 + $0x8] sm:$0xff] }
 0x55a   : > { %v5989_v43 = vpop.eup %5988 }
 0x55b   : > { %v1418_v44 = vsel %vm1351_vm4, %v5989_v43, 0.0 }
 0x55c   : > { %1419 = vadd.xlane.f32.xlu1 %v1418_v44 }
 0x565   : > { %v1369_v47 = vpop.xlane.xlu1 %1368 }
 0x566   : > { %v1381_v48 = vsub.f32 %v7020_v8, %v1369_v47 }
 0x568   : > { %v1394_v50 = vmul.f32 1.442695, %v1381_v48 }
 0x569   : > { %v1781_v51 = vpop.permute.xlu1 %1780 }
 0x56a   : > { %5990 = vpow2.f32 %v1394_v50  ;;  %5720 = vmatprep.subr.mxu0 %v1781_v51 }
 0x56b   : > { %5992 = vpow2.f32 %v1398_v49 }
 0x56d   : > { %1948 = vrot.lane.b32.xlu1 %v7010_v62, %s6456_s5  ;;  %v1951_v57 = vpop.permute.xlu1 %1950 }
 0x577   : > { %v5991_v52 = vpop.eup %5990 }
 0x578   : > { %v1415_v53 = vsel %vm1351_vm4, %v5991_v52, 0.0  ;;  %v5993_v54 = vpop.eup %5992 }
 0x579   : > { %1416 = vadd.xlane.f32.xlu0 %v1415_v53  ;;  %v1421_v55 = vsel %vm1351_vm4, %v5993_v54, 0.0 }
 0x57d   : > { %1422 = vadd.xlane.f32.xlu0 %v1421_v55 }
 0x593   : > { %1778 = vrot.lane.b32.xlu0 %v7010_v62, %s6455_s23 }
 0x5e1   : > { %v1414_v58 = vpop.xlane.xlu1 %1413 }
 0x5e2   : > { %5994 = vrcp.f32 %v1414_v58 }
 0x5e5   : > { %v1420_v60 = vpop.xlane.xlu1 %1419 }
 0x5e6   : > { %5996 = vrcp.f32 %v1420_v60 }
 0x5e9   : > { %v1949_v10 = vpop.permute.xlu1 %1948 }
 0x5ef   : > { %v5995_v63 = vpop.eup %5994 }
 0x5f0   : > { %v1436_v3 = vmul.f32 %v5995_v63, %v5987_v41  ;;  %v2171_v41 = vld [vmem:[%s6906_s19 + $0x18] sm:$0xff] }
 0x5f3   : > { %v5997_v5 = vpop.eup %5996 }
 0x5f4   : > { %v1438_v8 = vmul.f32 %v5997_v5, %v5989_v43  ;;  %v2170_v43 = vld [vmem:[%s6906_s19 + $0x10] sm:$0xff] }
 0x5fe   : > { %v5702_v59 = vpop.f32.mrf.mxu1 }
 0x600   : > { %v1520_v61 = vpop.f32.mrf.mxu1 }
 0x601   : > { %5717 = vmatprep.mubr.msk.f32.mxu1 %vm992_vm3, %v1520_v61 }
 0x602   : > { %v5709_v0 = vpop.f32.mrf.mxu1  ;;  %5718 = vmatmul.mubr.msk.f32.vlgmr.msra.gmra.mxu1 %vm992_vm3, %v5702_v59  ;;  %v1417_v1 = vpop.xlane.xlu0 %1416 }
 0x603   : > { %5998 = vrcp.f32 %v1417_v1  ;;  %5728 = vmatpush3.msra.mxu1 %v982_v13  ;;  %v864_v1 = vld [vmem:[#allocation6] sm:$0xff] }
 0x604   : > { %v1607_v2 = vpop.f32.mrf.mxu1  ;;  %5739 = vmatprep.subr.mxu1 %v983_v14 }
 0x605   : > { %5712 = vmatprep.mubr.msk.f32.mxu0 %vm992_vm3, %v1607_v2  ;;  %v5467_v2 = vld [vmem:[%s6924_s21 + $0x9] ss:$0 sm:$0xff] }
 0x606   : > { %5713 = vmatmul.mubr.msk.f32.vlgmr.msra.gmra.mxu0 %vm992_vm3, %v5709_v0  ;;  %v1423_v62 = vpop.xlane.xlu0 %1422 }
 0x607   : > { %5721 = vmatpush3.msra.mxu0 %v1781_v51  ;;  %6000 = vrcp.f32 %v1423_v62  ;;  %5724 = vmatprep.mubr.msk.f32.mxu0 %vm1351_vm4, %v1436_v3 }
 0x60a   : > { %v1779_v4 = vpop.permute.xlu0 %1778 }
 0x60b   : > { %5722 = vmatprep.subr.mxu0 %v1779_v4 }
 0x60c   : > { %5723 = vmatpush3.msra.mxu0 %v1779_v4  ;;  %v5468_v4 = vld [vmem:[%s6924_s21 + $0xa] ss:$0 sm:$0xff] }
 0x60d   : > { %5732 = vmatprep.subr.mxu0 %v1951_v57 }
 0x610   : > { %v5999_v6 = vpop.eup %5998 }
 0x611   : > { %v1437_v7 = vmul.f32 %v5999_v6, %v5991_v52 }
 0x613   : > { %5725 = vmatmul.mubr.msk.f32.vlgmr.msra.gmra.mxu0 %vm1351_vm4, %v1437_v7 }
 0x614   : > { %v6001_v9 = vpop.eup %6000  ;;  %5733 = vmatpush3.msra.mxu0 %v1951_v57  ;;  %5736 = vmatprep.mubr.msk.f32.mxu0 %vm1351_vm4, %v1438_v8 }
 0x615   : > { %5734 = vmatprep.subr.mxu0 %v1949_v10  ;;  %v1439_v12 = vmul.f32 %v6001_v9, %v5993_v54  ;;  %v6457_v54 = vmov 0.0  }
 0x616   : > { %5735 = vmatpush3.msra.mxu0 %v1949_v10 }
 0x617   : > { %5737 = vmatmul.mubr.msk.f32.vlgmr.msra.gmra.mxu0 %vm1351_vm4, %v1439_v12  ;;  %5744 = vmatprep.subr.mxu0 %v2171_v41  ;;  %v5473_v12 = vld [vmem:[%s6924_s21 + $0x5] ss:$0 sm:$0xff] }
 0x618   : > { %5745 = vmatpush3.msra.mxu0 %v2171_v41 }
 0x619   : > { %5746 = vmatprep.subr.mxu0 %v2170_v43 }
 0x61a   : > { %5747 = vmatpush3.msra.mxu0 %v2170_v43 }
 0x61b   : > { %5748 = vmatprep.subr.mxu0 %v2169_v42 }
 0x61c   : > { %5749 = vmatpush3.msra.mxu0 %v2169_v42 }
 0x6c2   : > { %v5719_v22 = vpop.f32.mrf.mxu1 }
 0x6c4   : > { %v1769_v23 = vpop.f32.mrf.mxu1 }
 0x6c6   : > { %v5714_v16 = vpop.f32.mrf.mxu0 }
 0x6c7   : > { %v1775_v25 = vadd.f32 %v5719_v22, %v5714_v16 }
 0x6c8   : > { %v1688_v17 = vpop.f32.mrf.mxu0 }
 0x6c9   : > { %v1770_v27 = vadd.f32 %v1769_v23, %v1688_v17  ;;  %v5469_v17 = vld [vmem:[%s6924_s21 + $0x4] ss:$0 sm:$0xff] }
 0x6d3   : > { %v5726_v18 = vpop.f32.mrf.mxu0 }
 0x6d5   : > { %v1856_v19 = vpop.f32.mrf.mxu0 }
 0x6d6   : > { %5729 = vmatprep.mubr.msk.f32.mxu1 %vm992_vm3, %v1856_v19 }
 0x6d7   : > { %5730 = vmatmul.mubr.msk.f32.vlgmr.msra.gmra.mxu1 %vm992_vm3, %v5726_v18  ;;  %v5738_v20 = vpop.f32.mrf.mxu0 }
 0x6d8   : > { %5740 = vmatpush3.msra.mxu1 %v983_v14 }
 0x6d9   : > { %v2026_v21 = vpop.f32.mrf.mxu0  ;;  %5755 = vmatprep.subr.mxu1 %v6457_v54 }
 0x6da   : > { %5741 = vmatprep.mubr.msk.f32.mxu1 %vm992_vm3, %v2026_v21 }
 0x6db   : > { %5742 = vmatmul.mubr.msk.f32.vlgmr.msra.gmra.mxu1 %vm992_vm3, %v5738_v20 }
 0x6dc   : > { %5763 = vmatprep.mubr.msk.f32.mxu1 %vm6458_vm5, %v6457_v54 }
 0x797   : > { %v5731_v24 = vpop.f32.mrf.mxu1 }
 0x798   : > { %v1947_v28 = vadd.f32 %v5731_v24, %v1775_v25 }
 0x799   : > { %v1937_v26 = vpop.f32.mrf.mxu1 }
 0x79a   : > { %v1946_v31 = vadd.f32 %v1937_v26, %v1770_v27 }
 0x79b   : > { %v5743_v29 = vpop.f32.mrf.mxu1 }
 0x79c   : > { %v2117_v32 = vadd.f32 %v5743_v29, %v1947_v28 }
 0x79d   : > { %v2107_v33 = vpop.f32.mrf.mxu1 }
 0x79e   : > { %v2124_v34 = vadd.f32 %v5466_v30, %v2117_v32  ;;  %v2116_v35 = vadd.f32 %v2107_v33, %v1946_v31 }
 0x7a0   : > { %v2123_v36 = vadd.f32 %v5466_v30, %v2116_v35  ;;  %v2126_v37 = vadd.f32 %v2124_v34, %v6952_v15  ;;  %v2168_v15 = vld [vmem:[%s6906_s19] sm:$0xff] }
 0x7a1   : > { %5750 = vmatprep.subr.mxu0 %v2168_v15 }
 0x7a2   : > { %v2132_v38 = vsel %vm869_vm2, %v2126_v37, 0.0  ;;  %v2125_v39 = vadd.f32 %v2123_v36, %v6944_v11  ;;  %5751 = vmatpush3.msra.mxu0 %v2168_v15 }
 0x7a3   : > { %2133 = vadd.xlane.f32.xlu1 %v2132_v38 }
 0x7a4   : > { %v2129_v40 = vsel %vm869_vm2, %v2125_v39, 0.0 }
 0x7a5   : > { %2130 = vadd.xlane.f32.xlu0 %v2129_v40 }
 0x7b4   : > { %2268 = vrot.lane.b32.xlu1 %v2171_v41, %s6446_s3 }
 0x7b8   : > { %2264 = vrot.lane.b32.xlu1 %v2169_v42, %s6446_s3 }
 0x7bc   : > { %2262 = vrot.lane.b32.xlu1 %v2168_v15, %s6446_s3 }
 0x82c   : > { %v2134_v11 = vpop.xlane.xlu1 %2133 }
 0x82d   : > { %v2137_v44 = vmul.f32 0.03125, %v2134_v11 }
 0x82e   : > { %v2131_v45 = vpop.xlane.xlu0 %2130 }
 0x82f   : > { %v2136_v46 = vmul.f32 0.03125, %v2131_v45  ;;  %v2139_v47 = vsub.f32 %v2126_v37, %v2137_v44  ;;  %v5474_v37 = vld [vmem:[%s6924_s21 + $0x6] ss:$0 sm:$0xff] }
 0x830   : > { %v2269_v53 = vpop.permute.xlu1 %2268 }
 0x831   : > { %v2138_v48 = vsub.f32 %v2125_v39, %v2136_v46  ;;  %v2141_v51 = vmul.f32 %v2139_v47, %v2139_v47  ;;  %5756 = vmatpush3.msra.mxu1 %v2269_v53 }
 0x832   : > { %5757 = vmatprep.subr.mxu1 %v6457_v54 }
 0x833   : > { %v2140_v49 = vmul.f32 %v2138_v48, %v2138_v48  ;;  %v2145_v52 = vsel %vm869_vm2, %v2141_v51, 0.0 }
 0x834   : > { %v2265_v59 = vpop.permute.xlu1 %2264 }
 0x835   : > { %v2142_v50 = vsel %vm869_vm2, %v2140_v49, 0.0 }
 0x836   : > { %2143 = vadd.xlane.f32.xlu0 %v2142_v50 }
 0x838   : > { %v2263_v0 = vpop.permute.xlu1 %2262 }
 0x83a   : > { %2146 = vadd.xlane.f32.xlu0 %v2145_v52 }
 0x850   : > { %2266 = vrot.lane.b32.xlu0 %v2170_v43, %s6446_s3 }
 0x8bf   : > { %v2144_v55 = vpop.xlane.xlu0 %2143 }
 0x8c0   : > { %v2148_v56 = vmul.f32 0.03125, %v2144_v55 }
 0x8c2   : > { %v2150_v57 = vadd.f32 1e-05, %v2148_v56 }
 0x8c3   : > { %v2147_v58 = vpop.xlane.xlu0 %2146 }
 0x8c4   : > { %6002 = vrsqrt.f32 %v2150_v57  ;;  %v2149_v60 = vmul.f32 0.03125, %v2147_v58 }
 0x8c6   : > { %v2151_v61 = vadd.f32 1e-05, %v2149_v60 }
 0x8c7   : > { %v2267_v63 = vpop.permute.xlu0 %2266 }
 0x8c8   : > { %6004 = vrsqrt.f32 %v2151_v61  ;;  %5758 = vmatpush3.msra.mxu1 %v2267_v63 }
 0x8c9   : > { %5759 = vmatprep.subr.mxu1 %v6457_v54 }
 0x8ca   : > { %5760 = vmatpush3.msra.mxu1 %v2265_v59 }
 0x8cb   : > { %5761 = vmatprep.subr.mxu1 %v6457_v54 }
 0x8cc   : > { %5762 = vmatpush3.msra.mxu1 %v2263_v0 }
 0x8cd   : > { %5764 = vmatmul.mubr.msk.f32.vlgmr.msra.gmra.mxu1 %vm869_vm2, %v864_v1 }
 0x8d1   : > { %v6003_v3 = vpop.eup %6002 }
 0x8d2   : > { %v2158_v62 = vmul.f32 %v6003_v3, %v5467_v2 }
 0x8d4   : > { %v2160_v5 = vmul.f32 %v2158_v62, %v2138_v48 }
 0x8d5   : > { %v6005_v6 = vpop.eup %6004 }
 0x8d6   : > { %v2159_v7 = vmul.f32 %v6005_v6, %v5467_v2  ;;  %v7086_v8 = vadd.f32 %v5468_v4, %v2160_v5 }
 0x8d8   : > { %v2161_v9 = vmul.f32 %v2159_v7, %v2139_v47  ;;  %5752 = vmatprep.mubr.msk.f32.mxu0 %vm869_vm2, %v7086_v8 }
 0x8da   : > { %v7090_v10 = vadd.f32 %v5468_v4, %v2161_v9 }
 0x8dc   : > { %5753 = vmatmul.mubr.msk.f32.vlgmr.msra.gmra.mxu0 %vm869_vm2, %v7090_v10 }
 0x98d   : > { %v7095_v13 = vpop.f32.mrf.mxu1 }
 0x98e   : > { %v2352_v14 = vadd.f32 %v5473_v12, %v7095_v13 }
 0x98f   : > { %v5765_v16 = vpop.f32.mrf.mxu1 }
 0x990   : > { %2457 = vrot.lane.b32.xlu0 %v2352_v14, %s6448_s22  ;;  %5766 = vmatprep.subr.msk.mxu0 %vm992_vm3, %v2352_v14 }
 0x991   : > { %5767 = vmatpush3.xpose.msk.msra.mxu0 %vm992_vm3, %v2352_v14 }
 0x99c   : > { %v5754_v18 = vpop.f32.mrf.mxu0 }
 0x99d   : > { %v2255_v19 = vadd.f32 %v5754_v18, %v5469_v17 }
 0x99e   : > { %v2249_v20 = vpop.f32.mrf.mxu0 }
 0x99f   : > { %v2368_v21 = vmul.f32 0.35355338, %v2255_v19  ;;  %v2250_v22 = vadd.f32 %v5469_v17, %v2249_v20 }
 0x9a1   : > { %v2367_v23 = vmul.f32 0.35355338, %v2250_v22  ;;  %2455 = vrot.lane.b32.xlu0 %v2368_v21, %s6448_s22 }
 0x9a3   : > { %2453 = vrot.lane.b32.xlu1 %v2367_v23, %s6448_s22  ;;  %5768 = vmatprep.mubr.msk.f32.mxu0 %vm992_vm3, %v2367_v23 }
 0x9a4   : > { %5769 = vmatmul.mubr.msk.f32.vlgmr.msra.gmra.mxu0 %vm992_vm3, %v2368_v21 }
 0x9a5   : > { %2540 = vrot.lane.b32.xlu0 %v2367_v23, %s6450_s27 }
 0x9a7   : > { %2544 = vrot.lane.b32.xlu1 %v2352_v14, %s6450_s27 }
 0x9a9   : > { %2631 = vrot.lane.b32.xlu0 %v2352_v14, %s6452_s26 }
 0x9ab   : > { %2542 = vrot.lane.b32.xlu1 %v2368_v21, %s6450_s27 }
 0x9ad   : > { %2629 = vrot.lane.b32.xlu0 %v2368_v21, %s6452_s26 }
 0x9af   : > { %2627 = vrot.lane.b32.xlu1 %v2367_v23, %s6452_s26 }
 0xa02   : > { %v2458_v24 = vpop.permute.xlu0 %2457 }
 0xa03   : > { %5771 = vmatprep.subr.msk.mxu1 %vm992_vm3, %v2458_v24 }
 0xa04   : > { %5772 = vmatpush3.xpose.msk.msra.mxu1 %vm992_vm3, %v2458_v24 }
 0xa13   : > { %v2456_v25 = vpop.permute.xlu0 %2455 }
 0xa15   : > { %v2454_v26 = vpop.permute.xlu1 %2453 }
 0xa16   : > { %5773 = vmatprep.mubr.msk.f32.mxu1 %vm992_vm3, %v2454_v26 }
 0xa17   : > { %5774 = vmatmul.mubr.msk.f32.vlgmr.msra.gmra.mxu1 %vm992_vm3, %v2456_v25  ;;  %v2541_v27 = vpop.permute.xlu0 %2540 }
 0xa18   : > { %5778 = vmatprep.mubr.msk.f32.mxu0 %vm992_vm3, %v2541_v27 }
 0xa19   : > { %v2545_v28 = vpop.permute.xlu1 %2544 }
 0xa1a   : > { %5776 = vmatprep.subr.msk.mxu0 %vm992_vm3, %v2545_v28 }
 0xa1b   : > { %v2632_v29 = vpop.permute.xlu0 %2631  ;;  %5777 = vmatpush3.xpose.msk.msra.mxu0 %vm992_vm3, %v2545_v28 }
 0xa1c   : > { %5781 = vmatprep.subr.msk.mxu1 %vm992_vm3, %v2632_v29 }
 0xa1d   : > { %v2543_v30 = vpop.permute.xlu1 %2542  ;;  %5782 = vmatpush3.xpose.msk.msra.mxu1 %vm992_vm3, %v2632_v29 }
 0xa1e   : > { %5779 = vmatmul.mubr.msk.f32.vlgmr.msra.gmra.mxu0 %vm992_vm3, %v2543_v30 }
 0xa1f   : > { %v2630_v32 = vpop.permute.xlu0 %2629 }
 0xa21   : > { %v2628_v31 = vpop.permute.xlu1 %2627 }
 0xa22   : > { %5783 = vmatprep.mubr.msk.f32.mxu1 %vm992_vm3, %v2628_v31 }
 0xa23   : > { %5784 = vmatmul.mubr.msk.f32.vlgmr.msra.gmra.mxu1 %vm992_vm3, %v2630_v32 }
 0xa64   : > { %v7128_v38 = vpop.f32.mrf.mxu0 }
 0xa65   : > { %v2717_v9 = vsel %vm992_vm3, %v7128_v38, -inf }
 0xa66   : > { %v2444_v39 = vpop.f32.mrf.mxu0 }
 0xa67   : > { %v2714_v41 = vsel %vm992_vm3, %v2444_v39, -inf }
 0xad7   : > { %v5775_v33 = vpop.f32.mrf.mxu1 }
 0xad8   : > { %v2723_v34 = vsel %vm992_vm3, %v5775_v33, -inf }
 0xad9   : > { %2724 = vmax.xlane.f32.xlu0 %v2723_v34  ;;  %v2531_v35 = vpop.f32.mrf.mxu1 }
 0xada   : > { %v2720_v36 = vsel %vm992_vm3, %v2531_v35, -inf }
 0xadb   : > { %2721 = vmax.xlane.f32.xlu1 %v2720_v36 }
 0xade   : > { %v7130_v40 = vpop.f32.mrf.mxu0 }
 0xadf   : > { %v2729_v11 = vsel %vm992_vm3, %v7130_v40, -inf }
 0xae0   : > { %v2618_v42 = vpop.f32.mrf.mxu0 }
 0xae1   : > { %v2726_v43 = vsel %vm992_vm3, %v2618_v42, -inf }
 0xae3   : > { %v7134_v15 = vpop.f32.mrf.mxu1 }
 0xae5   : > { %v2705_v44 = vpop.f32.mrf.mxu1 }
 0xae6   : > { %v2732_v45 = vsel %vm992_vm3, %v2705_v44, -inf }
 0xaef   : > { %2359 = vrot.lane.b32.xlu0 %v5474_v37, %s6445_s13 }
 0xb0e   : > { %2715 = vmax.xlane.f32.xlu0 %v2714_v41 }
 0xb12   : > { %2727 = vmax.xlane.f32.xlu0 %v2726_v43 }
 0xb16   : > { %2730 = vmax.xlane.f32.xlu0 %v2729_v11 }
 0xb1a   : > { %2733 = vmax.xlane.f32.xlu0 %v2732_v45 }
 0xb62   : > { %v2725_v46 = vpop.xlane.xlu0 %2724 }
 0xb63   : > { %v2741_v47 = vsub.f32 %v5775_v33, %v2725_v46 }
 0xb64   : > { %v2722_v48 = vpop.xlane.xlu1 %2721 }
 0xb65   : > { %v2752_v49 = vmul.f32 1.442695, %v2741_v47  ;;  %v2740_v50 = vsub.f32 %v2531_v35, %v2722_v48 }
 0xb66   : > { %v2360_v57 = vpop.permute.xlu0 %2359 }
 0xb67   : > { %6006 = vpow2.f32 %v2752_v49  ;;  %v2750_v51 = vmul.f32 1.442695, %v2740_v50  ;;  %v7142_v58 = vadd.f32 %v2360_v57, %v7095_v13  ;;  %v2735_v13 = vsel %vm992_vm3, %v7134_v15, -inf }
 0xb69   : > { %6008 = vpow2.f32 %v2750_v51 }
 0xb74   : > { %v6007_v52 = vpop.eup %6006 }
 0xb75   : > { %v2771_v53 = vsel %vm992_vm3, %v6007_v52, 0.0 }
 0xb76   : > { %v6009_v55 = vpop.eup %6008  ;;  %2772 = vadd.xlane.f32.xlu1 %v2771_v53 }
 0xb77   : > { %v2768_v56 = vsel %vm992_vm3, %v6009_v55, 0.0 }
 0xb7a   : > { %2769 = vadd.xlane.f32.xlu1 %v2768_v56 }
 0xb8b   : > { %2887 = vrot.lane.b32.xlu1 %v7142_v58, %s6447_s24 }
 0xb97   : > { %v2716_v59 = vpop.xlane.xlu0 %2715 }
 0xb98   : > { %v2738_v60 = vsub.f32 %v2444_v39, %v2716_v59 }
 0xb9a   : > { %v2746_v61 = vmul.f32 1.442695, %v2738_v60 }
 0xb9b   : > { %v2728_v63 = vpop.xlane.xlu0 %2727 }
 0xb9c   : > { %6010 = vpow2.f32 %v2746_v61  ;;  %v2742_v0 = vsub.f32 %v2618_v42, %v2728_v63  ;;  %v2363_v61 = vld [vmem:[%s6908_s20] sm:$0xff]  ;;  %v2365_v63 = vld [vmem:[%s6908_s20 + $0x10] sm:$0xff] }
 0xb9e   : > { %v2754_v1 = vmul.f32 1.442695, %v2742_v0 }
 0xb9f   : > { %v2731_v2 = vpop.xlane.xlu0 %2730 }
 0xba0   : > { %6012 = vpow2.f32 %v2754_v1  ;;  %v2743_v25 = vsub.f32 %v7130_v40, %v2731_v2  ;;  %v2366_v2 = vld [vmem:[%s6908_s20 + $0x18] sm:$0xff] }
 0xba2   : > { %v2756_v28 = vmul.f32 1.442695, %v2743_v25 }
 0xba3   : > { %v2734_v3 = vpop.xlane.xlu0 %2733 }
 0xba4   : > { %v2744_v62 = vsub.f32 %v2705_v44, %v2734_v3 }
 0xba6   : > { %v2758_v4 = vmul.f32 1.442695, %v2744_v62 }
 0xba8   : > { %6014 = vpow2.f32 %v2758_v4 }
 0xba9   : > { %v6011_v5 = vpop.eup %6010 }
 0xbaa   : > { %v2762_v6 = vsel %vm992_vm3, %v6011_v5, 0.0 }
 0xbab   : > { %2763 = vadd.xlane.f32.xlu0 %v2762_v6 }
 0xbad   : > { %v7147_v7 = vpop.eup %6012 }
 0xbae   : > { %v2774_v12 = vsel %vm992_vm3, %v7147_v7, 0.0 }
 0xbaf   : > { %2718 = vmax.xlane.f32.xlu1 %v2717_v9  ;;  %2775 = vadd.xlane.f32.xlu0 %v2774_v12 }
 0xbb3   : > { %2736 = vmax.xlane.f32.xlu1 %v2735_v13 }
 0xbb5   : > { %v7155_v14 = vpop.eup %6014 }
 0xbb6   : > { %v2780_v16 = vsel %vm992_vm3, %v7155_v14, 0.0 }
 0xbb7   : > { %2781 = vadd.xlane.f32.xlu0 %v2780_v16 }
 0xbcd   : > { %2803 = vrot.lane.b32.xlu0 %v7142_v58, %s6446_s3  ;;  %s7619_s3 = sld [smem:[#allocation40_spill]] (!%p5525_p8) }
 0xbff   : > { %v2773_v17 = vpop.xlane.xlu1 %2772 }
 0xc00   : > { %6016 = vrcp.f32 %v2773_v17 }
 0xc03   : > { %v2770_v18 = vpop.xlane.xlu1 %2769 }
 0xc04   : > { %6018 = vrcp.f32 %v2770_v18 }
 0xc07   : > { %v2888_v19 = vpop.permute.xlu1 %2887 }
 0xc08   : > { %5791 = vmatprep.subr.mxu1 %v2888_v19 }
 0xc09   : > { %5792 = vmatpush3.msra.mxu1 %v2888_v19 }
 0xc0a   : > { %5801 = vmatprep.subr.mxu1 %v2363_v61 }
 0xc0d   : > { %v6017_v20 = vpop.eup %6016 }
 0xc0e   : > { %v2797_v23 = vmul.f32 %v6017_v20, %v6007_v52  ;;  %v5503_v20 = vld [vmem:[%s6924_s21 + $0x7] ss:$0 sm:$0xff] }
 0xc11   : > { %v6019_v21 = vpop.eup %6018 }
 0xc12   : > { %v2796_v22 = vmul.f32 %v6019_v21, %v6009_v55 }
 0xc14   : > { %5793 = vmatprep.mubr.msk.f32.mxu1 %vm992_vm3, %v2796_v22 }
 0xc15   : > { %5794 = vmatmul.mubr.msk.f32.vlgmr.msra.gmra.mxu1 %vm992_vm3, %v2797_v23 }
 0xc16   : > { %5802 = vmatpush3.msra.mxu1 %v2363_v61 }
 0xc17   : > { %5811 = vmatprep.subr.mxu1 %v2365_v63 }
 0xc34   : > { %v2764_v24 = vpop.xlane.xlu0 %2763 }
 0xc35   : > { %6020 = vrcp.f32 %v2764_v24 }
 0xc38   : > { %v2719_v26 = vpop.xlane.xlu1 %2718  ;;  %v2776_v30 = vpop.xlane.xlu0 %2775 }
 0xc39   : > { %v2739_v27 = vsub.f32 %v7128_v38, %v2719_v26 }
 0xc3b   : > { %v2748_v29 = vmul.f32 1.442695, %v2739_v27 }
 0xc3c   : > { %v2737_v31 = vpop.xlane.xlu1 %2736 }
 0xc3d   : > { %6022 = vpow2.f32 %v2748_v29  ;;  %v2745_v32 = vsub.f32 %v7134_v15, %v2737_v31  ;;  %v2364_v15 = vld [vmem:[%s6908_s20 + $0x8] sm:$0xff] }
 0xc3e   : > { %6024 = vpow2.f32 %v2756_v28 }
 0xc3f   : > { %v2760_v33 = vmul.f32 1.442695, %v2745_v32 }
 0xc40   : > { %v2782_v34 = vpop.xlane.xlu0 %2781 }
 0xc41   : > { %6026 = vpow2.f32 %v2760_v33 }
 0xc42   : > { %v6021_v35 = vpop.eup %6020 }
 0xc43   : > { %v2794_v36 = vmul.f32 %v6021_v35, %v6011_v5 }
 0xc44   : > { %v2804_v37 = vpop.permute.xlu0 %2803 }
 0xc45   : > { %5786 = vmatprep.subr.mxu0 %v2804_v37  ;;  %5788 = vmatprep.mubr.msk.f32.mxu0 %vm992_vm3, %v2794_v36 }
 0xc46   : > { %5787 = vmatpush3.msra.mxu0 %v2804_v37 }
 0xc47   : > { %5796 = vmatprep.subr.mxu0 %v2364_v15 }
 0xc4a   : > { %v6023_v38 = vpop.eup %6022 }
 0xc4b   : > { %v2765_v39 = vsel %vm992_vm3, %v6023_v38, 0.0  ;;  %v6025_v40 = vpop.eup %6024 }
 0xc4c   : > { %2766 = vadd.xlane.f32.xlu1 %v2765_v39  ;;  %v2777_v41 = vsel %vm992_vm3, %v6025_v40, 0.0  ;;  %v3565_v39 = vld [vmem:[%s6914_s29 + $0x188] sm:$0xff] }
 0xc4e   : > { %v6027_v42 = vpop.eup %6026 }
 0xc4f   : > { %v2783_v43 = vsel %vm992_vm3, %v6027_v42, 0.0 }
 0xc50   : > { %2778 = vadd.xlane.f32.xlu1 %v2777_v41  ;;  %v3564_v41 = vld [vmem:[%s6914_s29 + $0x180] sm:$0xff] }
 0xc54   : > { %2784 = vadd.xlane.f32.xlu1 %v2783_v43  ;;  %v3549_v43 = vld [vmem:[%s6914_s29 + $0x108] sm:$0xff] }
 0xc65   : > { %3133 = vrot.lane.b32.xlu1 %v7142_v58, %s6449_s17 }
 0xc69   : > { %3300 = vrot.lane.b32.xlu1 %v7142_v58, %s6451_s30 }
 0xcd5   : > { %v2767_v11 = vpop.xlane.xlu1 %2766  ;;  %v5795_v46 = vpop.f32.mrf.mxu1 }
 0xcd6   : > { %6028 = vrcp.f32 %v2767_v11  ;;  %v3548_v11 = vld [vmem:[%s6914_s29 + $0x100] sm:$0xff] }
 0xcd7   : > { %6030 = vrcp.f32 %v2776_v30  ;;  %v2962_v51 = vpop.f32.mrf.mxu1 }
 0xcd9   : > { %v2779_v44 = vpop.xlane.xlu1 %2778 }
 0xcda   : > { %6032 = vrcp.f32 %v2779_v44  ;;  %v3550_v44 = vld [vmem:[%s6914_s29 + $0x110] sm:$0xff] }
 0xcdb   : > { %6034 = vrcp.f32 %v2782_v34 }
 0xcdd   : > { %v2785_v45 = vpop.xlane.xlu1 %2784 }
 0xcde   : > { %6036 = vrcp.f32 %v2785_v45  ;;  %v3533_v45 = vld [vmem:[%s6914_s29 + $0x88] sm:$0xff] }
 0xce1   : > { %v3134_v49 = vpop.permute.xlu1 %3133 }
 0xce3   : > { %v6029_v47 = vpop.eup %6028 }
 0xce4   : > { %v2795_v48 = vmul.f32 %v6029_v47, %v6023_v38  ;;  %v6031_v50 = vpop.eup %6030  ;;  %v3532_v47 = vld [vmem:[%s6914_s29 + $0x80] sm:$0xff] }
 0xce5   : > { %v2798_v53 = vmul.f32 %v6031_v50, %v7147_v7  ;;  %v3301_v56 = vpop.permute.xlu1 %3300  ;;  %v3519_v50 = vld [vmem:[%s6914_s29 + $0x18] sm:$0xff] }
 0xce6   : > { %5789 = vmatmul.mubr.msk.f32.vlgmr.msra.gmra.mxu0 %vm992_vm3, %v2795_v48  ;;  %v3534_v48 = vld [vmem:[%s6914_s29 + $0x90] sm:$0xff] }
 0xce7   : > { %5797 = vmatpush3.msra.mxu0 %v2364_v15  ;;  %5798 = vmatprep.mubr.msk.f32.mxu0 %vm992_vm3, %v2962_v51  ;;  %v6033_v52 = vpop.eup %6032  ;;  %v3551_v15 = vld [vmem:[%s6914_s29 + $0x118] sm:$0xff]  ;;  %v3516_v51 = vld [vmem:[%s6914_s29] sm:$0xff] }
 0xce8   : > { %5806 = vmatprep.subr.mxu0 %v3134_v49  ;;  %v6035_v55 = vpop.eup %6034  ;;  %v2799_v57 = vmul.f32 %v6033_v52, %v6025_v40  ;;  %v3567_v40 = vld [vmem:[%s6914_s29 + $0x198] sm:$0xff]  ;;  %v3518_v52 = vld [vmem:[%s6914_s29 + $0x10] sm:$0xff] }
 0xce9   : > { %v2800_v59 = vmul.f32 %v6035_v55, %v7155_v14  ;;  %v3571_v55 = vld [vmem:[%s6914_s29 + $0x1b8] sm:$0xff] }
 0xcea   : > { %5799 = vmatmul.mubr.msk.f32.vlgmr.msra.gmra.mxu0 %vm992_vm3, %v5795_v46  ;;  %v3535_v46 = vld [vmem:[%s6914_s29 + $0x98] sm:$0xff] }
 0xceb   : > { %5807 = vmatpush3.msra.mxu0 %v3134_v49  ;;  %5808 = vmatprep.mubr.msk.f32.mxu0 %vm992_vm3, %v2798_v53  ;;  %v6037_v58 = vpop.eup %6036  ;;  %v3517_v49 = vld [vmem:[%s6914_s29 + $0x8] sm:$0xff] }
 0xcec   : > { %5816 = vmatprep.subr.mxu0 %v3301_v56  ;;  %v2801_v60 = vmul.f32 %v6037_v58, %v6027_v42  ;;  %v3566_v42 = vld [vmem:[%s6914_s29 + $0x190] sm:$0xff]  ;;  %v3569_v53 = vld [vmem:[%s6914_s29 + $0x1a8] sm:$0xff] }
 0xcee   : > { %5809 = vmatmul.mubr.msk.f32.vlgmr.msra.gmra.mxu0 %vm992_vm3, %v2799_v57 }
 0xcef   : > { %5817 = vmatpush3.msra.mxu0 %v3301_v56  ;;  %5818 = vmatprep.mubr.msk.f32.mxu0 %vm992_vm3, %v2800_v59 }
 0xcf0   : > { %3694 = vmatprep.subr.mxu0 %v3565_v39  ;;  %v3526_v39 = vld [vmem:[%s6914_s29 + $0x50] sm:$0xff] }
 0xcf2   : > { %5819 = vmatmul.mubr.msk.f32.vlgmr.msra.gmra.mxu0 %vm992_vm3, %v2801_v60 }
 0xcf3   : > { %3734 = vmatprep.mubr.f32.mxu0 %v6457_v54  ;;  %3695 = vmatpush1.msra.mxu0 %v3564_v41  ;;  %v3579_v41 = vld [vmem:[%s6914_s29 + $0x1f8] sm:$0xff] }
 0xcf4   : > { %3696 = vmatprep.subr.mxu0 %v3549_v43  ;;  %v3578_v43 = vld [vmem:[%s6914_s29 + $0x1f0] sm:$0xff] }
 0xcf5   : > { %3697 = vmatpush1.msra.mxu0 %v3548_v11  ;;  %v3563_v11 = vld [vmem:[%s6914_s29 + $0x178] sm:$0xff] }
 0xcf6   : > { %3698 = vmatprep.subr.mxu0 %v3533_v45  ;;  %v3562_v45 = vld [vmem:[%s6914_s29 + $0x170] sm:$0xff] }
 0xcf7   : > { %3699 = vmatpush1.msra.mxu0 %v3532_v47  ;;  %v3547_v47 = vld [vmem:[%s6914_s29 + $0xf8] sm:$0xff] }
 0xcf8   : > { %3700 = vmatprep.subr.mxu0 %v3517_v49  ;;  %v3546_v49 = vld [vmem:[%s6914_s29 + $0xf0] sm:$0xff] }
 0xcf9   : > { %3701 = vmatpush1.msra.mxu0 %v3516_v51  ;;  %v3531_v51 = vld [vmem:[%s6914_s29 + $0x78] sm:$0xff] }
 0xcfa   : > { %3848 = vmatprep.subr.mxu0 %v3569_v53  ;;  %v3530_v53 = vld [vmem:[%s6914_s29 + $0x70] sm:$0xff] }
 0xda6   : > { %v5790_v0 = vpop.f32.mrf.mxu0 }
 0xda8   : > { %v2878_v1 = vpop.f32.mrf.mxu0 }
 0xda9   : > { %5803 = vmatprep.mubr.msk.f32.mxu1 %vm992_vm3, %v2878_v1 }
 0xdaa   : > { %v5800_v3 = vpop.f32.mrf.mxu0  ;;  %5804 = vmatmul.mubr.msk.f32.vlgmr.msra.gmra.mxu1 %vm992_vm3, %v5790_v0 }
 0xdab   : > { %5812 = vmatpush3.msra.mxu1 %v2365_v63  ;;  %v5504_v63 = vld [vmem:[%s6924_s21 + $0xb] ss:$0 sm:$0xff] }
 0xdac   : > { %v3043_v62 = vpop.f32.mrf.mxu0  ;;  %5821 = vmatprep.subr.mxu1 %v2366_v2 }
 0xdae   : > { %v5810_v4 = vpop.f32.mrf.mxu0 }
 0xdb0   : > { %v3208_v5 = vpop.f32.mrf.mxu0 }
 0xdb1   : > { %5813 = vmatprep.mubr.msk.f32.mxu1 %vm992_vm3, %v3208_v5 }
 0xdb2   : > { %5814 = vmatmul.mubr.msk.f32.vlgmr.msra.gmra.mxu1 %vm992_vm3, %v5810_v4  ;;  %v5820_v6 = vpop.f32.mrf.mxu0 }
 0xdb3   : > { %5822 = vmatpush3.msra.mxu1 %v2366_v2  ;;  %v5505_v2 = vld [vmem:[%s6924_s21 + $0xc] ss:$0 sm:$0xff] }
 0xdb4   : > { %v3375_v7 = vpop.f32.mrf.mxu0  ;;  %3771 = vmatprep.subr.mxu1 %v3567_v40  ;;  %v3577_v40 = vld [vmem:[%s6914_s29 + $0x1e8] sm:$0xff] }
 0xdb5   : > { %5823 = vmatprep.mubr.msk.f32.mxu1 %vm992_vm3, %v3375_v7  ;;  %v3570_v7 = vld [vmem:[%s6914_s29 + $0x1b0] sm:$0xff] }
 0xdb6   : > { %5824 = vmatmul.mubr.msk.f32.vlgmr.msra.gmra.mxu1 %vm992_vm3, %v5820_v6  ;;  %v3568_v6 = vld [vmem:[%s6914_s29 + $0x1a0] sm:$0xff] }
 0xdb7   : > { %3811 = vmatprep.mubr.f32.mxu1 %v6457_v54  ;;  %3772 = vmatpush1.msra.mxu1 %v3566_v42  ;;  %v3576_v42 = vld [vmem:[%s6914_s29 + $0x1e0] sm:$0xff] }
 0xdb8   : > { %3773 = vmatprep.subr.mxu1 %v3551_v15  ;;  %v3561_v15 = vld [vmem:[%s6914_s29 + $0x168] sm:$0xff] }
 0xdb9   : > { %3774 = vmatpush1.msra.mxu1 %v3550_v44  ;;  %v3560_v44 = vld [vmem:[%s6914_s29 + $0x160] sm:$0xff] }
 0xdba   : > { %3775 = vmatprep.subr.mxu1 %v3535_v46  ;;  %v3545_v46 = vld [vmem:[%s6914_s29 + $0xe8] sm:$0xff] }
 0xdbb   : > { %3776 = vmatpush1.msra.mxu1 %v3534_v48  ;;  %v3544_v48 = vld [vmem:[%s6914_s29 + $0xe0] sm:$0xff] }
 0xdbc   : > { %3777 = vmatprep.subr.mxu1 %v3519_v50  ;;  %v3529_v50 = vld [vmem:[%s6914_s29 + $0x68] sm:$0xff] }
 0xdbd   : > { %3778 = vmatpush1.msra.mxu1 %v3518_v52  ;;  %v3528_v52 = vld [vmem:[%s6914_s29 + $0x60] sm:$0xff] }
 0xdbe   : > { %3925 = vmatprep.subr.mxu1 %v3571_v55  ;;  %v4367_v55 = vld [vmem:[%s6916_s16 + $0x188] sm:$0xff] }
 0xe6a   : > { %v5805_v9 = vpop.f32.mrf.mxu1 }
 0xe6b   : > { %v3130_v14 = vadd.f32 %v5805_v9, %v5800_v3  ;;  %v3553_v9 = vld [vmem:[%s6914_s29 + $0x128] sm:$0xff] }
 0xe6c   : > { %v3124_v12 = vpop.f32.mrf.mxu1 }
 0xe6d   : > { %v3125_v17 = vadd.f32 %v3124_v12, %v3043_v62  ;;  %v3555_v12 = vld [vmem:[%s6914_s29 + $0x138] sm:$0xff] }
 0xe72   : > { %v5815_v13 = vpop.f32.mrf.mxu1 }
 0xe73   : > { %v3299_v18 = vadd.f32 %v5815_v13, %v3130_v14  ;;  %v3552_v14 = vld [vmem:[%s6914_s29 + $0x120] sm:$0xff] }
 0xe74   : > { %v3289_v16 = vpop.f32.mrf.mxu1 }
 0xe75   : > { %v3298_v21 = vadd.f32 %v3289_v16, %v3125_v17  ;;  %v3554_v16 = vld [vmem:[%s6914_s29 + $0x130] sm:$0xff] }
 0xe76   : > { %v5825_v19 = vpop.f32.mrf.mxu1 }
 0xe77   : > { %v3466_v22 = vadd.f32 %v5825_v19, %v3299_v18  ;;  %v3537_v18 = vld [vmem:[%s6914_s29 + $0xa8] sm:$0xff]  ;;  %v3539_v19 = vld [vmem:[%s6914_s29 + $0xb8] sm:$0xff] }
 0xe78   : > { %v3456_v23 = vpop.f32.mrf.mxu1 }
 0xe79   : > { %v3473_v24 = vadd.f32 %v5503_v20, %v3466_v22  ;;  %v3465_v25 = vadd.f32 %v3456_v23, %v3298_v21  ;;  %v3538_v21 = vld [vmem:[%s6914_s29 + $0xb0] sm:$0xff]  ;;  %v3521_v22 = vld [vmem:[%s6914_s29 + $0x28] sm:$0xff]  ;;  %v3523_v23 = vld [vmem:[%s6914_s29 + $0x38] sm:$0xff] }
 0xe7b   : > { %v3472_v26 = vadd.f32 %v5503_v20, %v3465_v25  ;;  %v3475_v27 = vadd.f32 %v3473_v24, %v7090_v10  ;;  %v3536_v20 = vld [vmem:[%s6914_s29 + $0xa0] sm:$0xff]  ;;  %v3522_v25 = vld [vmem:[%s6914_s29 + $0x30] sm:$0xff] }
 0xe7c   : > { %v3520_v24 = vld [vmem:[%s6914_s29 + $0x20] sm:$0xff] }
 0xe7d   : > { %v3481_v28 = vsel %vm869_vm2, %v3475_v27, 0.0  ;;  %v3474_v29 = vadd.f32 %v3472_v26, %v7086_v8  ;;  %v3573_v26 = vld [vmem:[%s6914_s29 + $0x1c8] sm:$0xff] }
 0xe7e   : > { %3482 = vadd.xlane.f32.xlu1 %v3481_v28  ;;  %v3572_v28 = vld [vmem:[%s6914_s29 + $0x1c0] sm:$0xff] }
 0xe7f   : > { %v3478_v30 = vsel %vm869_vm2, %v3474_v29, 0.0 }
 0xe80   : > { %3479 = vadd.xlane.f32.xlu0 %v3478_v30  ;;  %v3557_v30 = vld [vmem:[%s6914_s29 + $0x148] sm:$0xff] }
 0xf07   : > { %v3483_v31 = vpop.xlane.xlu1 %3482 }
 0xf08   : > { %v3485_v32 = vmul.f32 0.03125, %v3483_v31  ;;  %v3559_v31 = vld [vmem:[%s6914_s29 + $0x158] sm:$0xff] }
 0xf09   : > { %v3480_v33 = vpop.xlane.xlu0 %3479 }
 0xf0a   : > { %v3484_v34 = vmul.f32 0.03125, %v3480_v33  ;;  %v7200_v35 = vsub.f32 %v3475_v27, %v3485_v32  ;;  %v3575_v27 = vld [vmem:[%s6914_s29 + $0x1d8] sm:$0xff]  ;;  %v3556_v32 = vld [vmem:[%s6914_s29 + $0x140] sm:$0xff]  ;;  %v3558_v33 = vld [vmem:[%s6914_s29 + $0x150] sm:$0xff] }
 0xf0c   : > { %v3486_v10 = vsub.f32 %v3474_v29, %v3484_v34  ;;  %v3489_v37 = vmul.f32 %v7200_v35, %v7200_v35  ;;  %v3574_v29 = vld [vmem:[%s6914_s29 + $0x1d0] sm:$0xff]  ;;  %v3541_v34 = vld [vmem:[%s6914_s29 + $0xc8] sm:$0xff] }
 0xf0e   : > { %v3488_v36 = vmul.f32 %v3486_v10, %v3486_v10  ;;  %v3493_v38 = vsel %vm869_vm2, %v3489_v37, 0.0  ;;  %v3527_v37 = vld [vmem:[%s6914_s29 + $0x58] sm:$0xff] }
 0xf10   : > { %v3490_v8 = vsel %vm869_vm2, %v3488_v36, 0.0  ;;  %v3542_v36 = vld [vmem:[%s6914_s29 + $0xd0] sm:$0xff] }
 0xf11   : > { %3491 = vadd.xlane.f32.xlu0 %v3490_v8  ;;  %v3525_v8 = vld [vmem:[%s6914_s29 + $0x48] sm:$0xff] }
 0xf15   : > { %3494 = vadd.xlane.f32.xlu0 %v3493_v38  ;;  %v3524_v38 = vld [vmem:[%s6914_s29 + $0x40] sm:$0xff] }
 0xf9a   : > { %v3492_v56 = vpop.xlane.xlu0 %3491 }
 0xf9b   : > { %v3496_v57 = vmul.f32 0.03125, %v3492_v56  ;;  %v4369_v56 = vld [vmem:[%s6916_s16 + $0x198] sm:$0xff] }
 0xf9d   : > { %v3498_v58 = vadd.f32 1e-05, %v3496_v57  ;;  %v4366_v57 = vld [vmem:[%s6916_s16 + $0x180] sm:$0xff] }
 0xf9e   : > { %v3495_v59 = vpop.xlane.xlu0 %3494 }
 0xf9f   : > { %6038 = vrsqrt.f32 %v3498_v58  ;;  %v3497_v60 = vmul.f32 0.03125, %v3495_v59  ;;  %v4368_v58 = vld [vmem:[%s6916_s16 + $0x190] sm:$0xff]  ;;  %v4351_v59 = vld [vmem:[%s6916_s16 + $0x108] sm:$0xff] }
 0xfa1   : > { %v3499_v61 = vadd.f32 1e-05, %v3497_v60  ;;  %v4353_v60 = vld [vmem:[%s6916_s16 + $0x118] sm:$0xff] }
 0xfa3   : > { %6040 = vrsqrt.f32 %v3499_v61  ;;  %v4350_v61 = vld [vmem:[%s6916_s16 + $0x100] sm:$0xff] }
 0xfac   : > { %v6039_v0 = vpop.eup %6038 }
 0xfad   : > { %v3506_v1 = vmul.f32 %v6039_v0, %v5504_v63  ;;  %v4337_v0 = vld [vmem:[%s6916_s16 + $0x98] sm:$0xff] }
 0xfaf   : > { %v3508_v3 = vmul.f32 %v3506_v1, %v3486_v10  ;;  %v3540_v10 = vld [vmem:[%s6914_s29 + $0xc0] sm:$0xff] }
 0xfb0   : > { %v6041_v62 = vpop.eup %6040  ;;  %v4334_v1 = vld [vmem:[%s6916_s16 + $0x80] sm:$0xff] }
 0xfb1   : > { %v7226_v4 = vadd.f32 %v5505_v2, %v3508_v3  ;;  %v3507_v5 = vmul.f32 %v6041_v62, %v5504_v63  ;;  %v4352_v63 = vld [vmem:[%s6916_s16 + $0x110] sm:$0xff]  ;;  %v4319_v3 = vld [vmem:[%s6916_s16 + $0x8] sm:$0xff]  ;;  %v4321_v62 = vld [vmem:[%s6916_s16 + $0x18] sm:$0xff] }
 0xfb3   : > { %v3509_v13 = vmul.f32 %v3507_v5, %v7200_v35  ;;  %5506 = vmatmul.mubr.msk.f32.vlgmr.msra.gmra.mxu0 %vm869_vm2, %v7226_v4  ;;  %5508 = vmatmul.mubr.msk.f32.vlgmr.msra.gmra.mxu1 %vm869_vm2, %v7226_v4  ;;  %v3543_v35 = vld [vmem:[%s6914_s29 + $0xd8] sm:$0xff]  ;;  %v4318_v5 = vld [vmem:[%s6916_s16] sm:$0xff]  ;;  %s7617_s29 = sld [smem:[#allocation39_spill]] (!%p5525_p8) }
 0xfb4   : > { %3849 = vmatpush1.msra.mxu0 %v3568_v6  ;;  %3926 = vmatpush1.msra.mxu1 %v3570_v7  ;;  %v4320_v6 = vld [vmem:[%s6916_s16 + $0x10] sm:$0xff]  ;;  %v4371_v7 = vld [vmem:[%s6916_s16 + $0x1a8] sm:$0xff] }
 0xfb5   : > { %v7239_v17 = vadd.f32 %v5505_v2, %v3509_v13  ;;  %3850 = vmatprep.subr.mxu0 %v3553_v9  ;;  %3927 = vmatprep.subr.mxu1 %v3555_v12  ;;  %v4336_v2 = vld [vmem:[%s6916_s16 + $0x90] sm:$0xff]  ;;  %v4373_v9 = vld [vmem:[%s6916_s16 + $0x1b8] sm:$0xff]  ;;  %v3584_v12 = vlaneseq }
 0xfb6   : > { %3740 = vmatprep.mubr.f32.mxu0 %v6457_v54  ;;  %3817 = vmatprep.mubr.f32.mxu1 %v6457_v54 }
 0xfb7   : > { %3851 = vmatpush1.msra.mxu0 %v3552_v14  ;;  %3928 = vmatpush1.msra.mxu1 %v3554_v16  ;;  %v7341_v13 = vshrl.u32 %v3584_v12, 7 }
 0xfb8   : > { %5507 = vmatmul.mubr.msk.f32.gmra.mxu0 %vm869_vm2, %v7239_v17  ;;  %5509 = vmatmul.mubr.msk.f32.gmra.mxu1 %vm869_vm2, %v7239_v17 }
 0xfb9   : > { %3852 = vmatprep.subr.mxu0 %v3537_v18  ;;  %3929 = vmatprep.subr.mxu1 %v3539_v19  ;;  %v3586_v14 = vsub.s32 0, %v7341_v13  ;;  %v3594_v16 = vsub.s32 2, %v7341_v13  ;;  %v7346_v18 = vld [vmem:[%s6922_s6] sm:$0xff]  ;;  %v3590_v19 = vsub.s32 1, %v7341_v13 }
 0xfba   : > { %3853 = vmatpush1.msra.mxu0 %v3536_v20  ;;  %3930 = vmatpush1.msra.mxu1 %v3538_v21  ;;  %v3598_v20 = vsub.s32 3, %v7341_v13 }
 0xfbb   : > { %3854 = vmatprep.subr.mxu0 %v3521_v22  ;;  %3931 = vmatprep.subr.mxu1 %v3523_v23  ;;  %v3587_v21 = vrot.slane %v7346_v18, %v3586_v14  ;;  %v3595_v22 = vrot.slane %v7346_v18, %v3594_v16  ;;  %v3591_v23 = vrot.slane %v7346_v18, %v3590_v19 }
 0xfbc   : > { %3855 = vmatpush1.msra.mxu0 %v3520_v24  ;;  %3888 = vmatprep.mubr.f32.mxu0 %v6457_v54  ;;  %v3599_v24 = vrot.slane %v7346_v18, %v3598_v20 }
 0xfbd   : > { %3932 = vmatpush1.msra.mxu1 %v3522_v25  ;;  %3965 = vmatprep.mubr.f32.mxu1 %v6457_v54 }
 0xfbe   : > { %5510 = vmatmul.mubr.msk.f32.vlgmr.msra.gmra.mxu0 %vm869_vm2, %v7226_v4  ;;  %5512 = vmatmul.mubr.msk.f32.vlgmr.msra.gmra.mxu1 %vm869_vm2, %v7226_v4 }
 0xfbf   : > { %4002 = vmatprep.subr.mxu0 %v3573_v26  ;;  %4079 = vmatprep.subr.mxu1 %v3575_v27 }
 0xfc0   : > { %4003 = vmatpush1.msra.mxu0 %v3572_v28  ;;  %4080 = vmatpush1.msra.mxu1 %v3574_v29 }
 0xfc1   : > { %4004 = vmatprep.subr.mxu0 %v3557_v30  ;;  %4081 = vmatprep.subr.mxu1 %v3559_v31 }
 0xfc2   : > { %3894 = vmatprep.mubr.f32.mxu0 %v6457_v54  ;;  %3971 = vmatprep.mubr.f32.mxu1 %v6457_v54 }
 0xfc3   : > { %4005 = vmatpush1.msra.mxu0 %v3556_v32  ;;  %4082 = vmatpush1.msra.mxu1 %v3558_v33 }
 0xfc4   : > { %5511 = vmatmul.mubr.msk.f32.gmra.mxu0 %vm869_vm2, %v7239_v17  ;;  %5513 = vmatmul.mubr.msk.f32.gmra.mxu1 %vm869_vm2, %v7239_v17 }
 0xfc5   : > { %4006 = vmatprep.subr.mxu0 %v3541_v34  ;;  %4083 = vmatprep.subr.mxu1 %v3543_v35 }
 0xfc6   : > { %4007 = vmatpush1.msra.mxu0 %v3540_v10  ;;  %4084 = vmatpush1.msra.mxu1 %v3542_v36 }
 0xfc7   : > { %4008 = vmatprep.subr.mxu0 %v3525_v8  ;;  %4085 = vmatprep.subr.mxu1 %v3527_v37  ;;  %v4370_v37 = vld [vmem:[%s6916_s16 + $0x1a0] sm:$0xff] }
 0xfc8   : > { %4009 = vmatpush1.msra.mxu0 %v3524_v38  ;;  %4042 = vmatprep.mubr.f32.mxu0 %v6457_v54  ;;  %v4372_v38 = vld [vmem:[%s6916_s16 + $0x1b0] sm:$0xff] }
 0xfc9   : > { %4086 = vmatpush1.msra.mxu1 %v3526_v39  ;;  %4119 = vmatprep.mubr.f32.mxu1 %v6457_v54  ;;  %v3606_v39 = vsub.s32 5, %v7341_v13 }
 0xfca   : > { %5514 = vmatmul.mubr.msk.f32.vlgmr.msra.gmra.mxu0 %vm869_vm2, %v7226_v4  ;;  %5516 = vmatmul.mubr.msk.f32.vlgmr.msra.gmra.mxu1 %vm869_vm2, %v7226_v4 }
 0xfcb   : > { %4156 = vmatprep.subr.mxu0 %v3577_v40  ;;  %4233 = vmatprep.subr.mxu1 %v3579_v41  ;;  %v3614_v40 = vsub.s32 7, %v7341_v13 }
 0xfcc   : > { %4157 = vmatpush1.msra.mxu0 %v3576_v42  ;;  %4234 = vmatpush1.msra.mxu1 %v3578_v43 }
 0xfcd   : > { %4158 = vmatprep.subr.mxu0 %v3561_v15  ;;  %4235 = vmatprep.subr.mxu1 %v3563_v11  ;;  %v4355_v11 = vld [vmem:[%s6916_s16 + $0x128] sm:$0xff] }
 0xfce   : > { %4048 = vmatprep.mubr.f32.mxu0 %v6457_v54  ;;  %4125 = vmatprep.mubr.f32.mxu1 %v6457_v54 }
 0xfcf   : > { %4159 = vmatpush1.msra.mxu0 %v3560_v44  ;;  %4236 = vmatpush1.msra.mxu1 %v3562_v45  ;;  %v4357_v44 = vld [vmem:[%s6916_s16 + $0x138] sm:$0xff] }
 0xfd0   : > { %5515 = vmatmul.mubr.msk.f32.gmra.mxu0 %vm869_vm2, %v7239_v17  ;;  %5517 = vmatmul.mubr.msk.f32.gmra.mxu1 %vm869_vm2, %v7239_v17 }
 0xfd1   : > { %4160 = vmatprep.subr.mxu0 %v3545_v46  ;;  %4237 = vmatprep.subr.mxu1 %v3547_v47 }
 0xfd2   : > { %4161 = vmatpush1.msra.mxu0 %v3544_v48  ;;  %4238 = vmatpush1.msra.mxu1 %v3546_v49  ;;  %v3607_v49 = vrot.slane %v7346_v18, %v3606_v39 }
 0xfd3   : > { %4162 = vmatprep.subr.mxu0 %v3529_v50  ;;  %4239 = vmatprep.subr.mxu1 %v3531_v51  ;;  %v3615_v50 = vrot.slane %v7346_v18, %v3614_v40 }
 0xfd4   : > { %4163 = vmatpush1.msra.mxu0 %v3528_v52  ;;  %4196 = vmatprep.mubr.f32.mxu0 %v6457_v54 }
 0xfd5   : > { %4240 = vmatpush1.msra.mxu1 %v3530_v53  ;;  %4273 = vmatprep.mubr.f32.mxu1 %v6457_v54 }
 0xfd6   : > { %5518 = vmatmul.mubr.msk.f32.vlgmr.msra.gmra.mxu0 %vm869_vm2, %v7226_v4  ;;  %5520 = vmatmul.mubr.msk.f32.vlgmr.msra.gmra.mxu1 %vm869_vm2, %v7226_v4 }
 0xfd7   : > { %4202 = vmatprep.mubr.f32.mxu0 %v6457_v54  ;;  %4279 = vmatprep.mubr.f32.mxu1 %v6457_v54  ;;  %v4335_v54 = vld [vmem:[%s6916_s16 + $0x88] sm:$0xff] }
 0xfd8   : > { %4411 = vmatprep.subr.mxu0 %v4367_v55  ;;  %4486 = vmatprep.subr.mxu1 %v4369_v56  ;;  %v4354_v56 = vld [vmem:[%s6916_s16 + $0x120] sm:$0xff] }
 0xfd9   : > { %4412 = vmatpush1.xpose.msra.mxu0 %v4366_v57  ;;  %4487 = vmatpush1.xpose.msra.mxu1 %v4368_v58  ;;  %v4356_v57 = vld [vmem:[%s6916_s16 + $0x130] sm:$0xff]  ;;  %v3602_v58 = vsub.s32 4, %v7341_v13 }
 0xfda   : > { %5519 = vmatmul.mubr.msk.f32.gmra.mxu0 %vm869_vm2, %v7239_v17  ;;  %5521 = vmatmul.mubr.msk.f32.gmra.mxu1 %vm869_vm2, %v7239_v17 }
 0xfdb   : > { %4413 = vmatprep.subr.mxu0 %v4351_v59  ;;  %4488 = vmatprep.subr.mxu1 %v4353_v60  ;;  %v3610_v59 = vsub.s32 6, %v7341_v13  ;;  %v4339_v60 = vld [vmem:[%s6916_s16 + $0xa8] sm:$0xff]  ;;  %v4330_v13 = vld [vmem:[%s6916_s16 + $0x60] sm:$0xff] }
 0xfdd   : > { %4414 = vmatpush1.xpose.msra.mxu0 %v4350_v61  ;;  %4489 = vmatpush1.xpose.msra.mxu1 %v4352_v63  ;;  %v4341_v61 = vld [vmem:[%s6916_s16 + $0xb8] sm:$0xff] }
 0xfde   : > { %4415 = vmatprep.subr.mxu0 %v4335_v54  ;;  %4490 = vmatprep.subr.mxu1 %v4337_v0 }
 0xfe1   : > { %4416 = vmatpush1.xpose.msra.mxu0 %v4334_v1  ;;  %4491 = vmatpush1.xpose.msra.mxu1 %v4336_v2  ;;  %v3603_v2 = vrot.slane %v7346_v18, %v3602_v58 }
 0xfe2   : > { %4417 = vmatprep.subr.mxu0 %v4319_v3  ;;  %4492 = vmatprep.subr.mxu1 %v4321_v62  ;;  %v3611_v3 = vrot.slane %v7346_v18, %v3610_v59 }
 0xfe5   : > { %4418 = vmatpush1.xpose.msra.mxu0 %v4318_v5  ;;  %4493 = vmatpush1.xpose.msra.mxu1 %v4320_v6  ;;  %v4338_v6 = vld [vmem:[%s6916_s16 + $0xa0] sm:$0xff] }
 0xfe6   : > { %4561 = vmatprep.subr.mxu0 %v4371_v7  ;;  %4636 = vmatprep.subr.mxu1 %v4373_v9  ;;  %v4340_v7 = vld [vmem:[%s6916_s16 + $0xb0] sm:$0xff] }
0x1073   : > { %v3736_v25 = vpop.f32.mrf.mxu0  ;;  %v3813_v26 = vpop.f32.mrf.mxu1 }
0x1074   : > { %v3737_v27 = vadd.f32 %v3736_v25, %v3587_v21  ;;  %v3814_v28 = vadd.f32 %v3813_v26, %v3595_v22  ;;  %v4322_v26 = vld [vmem:[%s6916_s16 + $0x20] sm:$0xff] }
0x1075   : > { %v3738_v29 = vpop.f32.mrf.mxu0  ;;  %v3815_v30 = vpop.f32.mrf.mxu1 }
0x1076   : > { %v3739_v31 = vadd.f32 %v3738_v29, %v3591_v23  ;;  %v3816_v32 = vadd.f32 %v3815_v30, %v3599_v24  ;;  %v4286_v36 = vmax.f32 %v3737_v27, 0.0  ;;  %v4288_v8 = vmax.f32 %v3814_v28, 0.0  ;;  %v4324_v27 = vld [vmem:[%s6916_s16 + $0x30] sm:$0xff]  ;;  %v7393_v30 = vld [vmem:[%s6922_s6 + $0x8] sm:$0xff]  ;;  %s7618_s6 = smov (!%p5525_p8), %s7617_s29 }
0x1078   : > { %v4287_v33 = vmax.f32 %v3739_v31, 0.0  ;;  %v4289_v34 = vmax.f32 %v3816_v32, 0.0  ;;  %v3742_v35 = vpop.f32.mrf.mxu0  ;;  %v3819_v10 = vpop.f32.mrf.mxu1  ;;  %v4375_v31 = vld [vmem:[%s6916_s16 + $0x1c8] sm:$0xff]  ;;  %v4377_v32 = vld [vmem:[%s6916_s16 + $0x1d8] sm:$0xff] }
0x1079   : > { %v3743_v41 = vadd.f32 %v3742_v35, %v3587_v21  ;;  %v3820_v42 = vadd.f32 %v3819_v10, %v3595_v22  ;;  %v4323_v21 = vld [vmem:[%s6916_s16 + $0x28] sm:$0xff]  ;;  %v4325_v22 = vld [vmem:[%s6916_s16 + $0x38] sm:$0xff] }
0x107a   : > { %v3744_v43 = vpop.f32.mrf.mxu0  ;;  %v3821_v15 = vpop.f32.mrf.mxu1  ;;  %4451 = vmatprep.mubr.f32.mxu0 %v4287_v33  ;;  %4526 = vmatprep.mubr.f32.mxu1 %v4289_v34  ;;  %v7400_v33 = vrot.slane %v7393_v30, %v3590_v19  ;;  %v7405_v34 = vrot.slane %v7393_v30, %v3598_v20  ;;  %v4376_v20 = vld [vmem:[%s6916_s16 + $0x1d0] sm:$0xff] }
0x107b   : > { %v3745_v45 = vadd.f32 %v3744_v43, %v3591_v23  ;;  %v3822_v46 = vadd.f32 %v3821_v15, %v3599_v24  ;;  %4452 = vmatmul.mubr.f32.vlgmr.msra.gmra.mxu0 %v4286_v36  ;;  %4527 = vmatmul.mubr.f32.vlgmr.msra.gmra.mxu1 %v4288_v8  ;;  %v4302_v51 = vmax.f32 %v3743_v41, 0.0  ;;  %v4304_v52 = vmax.f32 %v3820_v42, 0.0  ;;  %v4374_v15 = vld [vmem:[%s6916_s16 + $0x1c0] sm:$0xff] }
0x107c   : > { %4562 = vmatpush1.xpose.msra.mxu0 %v4370_v37  ;;  %4637 = vmatpush1.xpose.msra.mxu1 %v4372_v38 }
0x107d   : > { %v4303_v47 = vmax.f32 %v3745_v45, 0.0  ;;  %v4305_v48 = vmax.f32 %v3822_v46, 0.0  ;;  %4563 = vmatprep.subr.mxu0 %v4355_v11  ;;  %4638 = vmatprep.subr.mxu1 %v4357_v44  ;;  %v4359_v45 = vld [vmem:[%s6916_s16 + $0x148] sm:$0xff]  ;;  %v4361_v46 = vld [vmem:[%s6916_s16 + $0x158] sm:$0xff] }
0x107e   : > { %v3890_v53 = vpop.f32.mrf.mxu0  ;;  %v3967_v55 = vpop.f32.mrf.mxu1 }
0x107f   : > { %4456 = vmatprep.mubr.f32.mxu0 %v4303_v47  ;;  %4531 = vmatprep.mubr.f32.mxu1 %v4305_v48  ;;  %v3891_v18 = vadd.f32 %v3890_v53, %v3603_v2  ;;  %v3968_v25 = vadd.f32 %v3967_v55, %v3611_v3  ;;  %v4358_v53 = vld [vmem:[%s6916_s16 + $0x140] sm:$0xff]  ;;  %v4360_v55 = vld [vmem:[%s6916_s16 + $0x150] sm:$0xff] }
0x1080   : > { %v3892_v63 = vpop.f32.mrf.mxu0  ;;  %v3969_v54 = vpop.f32.mrf.mxu1  ;;  %4457 = vmatmul.mubr.f32.gmra.mxu0 %v4302_v51  ;;  %4532 = vmatmul.mubr.f32.gmra.mxu1 %v4304_v52 }
0x1081   : > { %v3893_v0 = vadd.f32 %v3892_v63, %v3607_v49  ;;  %v3970_v1 = vadd.f32 %v3969_v54, %v3615_v50  ;;  %4564 = vmatpush1.xpose.msra.mxu0 %v4354_v56  ;;  %4639 = vmatpush1.xpose.msra.mxu1 %v4356_v57  ;;  %v4290_v36 = vmax.f32 %v3891_v18, 0.0  ;;  %v4292_v8 = vmax.f32 %v3968_v25, 0.0  ;;  %v4343_v56 = vld [vmem:[%s6916_s16 + $0xc8] sm:$0xff]  ;;  %v4345_v57 = vld [vmem:[%s6916_s16 + $0xd8] sm:$0xff] }
0x1082   : > { %4565 = vmatprep.subr.mxu0 %v4339_v60  ;;  %4640 = vmatprep.subr.mxu1 %v4341_v61  ;;  %v3619_v63 = vrot.slane %v7393_v30, %v3586_v14  ;;  %v3627_v54 = vrot.slane %v7393_v30, %v3594_v16  ;;  %v4326_v16 = vld [vmem:[%s6916_s16 + $0x40] sm:$0xff] }
0x1083   : > { %v4291_v62 = vmax.f32 %v3893_v0, 0.0  ;;  %v4293_v5 = vmax.f32 %v3970_v1, 0.0  ;;  %v4342_v0 = vld [vmem:[%s6916_s16 + $0xc0] sm:$0xff]  ;;  %v4344_v1 = vld [vmem:[%s6916_s16 + $0xd0] sm:$0xff] }
0x1084   : > { %v3896_v9 = vpop.f32.mrf.mxu0  ;;  %v3973_v12 = vpop.f32.mrf.mxu1 }
0x1085   : > { %4601 = vmatprep.mubr.f32.mxu0 %v4291_v62  ;;  %4676 = vmatprep.mubr.f32.mxu1 %v4293_v5  ;;  %v3897_v37 = vadd.f32 %v3896_v9, %v3603_v2  ;;  %v3974_v38 = vadd.f32 %v3973_v12, %v3611_v3  ;;  %v4327_v2 = vld [vmem:[%s6916_s16 + $0x48] sm:$0xff]  ;;  %v4329_v3 = vld [vmem:[%s6916_s16 + $0x58] sm:$0xff] }
0x1086   : > { %v3898_v23 = vpop.f32.mrf.mxu0  ;;  %v3975_v24 = vpop.f32.mrf.mxu1  ;;  %4566 = vmatpush1.xpose.msra.mxu0 %v4338_v6  ;;  %4641 = vmatpush1.xpose.msra.mxu1 %v4340_v7  ;;  %v4328_v7 = vld [vmem:[%s6916_s16 + $0x50] sm:$0xff] }
0x1087   : > { %4567 = vmatprep.subr.mxu0 %v4323_v21  ;;  %4642 = vmatprep.subr.mxu1 %v4325_v22  ;;  %v3899_v28 = vadd.f32 %v3898_v23, %v3607_v49  ;;  %v3976_v29 = vadd.f32 %v3975_v24, %v3615_v50  ;;  %v4306_v47 = vmax.f32 %v3897_v37, 0.0  ;;  %v4308_v48 = vmax.f32 %v3974_v38, 0.0  ;;  %v4379_v23 = vld [vmem:[%s6916_s16 + $0x1e8] sm:$0xff]  ;;  %v4381_v24 = vld [vmem:[%s6916_s16 + $0x1f8] sm:$0xff] }
0x1088   : > { %v7438_v21 = vrot.slane %v7393_v30, %v3606_v39  ;;  %v7443_v22 = vrot.slane %v7393_v30, %v3614_v40 }
0x1089   : > { %v4307_v19 = vmax.f32 %v3899_v28, 0.0  ;;  %v4309_v41 = vmax.f32 %v3976_v29, 0.0 }
0x108a   : > { %v4044_v35 = vpop.f32.mrf.mxu0  ;;  %v4121_v10 = vpop.f32.mrf.mxu1  ;;  %4568 = vmatpush1.xpose.msra.mxu0 %v4322_v26  ;;  %4643 = vmatpush1.xpose.msra.mxu1 %v4324_v27 }
0x108b   : > { %4711 = vmatprep.subr.mxu0 %v4375_v31  ;;  %4786 = vmatprep.subr.mxu1 %v4377_v32  ;;  %v4045_v14 = vadd.f32 %v4044_v35, %v3619_v63  ;;  %v4122_v6 = vadd.f32 %v4121_v10, %v3627_v54  ;;  %v4363_v35 = vld [vmem:[%s6916_s16 + $0x168] sm:$0xff]  ;;  %v4365_v10 = vld [vmem:[%s6916_s16 + $0x178] sm:$0xff] }
0x108c   : > { %v4046_v42 = vpop.f32.mrf.mxu0  ;;  %v4123_v43 = vpop.f32.mrf.mxu1 }
0x108d   : > { %v4047_v11 = vadd.f32 %v4046_v42, %v7400_v33  ;;  %v4124_v44 = vadd.f32 %v4123_v43, %v7405_v34  ;;  %4602 = vmatmul.mubr.f32.vlgmr.msra.gmra.mxu0 %v4290_v36  ;;  %4677 = vmatmul.mubr.f32.vlgmr.msra.gmra.mxu1 %v4292_v8  ;;  %v4294_v26 = vmax.f32 %v4045_v14, 0.0  ;;  %v4296_v27 = vmax.f32 %v4122_v6, 0.0  ;;  %v4347_v42 = vld [vmem:[%s6916_s16 + $0xe8] sm:$0xff]  ;;  %v4349_v43 = vld [vmem:[%s6916_s16 + $0xf8] sm:$0xff] }
0x108e   : > { %4606 = vmatprep.mubr.f32.mxu0 %v4307_v19  ;;  %4681 = vmatprep.mubr.f32.mxu1 %v4309_v41  ;;  %v4362_v19 = vld [vmem:[%s6916_s16 + $0x160] sm:$0xff]  ;;  %v4364_v41 = vld [vmem:[%s6916_s16 + $0x170] sm:$0xff] }
0x108f   : > { %4712 = vmatpush1.xpose.msra.mxu0 %v4374_v15  ;;  %4787 = vmatpush1.xpose.msra.mxu1 %v4376_v20  ;;  %v4295_v49 = vmax.f32 %v4047_v11, 0.0  ;;  %v4297_v50 = vmax.f32 %v4124_v44, 0.0  ;;  %v3635_v11 = vrot.slane %v7393_v30, %v3602_v58  ;;  %v3643_v44 = vrot.slane %v7393_v30, %v3610_v59 }
0x1090   : > { %v4050_v51 = vpop.f32.mrf.mxu0  ;;  %v4127_v52 = vpop.f32.mrf.mxu1  ;;  %4713 = vmatprep.subr.mxu0 %v4359_v45  ;;  %4788 = vmatprep.subr.mxu1 %v4361_v46  ;;  %v4346_v45 = vld [vmem:[%s6916_s16 + $0xe0] sm:$0xff]  ;;  %v4348_v46 = vld [vmem:[%s6916_s16 + $0xf0] sm:$0xff] }
0x1091   : > { %4607 = vmatmul.mubr.f32.gmra.mxu0 %v4306_v47  ;;  %4682 = vmatmul.mubr.f32.gmra.mxu1 %v4308_v48  ;;  %v4051_v28 = vadd.f32 %v4050_v51, %v3619_v63  ;;  %v4128_v39 = vadd.f32 %v4127_v52, %v3627_v54  ;;  %v4331_v47 = vld [vmem:[%s6916_s16 + $0x68] sm:$0xff]  ;;  %v4333_v48 = vld [vmem:[%s6916_s16 + $0x78] sm:$0xff]  ;;  %v4332_v52 = vld [vmem:[%s6916_s16 + $0x70] sm:$0xff] }
0x1092   : > { %v4052_v60 = vpop.f32.mrf.mxu0  ;;  %v4129_v61 = vpop.f32.mrf.mxu1  ;;  %4751 = vmatprep.mubr.f32.mxu0 %v4295_v49  ;;  %4826 = vmatprep.mubr.f32.mxu1 %v4297_v50 }
0x1093   : > { %4714 = vmatpush1.xpose.msra.mxu0 %v4358_v53  ;;  %4789 = vmatpush1.xpose.msra.mxu1 %v4360_v55  ;;  %v4053_v9 = vadd.f32 %v4052_v60, %v7400_v33  ;;  %v4130_v12 = vadd.f32 %v4129_v61, %v7405_v34  ;;  %v4378_v33 = vld [vmem:[%s6916_s16 + $0x1e0] sm:$0xff]  ;;  %v4380_v34 = vld [vmem:[%s6916_s16 + $0x1f0] sm:$0xff]  ;;  %v4310_v36 = vmax.f32 %v4051_v28, 0.0  ;;  %v4312_v8 = vmax.f32 %v4128_v39, 0.0 }
0x1094   : > { %4715 = vmatprep.subr.mxu0 %v4343_v56  ;;  %4790 = vmatprep.subr.mxu1 %v4345_v57 }
0x1095   : > { %v4311_v29 = vmax.f32 %v4053_v9, 0.0  ;;  %v4313_v31 = vmax.f32 %v4130_v12, 0.0 }
0x1096   : > { %v7427_v62 = vpop.f32.mrf.mxu0  ;;  %v7429_v5 = vpop.f32.mrf.mxu1 }
0x1097   : > { %4716 = vmatpush1.xpose.msra.mxu0 %v4342_v0  ;;  %4791 = vmatpush1.xpose.msra.mxu1 %v4344_v1  ;;  %v4199_v51 = vadd.f32 %v7427_v62, %v3635_v11  ;;  %v4276_v58 = vadd.f32 %v7429_v5, %v3643_v44 }
0x1098   : > { %4717 = vmatprep.subr.mxu0 %v4327_v2  ;;  %4792 = vmatprep.subr.mxu1 %v4329_v3  ;;  %v4200_v18 = vpop.f32.mrf.mxu0  ;;  %v4277_v25 = vpop.f32.mrf.mxu1 }
0x1099   : > { %v4201_v40 = vadd.f32 %v4200_v18, %v7438_v21  ;;  %v4278_v32 = vadd.f32 %v4277_v25, %v7443_v22  ;;  %v4298_v53 = vmax.f32 %v4199_v51, 0.0  ;;  %v4300_v55 = vmax.f32 %v4276_v58, 0.0  ;;  %v5522_v18 = vld [vmem:[%s6924_s21 + $0x8] ss:$0 sm:$0xff] }
0x109a   : > { %v4204_v15 = vpop.f32.mrf.mxu0  ;;  %v4281_v20 = vpop.f32.mrf.mxu1 }
0x109b   : > { %4718 = vmatpush1.xpose.msra.mxu0 %v4326_v16  ;;  %4793 = vmatpush1.xpose.msra.mxu1 %v4328_v7  ;;  %v4299_v37 = vmax.f32 %v4201_v40, 0.0  ;;  %v4301_v38 = vmax.f32 %v4278_v32, 0.0  ;;  %v4205_v56 = vadd.f32 %v4204_v15, %v3635_v11  ;;  %v4282_v57 = vadd.f32 %v4281_v20, %v3643_v44 }
0x109c   : > { %4861 = vmatprep.subr.mxu0 %v4379_v23  ;;  %4936 = vmatprep.subr.mxu1 %v4381_v24  ;;  %v4206_v49 = vpop.f32.mrf.mxu0  ;;  %v4283_v50 = vpop.f32.mrf.mxu1 }
0x109d   : > { %v4207_v59 = vadd.f32 %v4206_v49, %v7438_v21  ;;  %v4284_v30 = vadd.f32 %v4283_v50, %v7443_v22  ;;  %v4314_v63 = vmax.f32 %v4205_v56, 0.0  ;;  %v4316_v54 = vmax.f32 %v4282_v57, 0.0 }
0x109e   : > { %4752 = vmatmul.mubr.f32.vlgmr.msra.gmra.mxu0 %v4294_v26  ;;  %4827 = vmatmul.mubr.f32.vlgmr.msra.gmra.mxu1 %v4296_v27 }
0x109f   : > { %4756 = vmatprep.mubr.f32.mxu0 %v4311_v29  ;;  %4831 = vmatprep.mubr.f32.mxu1 %v4313_v31  ;;  %v4315_v60 = vmax.f32 %v4207_v59, 0.0  ;;  %v4317_v61 = vmax.f32 %v4284_v30, 0.0 }
0x10a0   : > { %4862 = vmatpush1.xpose.msra.mxu0 %v4378_v33  ;;  %4937 = vmatpush1.xpose.msra.mxu1 %v4380_v34 }
0x10a1   : > { %4863 = vmatprep.subr.mxu0 %v4363_v35  ;;  %4938 = vmatprep.subr.mxu1 %v4365_v10 }
0x10a2   : > { %4757 = vmatmul.mubr.f32.gmra.mxu0 %v4310_v36  ;;  %4832 = vmatmul.mubr.f32.gmra.mxu1 %v4312_v8 }
0x10a3   : > { %4901 = vmatprep.mubr.f32.mxu0 %v4299_v37  ;;  %4976 = vmatprep.mubr.f32.mxu1 %v4301_v38 }
0x10a4   : > { %4864 = vmatpush1.xpose.msra.mxu0 %v4362_v19  ;;  %4939 = vmatpush1.xpose.msra.mxu1 %v4364_v41 }
0x10a5   : > { %4865 = vmatprep.subr.mxu0 %v4347_v42  ;;  %4940 = vmatprep.subr.mxu1 %v4349_v43 }
0x10a8   : > { %4866 = vmatpush1.xpose.msra.mxu0 %v4346_v45  ;;  %4941 = vmatpush1.xpose.msra.mxu1 %v4348_v46 }
0x10a9   : > { %4867 = vmatprep.subr.mxu0 %v4331_v47  ;;  %4942 = vmatprep.subr.mxu1 %v4333_v48 }
0x10ac   : > { %4868 = vmatpush1.xpose.msra.mxu0 %v4330_v13  ;;  %4943 = vmatpush1.xpose.msra.mxu1 %v4332_v52 }
0x10af   : > { %4902 = vmatmul.mubr.f32.vlgmr.msra.gmra.mxu0 %v4298_v53  ;;  %4977 = vmatmul.mubr.f32.vlgmr.msra.gmra.mxu1 %v4300_v55 }
0x10b0   : > { %4906 = vmatprep.mubr.f32.mxu0 %v4315_v60  ;;  %4981 = vmatprep.mubr.f32.mxu1 %v4317_v61 }
0x10b3   : > { %4907 = vmatmul.mubr.f32.gmra.mxu0 %v4314_v63  ;;  %4982 = vmatmul.mubr.f32.gmra.mxu1 %v4316_v54 }
0x113b   : > { %v4453_v0 = vpop.f32.mrf.mxu0  ;;  %v4528_v1 = vpop.f32.mrf.mxu1 }
0x113c   : > { %v4454_v25 = vadd.f32 %v5522_v18, %v4453_v0 }
0x113d   : > { %v4455_v2 = vpop.f32.mrf.mxu0  ;;  %v4530_v3 = vpop.f32.mrf.mxu1 }
0x113e   : > { %v4529_v29 = vadd.f32 %v4528_v1, %v4454_v25 }
0x1140   : > { %v4458_v62 = vpop.f32.mrf.mxu0  ;;  %v4533_v5 = vpop.f32.mrf.mxu1 }
0x1141   : > { %v4459_v31 = vadd.f32 %v5522_v18, %v4458_v62 }
0x1142   : > { %v4460_v14 = vpop.f32.mrf.mxu0  ;;  %v4535_v6 = vpop.f32.mrf.mxu1 }
0x1143   : > { %v4534_v10 = vadd.f32 %v4533_v5, %v4459_v31  ;;  %v5523_v5 = vld [vmem:[%s6924_s21 + $0xd] ss:$0 sm:$0xff] }
0x114d   : > { %v4603_v16 = vpop.f32.mrf.mxu0  ;;  %v4678_v7 = vpop.f32.mrf.mxu1 }
0x114e   : > { %v4604_v33 = vadd.f32 %v4603_v16, %v4529_v29  ;;  %v5524_v16 = vld [vmem:[%s6924_s21 + $0xe] ss:$0 sm:$0xff] }
0x114f   : > { %v4605_v9 = vpop.f32.mrf.mxu0  ;;  %v4680_v12 = vpop.f32.mrf.mxu1 }
0x1150   : > { %v4679_v36 = vadd.f32 %v4678_v7, %v4604_v33 }
0x1151   : > { %v4608_v21 = vpop.f32.mrf.mxu0  ;;  %v4683_v22 = vpop.f32.mrf.mxu1 }
0x1152   : > { %v4609_v8 = vadd.f32 %v4608_v21, %v4534_v10 }
0x1153   : > { %v4610_v23 = vpop.f32.mrf.mxu0  ;;  %v4685_v24 = vpop.f32.mrf.mxu1 }
0x1154   : > { %v4684_v38 = vadd.f32 %v4683_v22, %v4609_v8 }
0x115e   : > { %v4753_v26 = vpop.f32.mrf.mxu0  ;;  %v4828_v27 = vpop.f32.mrf.mxu1 }
0x115f   : > { %v4754_v37 = vadd.f32 %v4753_v26, %v4679_v36 }
0x1160   : > { %v4755_v28 = vpop.f32.mrf.mxu0  ;;  %v4830_v39 = vpop.f32.mrf.mxu1 }
0x1161   : > { %v4829_v19 = vadd.f32 %v4828_v27, %v4754_v37 }
0x1162   : > { %v4758_v40 = vpop.f32.mrf.mxu0  ;;  %v4833_v32 = vpop.f32.mrf.mxu1 }
0x1163   : > { %v4759_v41 = vadd.f32 %v4758_v40, %v4684_v38 }
0x1164   : > { %v4760_v34 = vpop.f32.mrf.mxu0  ;;  %v4835_v35 = vpop.f32.mrf.mxu1 }
0x1165   : > { %v4834_v44 = vadd.f32 %v4833_v32, %v4759_v41 }
0x116f   : > { %v4903_v42 = vpop.f32.mrf.mxu0  ;;  %v4978_v43 = vpop.f32.mrf.mxu1 }
0x1170   : > { %v4904_v15 = vadd.f32 %v4903_v42, %v4829_v19 }
0x1171   : > { %v4905_v20 = vpop.f32.mrf.mxu0  ;;  %v4980_v11 = vpop.f32.mrf.mxu1 }
0x1172   : > { %v4979_v45 = vadd.f32 %v4978_v43, %v4904_v15 }
0x1173   : > { %v4908_v46 = vpop.f32.mrf.mxu0  ;;  %v4983_v47 = vpop.f32.mrf.mxu1 }
0x1174   : > { %v4909_v48 = vadd.f32 %v4908_v46, %v4834_v44  ;;  %v4987_v49 = vadd.f32 %v4979_v45, %v7226_v4 }
0x1175   : > { %v4910_v50 = vpop.f32.mrf.mxu0  ;;  %v4985_v51 = vpop.f32.mrf.mxu1 }
0x1176   : > { %v4984_v58 = vadd.f32 %v4983_v47, %v4909_v48  ;;  %v4991_v13 = vsel %vm869_vm2, %v4987_v49, 0.0 }
0x1177   : > { %4992 = vadd.xlane.f32.xlu1 %v4991_v13 }
0x1178   : > { %v4988_v52 = vadd.f32 %v4984_v58, %v7239_v17 }
0x117a   : > { %v4994_v59 = vsel %vm869_vm2, %v4988_v52, 0.0 }
0x117b   : > { %4995 = vadd.xlane.f32.xlu0 %v4994_v59 }
0x1200   : > { %v4993_v30 = vpop.xlane.xlu1 %4992 }
0x1201   : > { %v4997_v53 = vmul.f32 0.03125, %v4993_v30 }
0x1203   : > { %v4999_v55 = vsub.f32 %v4987_v49, %v4997_v53 }
0x1204   : > { %v4996_v56 = vpop.xlane.xlu0 %4995 }
0x1205   : > { %v4998_v57 = vmul.f32 0.03125, %v4996_v56  ;;  %v5001_v60 = vmul.f32 %v4999_v55, %v4999_v55 }
0x1207   : > { %v5000_v61 = vsub.f32 %v4988_v52, %v4998_v57  ;;  %v5003_v4 = vsel %vm869_vm2, %v5001_v60, 0.0 }
0x1208   : > { %5004 = vadd.xlane.f32.xlu1 %v5003_v4 }
0x1209   : > { %v5002_v63 = vmul.f32 %v5000_v61, %v5000_v61 }
0x120b   : > { %v5006_v54 = vsel %vm869_vm2, %v5002_v63, 0.0 }
0x120c   : > { %5007 = vadd.xlane.f32.xlu0 %v5006_v54 }
0x1291   : > { %v5005_v17 = vpop.xlane.xlu1 %5004 }
0x1292   : > { %v5009_v0 = vmul.f32 0.03125, %v5005_v17 }
0x1294   : > { %v5011_v1 = vadd.f32 1e-05, %v5009_v0 }
0x1295   : > { %v5008_v2 = vpop.xlane.xlu0 %5007 }
0x1296   : > { %6042 = vrsqrt.f32 %v5011_v1  ;;  %v5010_v3 = vmul.f32 0.03125, %v5008_v2 }
0x1298   : > { %v5012_v62 = vadd.f32 1e-05, %v5010_v3 }
0x129a   : > { %6044 = vrsqrt.f32 %v5012_v62 }
0x12a3   : > { %v6043_v14 = vpop.eup %6042 }
0x12a4   : > { %v5019_v6 = vmul.f32 %v6043_v14, %v5523_v5 }
0x12a6   : > { %v5021_v7 = vmul.f32 %v5019_v6, %v4999_v55 }
0x12a7   : > { %v6045_v9 = vpop.eup %6044 }
0x12a8   : > { %v5027_v12 = vadd.f32 %v5524_v16, %v5021_v7  ;;  %v5020_v21 = vmul.f32 %v6045_v9, %v5523_v5 }
0x12aa   : > { %5029 = vst.msk [vmem:[#allocation2] sm:$0xff] %vm869_vm2, %v5027_v12  ;;  %v5022_v22 = vmul.f32 %v5020_v21, %v5000_v61  ;;  %5034 = sbr.rel (%p5525_p8) target bundleno = 4990 (0x137e), region = 120 }
0x12ac   : > { %v5028_v23 = vadd.f32 %v5524_v16, %v5022_v22 }
0x12ae   : > { %5030 = vst.msk [vmem:[#allocation2 + $0x8] sm:$0xff] %vm869_vm2, %v5028_v23 }
0x12af   : > { %5035 = vst.msk [vmem:[#allocation21] sm:$0xff] %vm869_vm2, %v5027_v12  ;;  %5036 = vst.msk [vmem:[#allocation21 + $0x8] sm:$0xff] %vm869_vm2, %v5028_v23  ;;  %v5040_v24 = vld [vmem:[%s7617_s29 + $0x18] sm:$0xff]  ;;  %v5039_v18 = vld [vmem:[%s7618_s6 + $0x10] sm:$0xff]  ;;  %5834 = vmatprep.mubr.msk.f32.mxu0 %vm869_vm2, %v5027_v12  ;;  %vm5127_vm6 = vcmask 97280  }
0x12b0   : > { %5826 = vmatprep.subr.mxu0 %v5040_v24  ;;  %v5038_v25 = vld [vmem:[%s7618_s6 + $0x8] sm:$0xff]  ;;  %v5037_v26 = vld [vmem:[%s7618_s6] sm:$0xff] }
0x12b1   : > { %5827 = vmatpush3.msra.mxu0 %v5040_v24  ;;  %v5526_v27 = vld [vmem:[%s7619_s3 + $0x1] ss:$0 sm:$0xff] }
0x12b2   : > { %5828 = vmatprep.subr.mxu0 %v5039_v18 }
0x12b3   : > { %5829 = vmatpush3.msra.mxu0 %v5039_v18 }
0x12b4   : > { %5830 = vmatprep.subr.mxu0 %v5038_v25 }
0x12b5   : > { %5831 = vmatpush3.msra.mxu0 %v5038_v25 }
0x12b6   : > { %5832 = vmatprep.subr.mxu0 %v5037_v26 }
0x12b7   : > { %5833 = vmatpush3.msra.mxu0 %v5037_v26 }
0x12b8   : > { %5835 = vmatmul.mubr.msk.f32.vlgmr.msra.gmra.mxu0 %vm869_vm2, %v5028_v23 }
0x1378   : > { %v5836_v28 = vpop.f32.mrf.mxu0 }
0x1379   : > { %v5124_v39 = vadd.f32 %v5836_v28, %v5526_v27 }
0x137a   : > { %v5118_v29 = vpop.f32.mrf.mxu0 }
0x137b   : > { %5129 = vst.msk [vmem:[#allocation20 + $0x8] sm:$0xff] %vm5127_vm6, %v5124_v39  ;;  %v5119_v31 = vadd.f32 %v5526_v27, %v5118_v29 }
0x137d   : > { %5128 = vst.msk [vmem:[#allocation20] sm:$0xff] %vm5127_vm6, %v5119_v31 }
0x137e PF: > { %s7620_s24 = sld [smem:[#allocation33_spill]]  ;;  %s6459_s22 = smov [#allocation20]  }
0x137f   : > { %s5136_s17 = sshll.u32 %s6459_s22, 4  ;;  %s5137_s17 = int_to_ptr.vmem [resolvable:$true] %s5136_s17 }
0x1380   : > { %s6320_s27 = scalar_lea.vmem %s5137_s17, 256  ;;  %p6327_p12 = scmp.lt.s32.totalorder %s5137_s17, %s5137_s17 }
0x1381   : > { %p6321_p10 = scmp.ne.s32.totalorder %s5137_s17, %s6320_s27  ;;  %p6328_p5 = scmp.lt.s32.totalorder %s6320_s27, %s6320_s27 }
0x1383   : > { %p6329_p3 = por %p6328_p5, %p6327_p12 }
0x1384   : > { %p5910_p2 = scmp.eq.s32.totalorder %s7620_s24, 1 }
0x1386   : > { %p6322_p13 = pnand %p6321_p10, %p5910_p2 }
0x1388   : > { %p6323_p1 = pneg %p6322_p13 }
0x138a   : > { %p6330_p6 = pnand %p6329_p3, %p6323_p1 }
0x138c   : > { %6333 = shalt.err (!%p6330_p6)
}
0x138d   : > { %s6460_s30 = smov 128   ;;  %s6461_s26 = smov 8  }
0x138e   : > { %s7621_s23 = sld [smem:[#allocation44_spill]]  ;;  %s6462_s5 = smov [#allocation21]  }
0x138f   : > { %s5149_s8 = sshll.u32 %s6462_s5, 4  ;;  %s5150_s8 = int_to_ptr.vmem [resolvable:$true] %s5149_s8 }
0x1390   : > { %s6344_s19 = scalar_lea.vmem %s5150_s8, 256  ;;  %p6351_p4 = scmp.lt.s32.totalorder %s5150_s8, %s5150_s8 }
0x1391   : > { %p6345_p7 = scmp.ne.s32.totalorder %s5150_s8, %s6344_s19  ;;  %p6352_p9 = scmp.lt.s32.totalorder %s6344_s19, %s6344_s19 }
0x1393   : > { %p6346_p11 = pnand %p6345_p7, %p5910_p2  ;;  %p6353_p8 = por %p6352_p9, %p6351_p4 }
0x1394   : > { %5864 = dma.vmem_to_hbm [thread:$0]  (%p5910_p2), %s5137_s17, 256, %s7621_s23, [#allocation5], %s6460_s30, %s6460_s30, %s6461_s26  }
0x1395   : > { %p6347_p0 = pneg %p6346_p11 }
0x1397   : > { %p6354_p10 = pnand %p6353_p8, %p6347_p0 }
0x1399   : > { %6357 = shalt.err (!%p6354_p10)
}
0x139a   : > { %s7622_s16 = sld [smem:[#allocation45_spill]] }
0x13a0   : > { %5866 = dma.vmem_to_hbm [thread:$0]  (%p5910_p2), %s5150_s8, 256, %s7622_s16, [#allocation22], %s6460_s30, %s6460_s30, %s6461_s26  }
0x13a1   : > { %6409 = dma.done.wait (%p5910_p2), [#allocation5], 256  }
0x13a2   : > { %6411 = vsyncadd (%p5910_p2), [#allocation5], 4294967040 }
0x13a3   : > { %6413 = dma.done.wait (%p5910_p2), [#allocation22], 256  }
0x13a4   : > { %6415 = vsyncadd (%p5910_p2), [#allocation22], 4294967040 }
0x13a5 PF: > { %s7623_s16 = sld [smem:[#allocation34_spill]] }
0x13a6   : > { %s7624_s29 = sld [smem:[#allocation31_spill]] }
0x13a7   : > { %s7625_s30 = sld [smem:[#allocation32_spill]] }
0x13a8   : > { %s7626_s15 = sld [smem:[#allocation35_spill]] }
0x13ab   : > { %p38_p13 = scmp.ge.s32.totalorder %s7623_s16, 4  }
0x13ad   :  { %40 = sbr.rel (!%p38_p13) target bundleno = 22 (0x16), region = 213 }
0x13b2   :  { %5169 = vsyncpa [#allocation4], 1 }
0x13b3   :  { %5171 = vsyncpa [#allocation4 + $0x1], 1 }
0x13b4   :  { %5172 = vsyncpa [#allocation7], 1 }
0x13b5   :  { %5173 = vsyncpa [#allocation10], 1 }
0x13b6   :  { %5175 = vsyncpa [#allocation10 + $0x1], 1 }
0x13b7   :  { %5176 = vsyncpa [#allocation13], 1 }
0x13b8   :  { %5178 = vsyncpa [#allocation13 + $0x1], 1 }
0x13b9   :  { %5179 = vsyncpa [#allocation16], 1 }
0x13ba   :  { %5181 = vsyncpa [#allocation16 + $0x1], 1 }
0x13bb   :  { %5182 = vsyncpa [#allocation19], 1 }
0x13bc   :  { %5184 = vsyncpa [#allocation19 + $0x1], 1 }
0x13bd   :  { %5185 = vsyncpa [#allocation5], 1 }
0x13be   :  { %5187 = vsyncpa [#allocation5 + $0x1], 1 }
0x13bf   :  { %5188 = vsyncpa [#allocation22], 1 }

</bundles_post_ra>
